<compile_context>
chip_gen: v7x
topology: tpu7x:2x2x1
jax: 0.10.0
libtpu: 0.0.40
codegen_flags: <defaults>
</compile_context>

<pallas_src>
import functools

import jax
import jax.numpy as jnp
import numpy as np
from jax.experimental import pallas as pl
from jax.experimental.pallas import tpu as pltpu

EPS = 1e-5
HALF = 128          # lane offset of the odd-column half (vreg aligned)
NEG_PAD = -1e30     # padding logit value: exp() underflows to 0 in log_softmax


# --------------------------------- kernel ------------------------------------

def mnist_kernel(x_ref, t1_ref, b1_ref, g1_ref, bl1_ref, gm1_ref, ex1_ref,
                 t2_ref, b2_ref, g2_ref, bl2_ref, gm2_ref, ex2_ref,
                 fw1_ref, fb1_ref, fw2_ref, fb2_ref, out_ref):
    x = x_ref[...]                                   # (B, 28, 28) rows=H lanes=W
    bsz = x.shape[0]

    def batchnorm(y, n, g_ref, bl_ref, gm_ref, ex_ref):
        """Training-mode BN over packed (w, c) lanes, single-pass stats (f32)."""
        # [sum(y); sum(y*y)] per lane in one reduction; the concat is along the
        # untiled major axis (free), then ONE per-channel reduction matmul.
        yy = jnp.concatenate([y, y * y], axis=0)               # (2B, R, 128)
        s12 = jnp.sum(yy.reshape(2, -1, HALF), axis=1)         # (2, 128)
        sums_c = jnp.dot(s12, gm_ref[...],
                         preferred_element_type=jnp.float32)   # (2, c)
        inv_n = 1.0 / n
        mean_c = sums_c[0:1] * inv_n
        var_c = jnp.maximum(sums_c[1:2] * inv_n - mean_c * mean_c, 0.0)
        scale_c = g_ref[...] * jax.lax.rsqrt(var_c + EPS)
        # One-hot lane expansion of mean / scale; beta is pre-expanded (hoisted).
        mean_l = jnp.dot(mean_c, ex_ref[...], preferred_element_type=jnp.float32)
        scale_l = jnp.dot(scale_c, ex_ref[...], preferred_element_type=jnp.float32)
        return y * scale_l + (bl_ref[...] - mean_l * scale_l)

    # conv1: ONE bf16 MXU matmul; K = 140 fused im2col lanes, N = 256.
    # Output lane n encodes (output column j, out channel o):
    #   even j -> n = (j//2)*10 + o ; odd j -> n = 128 + (j//2)*10 + o.
    rows1 = jnp.concatenate([x[:, kh:kh + 24, :] for kh in range(5)],
                            axis=-1).reshape(bsz * 24, 140)
    acc1 = jnp.dot(rows1.astype(jnp.bfloat16), t1_ref[...],
                   preferred_element_type=jnp.float32) + b1_ref[...]  # (B*24,256)

    # maxpool 2x2: H via reshape+max, W via ONE max of the two aligned halves.
    a = jnp.max(acc1.reshape(bsz, 12, 2, 256), axis=2)            # (B, 12, 256)
    a = jnp.maximum(a[:, :, 0:HALF], a[:, :, HALF:2 * HALF])      # (B, 12, 128)
    y = jnp.maximum(a, 0.0)                                       # relu
    y = batchnorm(y, float(bsz * 12 * 12), g1_ref, bl1_ref, gm1_ref, ex1_ref)

    # conv2: ONE bf16 MXU matmul; K = 640 (five 128-lane aligned chunks).
    rows2 = jnp.concatenate([y[:, kh:kh + 8, :] for kh in range(5)],
                            axis=-1).reshape(bsz * 8, 640)
    acc2 = jnp.dot(rows2.astype(jnp.bfloat16), t2_ref[...],
                   preferred_element_type=jnp.float32) + b2_ref[...]  # (B*8, 256)

    a = jnp.max(acc2.reshape(bsz, 4, 2, 256), axis=2)             # (B, 4, 256)
    a = jnp.maximum(a[:, :, 0:HALF], a[:, :, HALF:2 * HALF])      # (B, 4, 128)
    z = jnp.maximum(a, 0.0)
    z = batchnorm(z, float(bsz * 4 * 4), g2_ref, bl2_ref, gm2_ref, ex2_ref)

    # fc1 (ONE K=512 matmul; torch's channel-major x.view(-1, 320) is folded
    # into the packed weight) -> relu -> fc2 -> log_softmax, all lane-dense.
    zz = jnp.concatenate([z[:, h:h + 1, :] for h in range(4)],
                         axis=-1).reshape(bsz, 4 * HALF)           # (B, 512)
    h1 = jnp.dot(zz.astype(jnp.bfloat16), fw1_ref[...],
                 preferred_element_type=jnp.float32) + fb1_ref[...]  # (B, 128)
    h1 = jnp.maximum(h1, 0.0)
    logits = jnp.dot(h1.astype(jnp.bfloat16), fw2_ref[...],
                     preferred_element_type=jnp.float32) + fb2_ref[...]
    m = jnp.max(logits, axis=-1, keepdims=True)    # padding lanes sit at -1e30
    s = logits - m
    lse = jnp.log(jnp.sum(jnp.exp(s), axis=-1, keepdims=True))
    out_ref[...] = s - lse                                         # (B, 128)


# ------------------------ one-time parameter repacking ------------------------

def prepare_params(params):
    """Repack PyTorch-layout params into the kernel layout (host, runs once)."""
    p = {k: np.asarray(v, np.float32) for k, v in params.items()}

    # conv1 (OIHW (10,1,5,5)) -> ONE Toeplitz slab (140, 256);
    # row = kh*28 + input column, lane = packed (output column j, channel o).
    w1 = p["conv1_w"]
    t1 = np.zeros((5, 28, 256), np.float32)
    b1 = np.zeros((1, 256), np.float32)
    for j in range(24):                               # output column
        base = (j // 2) * 10 + (128 if j % 2 else 0)
        b1[0, base:base + 10] = p["conv1_b"]
        for kh in range(5):
            for kw in range(5):
                t1[kh, j + kw, base:base + 10] = w1[:, 0, kh, kw]
    t1 = t1.reshape(140, 256)

    # conv2 (OIHW (20,10,5,5)) -> ONE slab (640, 256); row = kh*128 + w*10 + c.
    w2 = p["conv2_w"]
    t2 = np.zeros((5, 128, 256), np.float32)
    b2 = np.zeros((1, 256), np.float32)
    for j in range(8):
        base = (j // 2) * 20 + (128 if j % 2 else 0)
        b2[0, base:base + 20] = p["conv2_b"]
        for kh in range(5):
            for kw in range(5):
                w = j + kw
                for c in range(10):
                    t2[kh, w * 10 + c, base:base + 20] = w2[:, c, kh, kw]
    t2 = t2.reshape(640, 256)

    # One-hot lane<->channel matrices for the packed-lane BatchNorm stats.
    def group_mats(c_num, valid):
        lanes = np.arange(128)
        g = np.zeros((128, c_num), np.float32)
        for c in range(c_num):
            g[(lanes < valid) & (lanes % c_num == c), c] = 1.0
        return g, np.ascontiguousarray(g.T)

    gm1, ex1 = group_mats(10, 120)
    gm2, ex2 = group_mats(20, 80)

    # Hoisted lane-expanded BN betas (input-invariant).
    bl1 = p["bn1_beta"].reshape(1, 10) @ ex1          # (1, 128)
    bl2 = p["bn2_beta"].reshape(1, 20) @ ex2          # (1, 128)

    # fc1: fold torch's NCHW flatten (col = c*16 + h*4 + w) into one (512, 128)
    # slab; row = h*128 + w*20 + c (the packed pooled-conv2 lane).  Cols >=50: 0.
    fw1 = np.zeros((512, 128), np.float32)
    for h in range(4):
        for w in range(4):
            for c in range(20):
                fw1[h * 128 + w * 20 + c, :50] = p["fc1_w"][:, c * 16 + h * 4 + w]
    fb1 = np.zeros((1, 128), np.float32)
    fb1[0, :50] = p["fc1_b"]

    # fc2: lane-dense (128, 128); padding logits pinned to NEG_PAD via the bias
    # so the in-kernel log_softmax over 128 lanes matches the 10-class one.
    fw2 = np.zeros((128, 128), np.float32)
    fw2[:50, :10] = p["fc2_w"].T
    fb2 = np.full((1, 128), NEG_PAD, np.float32)
    fb2[0, :10] = p["fc2_b"]

    bf16 = lambda a: jnp.asarray(a, jnp.bfloat16)     # MXU operand slabs
    f32 = lambda a: jnp.asarray(a, jnp.float32)
    return dict(
        t1=bf16(t1), b1=f32(b1),
        g1=f32(p["bn1_gamma"].reshape(1, 10)), bl1=f32(bl1),
        gm1=f32(gm1), ex1=f32(ex1),
        t2=bf16(t2), b2=f32(b2),
        g2=f32(p["bn2_gamma"].reshape(1, 20)), bl2=f32(bl2),
        gm2=f32(gm2), ex2=f32(ex2),
        fw1=bf16(fw1), fb1=f32(fb1), fw2=bf16(fw2), fb2=f32(fb2),
    )


# --------------------------------- wrapper -----------------------------------

@jax.jit
def mnist_forward(prepped, x_nchw):
    b = x_nchw.shape[0]
    x = x_nchw.reshape(b, 28, 28)        # NCHW with C == 1: pure reshape
    vmem = functools.partial(pl.BlockSpec, memory_space=pltpu.MemorySpace.VMEM)
    args = (x,
            prepped["t1"], prepped["b1"], prepped["g1"], prepped["bl1"],
            prepped["gm1"], prepped["ex1"],
            prepped["t2"], prepped["b2"], prepped["g2"], prepped["bl2"],
            prepped["gm2"], prepped["ex2"],
            prepped["fw1"], prepped["fb1"], prepped["fw2"], prepped["fb2"])
    out = pl.pallas_call(
        mnist_kernel,
        out_shape=jax.ShapeDtypeStruct((b, HALF), jnp.float32),  # lane-dense
        in_specs=[vmem() for _ in args],
        out_specs=vmem(),
    )(*args)
    return out[:, :10]


# ------------------------- deterministic parameters --------------------------

def init_params(key):
    ks = jax.random.split(key, 12)
    n = lambda k, s, sc: sc * jax.random.normal(k, s, jnp.float32)
    return {
        "conv1_w": n(ks[0], (10, 1, 5, 5), 0.2),
        "conv1_b": n(ks[1], (10,), 0.1),
        "bn1_gamma": 1.0 + n(ks[2], (10,), 0.1),
        "bn1_beta": n(ks[3], (10,), 0.1),
        "conv2_w": n(ks[4], (20, 10, 5, 5), 0.1),
        "conv2_b": n(ks[5], (20,), 0.1),
        "bn2_gamma": 1.0 + n(ks[6], (20,), 0.1),
        "bn2_beta": n(ks[7], (20,), 0.1),
        "fc1_w": n(ks[8], (50, 320), 0.05),
        "fc1_b": n(ks[9], (50,), 0.1),
        "fc2_w": n(ks[10], (10, 50), 0.1),
        "fc2_b": n(ks[11], (10,), 0.1),
    }


# --------------------------- pure-JAX reference -------------------------------

def mnist_reference(params, x):
    def conv(x, w, bias):
        out = jax.lax.conv_general_dilated(
            x, w, (1, 1), "VALID", dimension_numbers=("NCHW", "OIHW", "NCHW"))
        return out + bias[None, :, None, None]

    def pool(x):
        return jax.lax.reduce_window(x, -jnp.inf, jax.lax.max,
                                     (1, 1, 2, 2), (1, 1, 2, 2), "VALID")

    def bn(x, g, bt):
        m = jnp.mean(x, axis=(0, 2, 3), keepdims=True)
        v = jnp.mean((x - m) ** 2, axis=(0, 2, 3), keepdims=True)
        return ((x - m) / jnp.sqrt(v + EPS)) * g[None, :, None, None] \
            + bt[None, :, None, None]

    x = bn(jax.nn.relu(pool(conv(x, params["conv1_w"], params["conv1_b"]))),
           params["bn1_gamma"], params["bn1_beta"])
    x = bn(jax.nn.relu(pool(conv(x, params["conv2_w"], params["conv2_b"]))),
           params["bn2_gamma"], params["bn2_beta"])
    x = x.reshape(x.shape[0], 320)
    x = jax.nn.relu(x @ params["fc1_w"].T + params["fc1_b"])
    x = x @ params["fc2_w"].T + params["fc2_b"]
    return jax.nn.log_softmax(x, axis=1)


# ----------------------------------- main -------------------------------------

if __name__ == "__main__":
    key = jax.random.PRNGKey(0)
    pkey, xkey = jax.random.split(key)
    params = init_params(pkey)
    # MNIST geometry is fixed by fc1's input size (320 = 20 * 4 * 4): 1x28x28.
    x = jax.random.normal(xkey, (2, 1, 28, 28), jnp.float32)

    prepped = prepare_params(params)
    out = mnist_forward(prepped, x)
    out = jax.block_until_ready(out)

    ref = mnist_reference(params, x)
    assert out.shape == (2, 10)
    assert bool(jnp.all(jnp.isfinite(out)))
    # Tolerance covers bf16 MXU operands in the kernel and default (non-HIGHEST)
    # MXU precision in the XLA reference.
    assert bool(jnp.allclose(out, ref, atol=5e-2, rtol=5e-2)), (
        "max abs diff %f" % float(jnp.max(jnp.abs(out - ref))))
    print("KERNEL_OK")
</pallas_src>

<mosaic_0001>
module attributes {stable_mosaic.version = 11 : i64} {
  func.func @mnist_kernel(%arg0: memref<2x28x28xf32, #tpu.memory_space<vmem>>, %arg1: memref<140x256xbf16, #tpu.memory_space<vmem>>, %arg2: memref<1x256xf32, #tpu.memory_space<vmem>>, %arg3: memref<1x10xf32, #tpu.memory_space<vmem>>, %arg4: memref<1x128xf32, #tpu.memory_space<vmem>>, %arg5: memref<128x10xf32, #tpu.memory_space<vmem>>, %arg6: memref<10x128xf32, #tpu.memory_space<vmem>>, %arg7: memref<640x256xbf16, #tpu.memory_space<vmem>>, %arg8: memref<1x256xf32, #tpu.memory_space<vmem>>, %arg9: memref<1x20xf32, #tpu.memory_space<vmem>>, %arg10: memref<1x128xf32, #tpu.memory_space<vmem>>, %arg11: memref<128x20xf32, #tpu.memory_space<vmem>>, %arg12: memref<20x128xf32, #tpu.memory_space<vmem>>, %arg13: memref<512x128xbf16, #tpu.memory_space<vmem>>, %arg14: memref<1x128xf32, #tpu.memory_space<vmem>>, %arg15: memref<128x128xbf16, #tpu.memory_space<vmem>>, %arg16: memref<1x128xf32, #tpu.memory_space<vmem>>, %arg17: memref<2x128xf32, #tpu.memory_space<vmem>>) attributes {dimension_semantics = [], scalar_prefetch = 0 : i64, scratch_operands = 0 : i64, tpu.core_type = #tpu.core_type<tc>} {
    %c0 = arith.constant 0 : index
    %c0_0 = arith.constant 0 : index
    %c0_1 = arith.constant 0 : index
    %0 = vector.load %arg0[%c0, %c0_0, %c0_1] : memref<2x28x28xf32, #tpu.memory_space<vmem>>, vector<2x28x28xf32>
    %1 = vector.extract_strided_slice %0 {offsets = [0, 0, 0], sizes = [2, 24, 28], strides = [1, 1, 1]} : vector<2x28x28xf32> to vector<2x24x28xf32>
    %2 = vector.extract_strided_slice %0 {offsets = [0, 1, 0], sizes = [2, 24, 28], strides = [1, 1, 1]} : vector<2x28x28xf32> to vector<2x24x28xf32>
    %3 = vector.extract_strided_slice %0 {offsets = [0, 2, 0], sizes = [2, 24, 28], strides = [1, 1, 1]} : vector<2x28x28xf32> to vector<2x24x28xf32>
    %4 = vector.extract_strided_slice %0 {offsets = [0, 3, 0], sizes = [2, 24, 28], strides = [1, 1, 1]} : vector<2x28x28xf32> to vector<2x24x28xf32>
    %5 = vector.extract_strided_slice %0 {offsets = [0, 4, 0], sizes = [2, 24, 28], strides = [1, 1, 1]} : vector<2x28x28xf32> to vector<2x24x28xf32>
    %6 = tpu.concatenate %1, %2, %3, %4, %5 in 2 : vector<2x24x28xf32>, vector<2x24x28xf32>, vector<2x24x28xf32>, vector<2x24x28xf32>, vector<2x24x28xf32> -> vector<2x24x140xf32>
    %7 = vector.shape_cast %6 : vector<2x24x140xf32> to vector<48x140xf32>
    %8 = arith.truncf %7 : vector<48x140xf32> to vector<48x140xbf16>
    %c0_2 = arith.constant 0 : index
    %c0_3 = arith.constant 0 : index
    %9 = vector.load %arg1[%c0_2, %c0_3] : memref<140x256xbf16, #tpu.memory_space<vmem>>, vector<140x256xbf16>
    %cst = arith.constant dense<0.000000e+00> : vector<48x256xf32>
    %10 = tpu.matmul %8, %9, %cst {dimension_numbers = #tpu.dot_dimension_numbers<[1], [0], [0], [1], [0, 0, 1, 1], [], []>} : vector<48x140xbf16>, vector<140x256xbf16>, vector<48x256xf32> -> vector<48x256xf32>
    %c0_4 = arith.constant 0 : index
    %c0_5 = arith.constant 0 : index
    %11 = vector.load %arg2[%c0_4, %c0_5] : memref<1x256xf32, #tpu.memory_space<vmem>>, vector<1x256xf32>
    %12 = vector.broadcast %11 : vector<1x256xf32> to vector<48x256xf32>
    %13 = arith.addf %10, %12 : vector<48x256xf32>
    %14 = vector.shape_cast %13 : vector<48x256xf32> to vector<2x12x2x256xf32>
    %cst_6 = arith.constant dense<0xFF800000> : vector<2x12x256xf32>
    %15 = vector.multi_reduction <maximumf>, %14, %cst_6 [2] : vector<2x12x2x256xf32> to vector<2x12x256xf32>
    %16 = vector.extract_strided_slice %15 {offsets = [0, 0, 0], sizes = [2, 12, 128], strides = [1, 1, 1]} : vector<2x12x256xf32> to vector<2x12x128xf32>
    %17 = vector.extract_strided_slice %15 {offsets = [0, 0, 128], sizes = [2, 12, 128], strides = [1, 1, 1]} : vector<2x12x256xf32> to vector<2x12x128xf32>
    %18 = arith.maximumf %16, %17 : vector<2x12x128xf32>
    %cst_7 = arith.constant 0.000000e+00 : f32
    %19 = vector.broadcast %cst_7 : f32 to vector<2x12x128xf32>
    %20 = arith.maximumf %18, %19 : vector<2x12x128xf32>
    %21 = arith.mulf %20, %20 : vector<2x12x128xf32>
    %22 = tpu.concatenate %20, %21 in 0 : vector<2x12x128xf32>, vector<2x12x128xf32> -> vector<4x12x128xf32>
    %23 = vector.shape_cast %22 : vector<4x12x128xf32> to vector<2x24x128xf32>
    %cst_8 = arith.constant dense<0.000000e+00> : vector<2x128xf32>
    %24 = vector.multi_reduction <add>, %23, %cst_8 [1] : vector<2x24x128xf32> to vector<2x128xf32>
    %c0_9 = arith.constant 0 : index
    %c0_10 = arith.constant 0 : index
    %25 = vector.load %arg5[%c0_9, %c0_10] : memref<128x10xf32, #tpu.memory_space<vmem>>, vector<128x10xf32>
    %cst_11 = arith.constant dense<0.000000e+00> : vector<2x10xf32>
    %26 = tpu.matmul %24, %25, %cst_11 {dimension_numbers = #tpu.dot_dimension_numbers<[1], [0], [0], [1], [0, 0, 1, 1], [], []>} : vector<2x128xf32>, vector<128x10xf32>, vector<2x10xf32> -> vector<2x10xf32>
    %27 = vector.extract_strided_slice %26 {offsets = [0, 0], sizes = [1, 10], strides = [1, 1]} : vector<2x10xf32> to vector<1x10xf32>
    %cst_12 = arith.constant 0.00347222225 : f32
    %28 = vector.broadcast %cst_12 : f32 to vector<1x10xf32>
    %29 = arith.mulf %27, %28 : vector<1x10xf32>
    %30 = vector.extract_strided_slice %26 {offsets = [1, 0], sizes = [1, 10], strides = [1, 1]} : vector<2x10xf32> to vector<1x10xf32>
    %cst_13 = arith.constant 0.00347222225 : f32
    %31 = vector.broadcast %cst_13 : f32 to vector<1x10xf32>
    %32 = arith.mulf %30, %31 : vector<1x10xf32>
    %33 = arith.mulf %29, %29 : vector<1x10xf32>
    %34 = arith.subf %32, %33 : vector<1x10xf32>
    %cst_14 = arith.constant 0.000000e+00 : f32
    %35 = vector.broadcast %cst_14 : f32 to vector<1x10xf32>
    %36 = arith.maximumf %34, %35 : vector<1x10xf32>
    %c0_15 = arith.constant 0 : index
    %c0_16 = arith.constant 0 : index
    %37 = vector.load %arg3[%c0_15, %c0_16] : memref<1x10xf32, #tpu.memory_space<vmem>>, vector<1x10xf32>
    %cst_17 = arith.constant 9.99999974E-6 : f32
    %38 = vector.broadcast %cst_17 : f32 to vector<1x10xf32>
    %39 = arith.addf %36, %38 : vector<1x10xf32>
    %40 = math.rsqrt %39 : vector<1x10xf32>
    %41 = arith.mulf %37, %40 : vector<1x10xf32>
    %c0_18 = arith.constant 0 : index
    %c0_19 = arith.constant 0 : index
    %42 = vector.load %arg6[%c0_18, %c0_19] : memref<10x128xf32, #tpu.memory_space<vmem>>, vector<10x128xf32>
    %cst_20 = arith.constant dense<0.000000e+00> : vector<1x128xf32>
    %43 = tpu.matmul %29, %42, %cst_20 {dimension_numbers = #tpu.dot_dimension_numbers<[1], [0], [0], [1], [0, 0, 1, 1], [], []>} : vector<1x10xf32>, vector<10x128xf32>, vector<1x128xf32> -> vector<1x128xf32>
    %c0_21 = arith.constant 0 : index
    %c0_22 = arith.constant 0 : index
    %44 = vector.load %arg6[%c0_21, %c0_22] : memref<10x128xf32, #tpu.memory_space<vmem>>, vector<10x128xf32>
    %cst_23 = arith.constant dense<0.000000e+00> : vector<1x128xf32>
    %45 = tpu.matmul %41, %44, %cst_23 {dimension_numbers = #tpu.dot_dimension_numbers<[1], [0], [0], [1], [0, 0, 1, 1], [], []>} : vector<1x10xf32>, vector<10x128xf32>, vector<1x128xf32> -> vector<1x128xf32>
    %46 = vector.shape_cast %45 : vector<1x128xf32> to vector<1x1x128xf32>
    %47 = vector.broadcast %46 : vector<1x1x128xf32> to vector<2x12x128xf32>
    %48 = arith.mulf %20, %47 : vector<2x12x128xf32>
    %c0_24 = arith.constant 0 : index
    %c0_25 = arith.constant 0 : index
    %49 = vector.load %arg4[%c0_24, %c0_25] : memref<1x128xf32, #tpu.memory_space<vmem>>, vector<1x128xf32>
    %50 = arith.mulf %43, %45 : vector<1x128xf32>
    %51 = arith.subf %49, %50 : vector<1x128xf32>
    %52 = vector.shape_cast %51 : vector<1x128xf32> to vector<1x1x128xf32>
    %53 = vector.broadcast %52 : vector<1x1x128xf32> to vector<2x12x128xf32>
    %54 = arith.addf %48, %53 : vector<2x12x128xf32>
    %55 = vector.extract_strided_slice %54 {offsets = [0, 0, 0], sizes = [2, 8, 128], strides = [1, 1, 1]} : vector<2x12x128xf32> to vector<2x8x128xf32>
    %56 = vector.extract_strided_slice %54 {offsets = [0, 1, 0], sizes = [2, 8, 128], strides = [1, 1, 1]} : vector<2x12x128xf32> to vector<2x8x128xf32>
    %57 = vector.extract_strided_slice %54 {offsets = [0, 2, 0], sizes = [2, 8, 128], strides = [1, 1, 1]} : vector<2x12x128xf32> to vector<2x8x128xf32>
    %58 = vector.extract_strided_slice %54 {offsets = [0, 3, 0], sizes = [2, 8, 128], strides = [1, 1, 1]} : vector<2x12x128xf32> to vector<2x8x128xf32>
    %59 = vector.extract_strided_slice %54 {offsets = [0, 4, 0], sizes = [2, 8, 128], strides = [1, 1, 1]} : vector<2x12x128xf32> to vector<2x8x128xf32>
    %60 = tpu.concatenate %55, %56, %57, %58, %59 in 2 : vector<2x8x128xf32>, vector<2x8x128xf32>, vector<2x8x128xf32>, vector<2x8x128xf32>, vector<2x8x128xf32> -> vector<2x8x640xf32>
    %61 = vector.shape_cast %60 : vector<2x8x640xf32> to vector<16x640xf32>
    %62 = arith.truncf %61 : vector<16x640xf32> to vector<16x640xbf16>
    %c0_26 = arith.constant 0 : index
    %c0_27 = arith.constant 0 : index
    %63 = vector.load %arg7[%c0_26, %c0_27] : memref<640x256xbf16, #tpu.memory_space<vmem>>, vector<640x256xbf16>
    %cst_28 = arith.constant dense<0.000000e+00> : vector<16x256xf32>
    %64 = tpu.matmul %62, %63, %cst_28 {dimension_numbers = #tpu.dot_dimension_numbers<[1], [0], [0], [1], [0, 0, 1, 1], [], []>} : vector<16x640xbf16>, vector<640x256xbf16>, vector<16x256xf32> -> vector<16x256xf32>
    %c0_29 = arith.constant 0 : index
    %c0_30 = arith.constant 0 : index
    %65 = vector.load %arg8[%c0_29, %c0_30] : memref<1x256xf32, #tpu.memory_space<vmem>>, vector<1x256xf32>
    %66 = vector.broadcast %65 : vector<1x256xf32> to vector<16x256xf32>
    %67 = arith.addf %64, %66 : vector<16x256xf32>
    %68 = vector.shape_cast %67 : vector<16x256xf32> to vector<2x4x2x256xf32>
    %cst_31 = arith.constant dense<0xFF800000> : vector<2x4x256xf32>
    %69 = vector.multi_reduction <maximumf>, %68, %cst_31 [2] : vector<2x4x2x256xf32> to vector<2x4x256xf32>
    %70 = vector.extract_strided_slice %69 {offsets = [0, 0, 0], sizes = [2, 4, 128], strides = [1, 1, 1]} : vector<2x4x256xf32> to vector<2x4x128xf32>
    %71 = vector.extract_strided_slice %69 {offsets = [0, 0, 128], sizes = [2, 4, 128], strides = [1, 1, 1]} : vector<2x4x256xf32> to vector<2x4x128xf32>
    %72 = arith.maximumf %70, %71 : vector<2x4x128xf32>
    %cst_32 = arith.constant 0.000000e+00 : f32
    %73 = vector.broadcast %cst_32 : f32 to vector<2x4x128xf32>
    %74 = arith.maximumf %72, %73 : vector<2x4x128xf32>
    %75 = arith.mulf %74, %74 : vector<2x4x128xf32>
    %76 = tpu.concatenate %74, %75 in 0 : vector<2x4x128xf32>, vector<2x4x128xf32> -> vector<4x4x128xf32>
    %77 = vector.shape_cast %76 : vector<4x4x128xf32> to vector<2x8x128xf32>
    %cst_33 = arith.constant dense<0.000000e+00> : vector<2x128xf32>
    %78 = vector.multi_reduction <add>, %77, %cst_33 [1] : vector<2x8x128xf32> to vector<2x128xf32>
    %c0_34 = arith.constant 0 : index
    %c0_35 = arith.constant 0 : index
    %79 = vector.load %arg11[%c0_34, %c0_35] : memref<128x20xf32, #tpu.memory_space<vmem>>, vector<128x20xf32>
    %cst_36 = arith.constant dense<0.000000e+00> : vector<2x20xf32>
    %80 = tpu.matmul %78, %79, %cst_36 {dimension_numbers = #tpu.dot_dimension_numbers<[1], [0], [0], [1], [0, 0, 1, 1], [], []>} : vector<2x128xf32>, vector<128x20xf32>, vector<2x20xf32> -> vector<2x20xf32>
    %81 = vector.extract_strided_slice %80 {offsets = [0, 0], sizes = [1, 20], strides = [1, 1]} : vector<2x20xf32> to vector<1x20xf32>
    %cst_37 = arith.constant 3.125000e-02 : f32
    %82 = vector.broadcast %cst_37 : f32 to vector<1x20xf32>
    %83 = arith.mulf %81, %82 : vector<1x20xf32>
    %84 = vector.extract_strided_slice %80 {offsets = [1, 0], sizes = [1, 20], strides = [1, 1]} : vector<2x20xf32> to vector<1x20xf32>
    %cst_38 = arith.constant 3.125000e-02 : f32
    %85 = vector.broadcast %cst_38 : f32 to vector<1x20xf32>
    %86 = arith.mulf %84, %85 : vector<1x20xf32>
    %87 = arith.mulf %83, %83 : vector<1x20xf32>
    %88 = arith.subf %86, %87 : vector<1x20xf32>
    %cst_39 = arith.constant 0.000000e+00 : f32
    %89 = vector.broadcast %cst_39 : f32 to vector<1x20xf32>
    %90 = arith.maximumf %88, %89 : vector<1x20xf32>
    %c0_40 = arith.constant 0 : index
    %c0_41 = arith.constant 0 : index
    %91 = vector.load %arg9[%c0_40, %c0_41] : memref<1x20xf32, #tpu.memory_space<vmem>>, vector<1x20xf32>
    %cst_42 = arith.constant 9.99999974E-6 : f32
    %92 = vector.broadcast %cst_42 : f32 to vector<1x20xf32>
    %93 = arith.addf %90, %92 : vector<1x20xf32>
    %94 = math.rsqrt %93 : vector<1x20xf32>
    %95 = arith.mulf %91, %94 : vector<1x20xf32>
    %c0_43 = arith.constant 0 : index
    %c0_44 = arith.constant 0 : index
    %96 = vector.load %arg12[%c0_43, %c0_44] : memref<20x128xf32, #tpu.memory_space<vmem>>, vector<20x128xf32>
    %cst_45 = arith.constant dense<0.000000e+00> : vector<1x128xf32>
    %97 = tpu.matmul %83, %96, %cst_45 {dimension_numbers = #tpu.dot_dimension_numbers<[1], [0], [0], [1], [0, 0, 1, 1], [], []>} : vector<1x20xf32>, vector<20x128xf32>, vector<1x128xf32> -> vector<1x128xf32>
    %c0_46 = arith.constant 0 : index
    %c0_47 = arith.constant 0 : index
    %98 = vector.load %arg12[%c0_46, %c0_47] : memref<20x128xf32, #tpu.memory_space<vmem>>, vector<20x128xf32>
    %cst_48 = arith.constant dense<0.000000e+00> : vector<1x128xf32>
    %99 = tpu.matmul %95, %98, %cst_48 {dimension_numbers = #tpu.dot_dimension_numbers<[1], [0], [0], [1], [0, 0, 1, 1], [], []>} : vector<1x20xf32>, vector<20x128xf32>, vector<1x128xf32> -> vector<1x128xf32>
    %100 = vector.shape_cast %99 : vector<1x128xf32> to vector<1x1x128xf32>
    %101 = vector.broadcast %100 : vector<1x1x128xf32> to vector<2x4x128xf32>
    %102 = arith.mulf %74, %101 : vector<2x4x128xf32>
    %c0_49 = arith.constant 0 : index
    %c0_50 = arith.constant 0 : index
    %103 = vector.load %arg10[%c0_49, %c0_50] : memref<1x128xf32, #tpu.memory_space<vmem>>, vector<1x128xf32>
    %104 = arith.mulf %97, %99 : vector<1x128xf32>
    %105 = arith.subf %103, %104 : vector<1x128xf32>
    %106 = vector.shape_cast %105 : vector<1x128xf32> to vector<1x1x128xf32>
    %107 = vector.broadcast %106 : vector<1x1x128xf32> to vector<2x4x128xf32>
    %108 = arith.addf %102, %107 : vector<2x4x128xf32>
    %109 = vector.extract_strided_slice %108 {offsets = [0, 0, 0], sizes = [2, 1, 128], strides = [1, 1, 1]} : vector<2x4x128xf32> to vector<2x1x128xf32>
    %110 = vector.extract_strided_slice %108 {offsets = [0, 1, 0], sizes = [2, 1, 128], strides = [1, 1, 1]} : vector<2x4x128xf32> to vector<2x1x128xf32>
    %111 = vector.extract_strided_slice %108 {offsets = [0, 2, 0], sizes = [2, 1, 128], strides = [1, 1, 1]} : vector<2x4x128xf32> to vector<2x1x128xf32>
    %112 = vector.extract_strided_slice %108 {offsets = [0, 3, 0], sizes = [2, 1, 128], strides = [1, 1, 1]} : vector<2x4x128xf32> to vector<2x1x128xf32>
    %113 = tpu.concatenate %109, %110, %111, %112 in 2 : vector<2x1x128xf32>, vector<2x1x128xf32>, vector<2x1x128xf32>, vector<2x1x128xf32> -> vector<2x1x512xf32>
    %114 = vector.shape_cast %113 : vector<2x1x512xf32> to vector<2x512xf32>
    %115 = arith.truncf %114 : vector<2x512xf32> to vector<2x512xbf16>
    %c0_51 = arith.constant 0 : index
    %c0_52 = arith.constant 0 : index
    %116 = vector.load %arg13[%c0_51, %c0_52] : memref<512x128xbf16, #tpu.memory_space<vmem>>, vector<512x128xbf16>
    %cst_53 = arith.constant dense<0.000000e+00> : vector<2x128xf32>
    %117 = tpu.matmul %115, %116, %cst_53 {dimension_numbers = #tpu.dot_dimension_numbers<[1], [0], [0], [1], [0, 0, 1, 1], [], []>} : vector<2x512xbf16>, vector<512x128xbf16>, vector<2x128xf32> -> vector<2x128xf32>
    %c0_54 = arith.constant 0 : index
    %c0_55 = arith.constant 0 : index
    %118 = vector.load %arg14[%c0_54, %c0_55] : memref<1x128xf32, #tpu.memory_space<vmem>>, vector<1x128xf32>
    %119 = vector.broadcast %118 : vector<1x128xf32> to vector<2x128xf32>
    %120 = arith.addf %117, %119 : vector<2x128xf32>
    %cst_56 = arith.constant 0.000000e+00 : f32
    %121 = vector.broadcast %cst_56 : f32 to vector<2x128xf32>
    %122 = arith.maximumf %120, %121 : vector<2x128xf32>
    %123 = arith.truncf %122 : vector<2x128xf32> to vector<2x128xbf16>
    %c0_57 = arith.constant 0 : index
    %c0_58 = arith.constant 0 : index
    %124 = vector.load %arg15[%c0_57, %c0_58] : memref<128x128xbf16, #tpu.memory_space<vmem>>, vector<128x128xbf16>
    %cst_59 = arith.constant dense<0.000000e+00> : vector<2x128xf32>
    %125 = tpu.matmul %123, %124, %cst_59 {dimension_numbers = #tpu.dot_dimension_numbers<[1], [0], [0], [1], [0, 0, 1, 1], [], []>} : vector<2x128xbf16>, vector<128x128xbf16>, vector<2x128xf32> -> vector<2x128xf32>
    %c0_60 = arith.constant 0 : index
    %c0_61 = arith.constant 0 : index
    %126 = vector.load %arg16[%c0_60, %c0_61] : memref<1x128xf32, #tpu.memory_space<vmem>>, vector<1x128xf32>
    %127 = vector.broadcast %126 : vector<1x128xf32> to vector<2x128xf32>
    %128 = arith.addf %125, %127 : vector<2x128xf32>
    %cst_62 = arith.constant dense<0xFF800000> : vector<2xf32>
    %129 = vector.multi_reduction <maximumf>, %128, %cst_62 [1] : vector<2x128xf32> to vector<2xf32>
    %130 = vector.shape_cast %129 : vector<2xf32> to vector<2x1xf32>
    %131 = vector.broadcast %130 : vector<2x1xf32> to vector<2x128xf32>
    %132 = arith.subf %128, %131 : vector<2x128xf32>
    %133 = math.exp %132 : vector<2x128xf32>
    %cst_63 = arith.constant dense<0.000000e+00> : vector<2xf32>
    %134 = vector.multi_reduction <add>, %133, %cst_63 [1] : vector<2x128xf32> to vector<2xf32>
    %135 = vector.shape_cast %134 : vector<2xf32> to vector<2x1xf32>
    %136 = math.log %135 : vector<2x1xf32>
    %137 = vector.broadcast %136 : vector<2x1xf32> to vector<2x128xf32>
    %138 = arith.subf %132, %137 : vector<2x128xf32>
    %c0_64 = arith.constant 0 : index
    %c0_65 = arith.constant 0 : index
    %139 = vector.load %arg17[%c0_64, %c0_65] : memref<2x128xf32, #tpu.memory_space<vmem>>, vector<2x128xf32>
    tpu.vector_store %arg17[%c0_64, %c0_65], %138 {strides = array<i32>} : memref<2x128xf32, #tpu.memory_space<vmem>>, vector<2x128xf32>,
    return
  }
}

</mosaic_0001>

<bundles_post_ra>
// kernel: mnist_forward.1
= control target key start
LH: loop header
LB: loop body
LE: loop exit
PB: predicated region body
PF: predicated region fallthrough
CT: control target
= control target key end

     0   :  { %s6079_s0 = inlined_call_operand.vmem [shape: f32[2,28,28], index: 0, kind: input, shape index: {}]   ;;  %s6080_s1 = inlined_call_operand.vmem [shape: bf16[140,256], index: 1, kind: input, shape index: {}]   ;;  %s6081_s2 = inlined_call_operand.hbm [shape: f32[1,256], index: 2, kind: input, shape index: {}]   ;;  %s6082_s3 = inlined_call_operand.vmem [shape: f32[1,10], index: 3, kind: input, shape index: {}]   ;;  %s6083_s4 = inlined_call_operand.vmem [shape: f32[1,128], index: 4, kind: input, shape index: {}]   ;;  %s6084_s5 = inlined_call_operand.vmem [shape: f32[128,10], index: 5, kind: input, shape index: {}]   ;;  %s6085_s6 = inlined_call_operand.vmem [shape: f32[10,128], index: 6, kind: input, shape index: {}]   ;;  %s6086_s7 = inlined_call_operand.hbm [shape: bf16[640,256], index: 7, kind: input, shape index: {}]   ;;  %s6087_s8 = inlined_call_operand.hbm [shape: f32[1,256], index: 8, kind: input, shape index: {}]   ;;  %s6088_s9 = inlined_call_operand.vmem [shape: f32[1,20], index: 9, kind: input, shape index: {}]   ;;  %s6089_s10 = inlined_call_operand.vmem [shape: f32[1,128], index: 10, kind: input, shape index: {}]   ;;  %s6090_s11 = inlined_call_operand.vmem [shape: f32[128,20], index: 11, kind: input, shape index: {}]   ;;  %s6091_s12 = inlined_call_operand.vmem [shape: f32[20,128], index: 12, kind: input, shape index: {}]   ;;  %s6092_s13 = inlined_call_operand.vmem [shape: bf16[512,128], index: 13, kind: input, shape index: {}]   ;;  %s6093_s14 = inlined_call_operand.hbm [shape: f32[1,128], index: 14, kind: input, shape index: {}]   ;;  %s6094_s15 = inlined_call_operand.vmem [shape: bf16[128,128], index: 15, kind: input, shape index: {}]   ;;  %s6095_s16 = inlined_call_operand.hbm [shape: f32[1,128], index: 16, kind: input, shape index: {}]   ;;  %s6096_s17 = inlined_call_operand.hbm [shape: f32[2,128], index: 17, kind: output, shape index: {}]  }
   0x1   :  { %6109 = sst [smem:[#allocation21_spill]] %s6079_s0 }
   0x2   :  { %6110 = sst [smem:[#allocation22_spill]] %s6080_s1 }
   0x3   :  { %6111 = sst [smem:[#allocation23_spill]] %s6096_s17 }
   0x4   :  { %22 = vsyncpa [#allocation3], 0 }
   0x5   :  { %23 = vsyncpa [#allocation6], 0 }
   0x6   :  { %24 = vsyncpa [#allocation9], 0 }
   0x7   :  { %25 = vsyncpa [#allocation4], 0  ;;  %s4563_s24 = smov [#allocation5]   ;;  %s4423_s28 = scalar_lea.hbm %s6086_s7, 10240 }
   0x8   :  { %s53_s25 = sshll.u32 %s4563_s24, 4  ;;  %p4424_p0 = scmp.ne.s32.totalorder %s6086_s7, %s4423_s28  ;;  %s54_s25 = int_to_ptr.vmem [resolvable:$true] %s53_s25 }
   0x9   :  { %p4427_p1 = scmp.lt.u32.totalorder %s4423_s28, %s6086_s7 }
   0xb   :  { %p4429_p2 = pnand %p4427_p1, %p4424_p0 }
   0xd   :  { %4432 = shalt.err (!%p4429_p2)
}
   0xe   :  { %s4433_s19 = scalar_lea.vmem %s54_s25, 10240  ;;  %p4438_p4 = scmp.lt.s32.totalorder %s54_s25, %s54_s25 }
   0xf   :  { %p4434_p3 = scmp.ne.s32.totalorder %s54_s25, %s4433_s19  ;;  %p4439_p5 = scmp.lt.s32.totalorder %s4433_s19, %s4433_s19 }
  0x11   :  { %p4440_p6 = por %p4439_p5, %p4438_p4 }
  0x13   :  { %p4441_p7 = pnand %p4440_p6, %p4434_p3 }
  0x15   :  { %4444 = shalt.err (!%p4441_p7)
}
  0x16   :  { %s4564_s1 = smov 128   ;;  %s4565_s20 = smov 8  }
  0x17   :  { %59 = dma.hbm_to_vmem [thread:$0]  %s6086_s7, 10240, %s54_s25, [#allocation6], %s4564_s1, %s4564_s1, %s4565_s20  }
  0x18   :  { %s4566_s23 = smov [#allocation8]   ;;  %s4567_s26 = smov [#allocation2]  }
  0x19   :  { %s86_s24 = sshll.u32 %s4566_s23, 4  ;;  %s36_s27 = sshll.u32 %s4567_s26, 4  ;;  %s87_s24 = int_to_ptr.vmem [resolvable:$true] %s86_s24  ;;  %s37_s27 = int_to_ptr.vmem [resolvable:$true] %s36_s27 }
  0x1a   :  { %s4445_s0 = scalar_lea.hbm %s6093_s14, 16 }
  0x1b   :  { %p4446_p8 = scmp.ne.s32.totalorder %s6093_s14, %s4445_s0  ;;  %p4449_p9 = scmp.lt.u32.totalorder %s4445_s0, %s6093_s14 }
  0x1d   :  { %p4451_p10 = pnand %p4449_p9, %p4446_p8 }
  0x1f   :  { %4454 = shalt.err (!%p4451_p10)
}
  0x20   :  { %s4455_s7 = scalar_lea.vmem %s87_s24, 16  ;;  %s4459_s25 = scalar_lea.vmem %s87_s24, 32 }
  0x21   :  { %p4456_p11 = scmp.ne.s32.totalorder %s87_s24, %s4455_s7  ;;  %p4460_p12 = scmp.lt.s32.totalorder %s87_s24, %s87_s24 }
  0x22   :  { %p4461_p13 = scmp.lt.s32.totalorder %s4459_s25, %s4455_s7 }
  0x24   :  { %p4462_p0 = por %p4461_p13, %p4460_p12 }
  0x26   :  { %p4463_p1 = pnand %p4462_p0, %p4456_p11 }
  0x28   :  { %4466 = shalt.err (!%p4463_p1)
}
  0x29   :  { %89 = dma.hbm_to_vmem [thread:$0]  %s6093_s14, 16, %s87_s24, [#allocation9]  }
  0x2a   :  { %s4467_s17 = scalar_lea.hbm %s6081_s2, 32 }
  0x2b   :  { %p4468_p2 = scmp.ne.s32.totalorder %s6081_s2, %s4467_s17  ;;  %p4471_p3 = scmp.lt.u32.totalorder %s4467_s17, %s6081_s2 }
  0x2d   :  { %p4473_p4 = pnand %p4471_p3, %p4468_p2 }
  0x2f   :  { %4476 = shalt.err (!%p4473_p4)
}
  0x30   :  { %s4477_s0 = scalar_lea.vmem %s37_s27, 32  ;;  %p4482_p6 = scmp.lt.s32.totalorder %s37_s27, %s37_s27 }
  0x31   :  { %p4478_p5 = scmp.ne.s32.totalorder %s37_s27, %s4477_s0  ;;  %p4483_p7 = scmp.lt.s32.totalorder %s4477_s0, %s4477_s0 }
  0x33   :  { %p4484_p8 = por %p4483_p7, %p4482_p6 }
  0x35   :  { %p4485_p9 = pnand %p4484_p8, %p4478_p5 }
  0x37   :  { %4488 = shalt.err (!%p4485_p9)
}
  0x38   :  { %39 = dma.hbm_to_vmem [thread:$0]  %s6081_s2, 32, %s37_s27, [#allocation3]  }
  0x39   :  { %s4568_s30 = smov [#allocation7]   ;;  %s4569_s19 = smov [#allocation10]  }
  0x3a   :  { %s66_s18 = sshll.u32 %s4568_s30, 4  ;;  %s98_s7 = sshll.u32 %s4569_s19, 4  ;;  %s67_s18 = int_to_ptr.vmem [resolvable:$true] %s66_s18  ;;  %s99_s7 = int_to_ptr.vmem [resolvable:$true] %s98_s7 }
  0x3b   :  { %s4489_s20 = scalar_lea.hbm %s6087_s8, 32 }
  0x3c   :  { %p4490_p10 = scmp.ne.s32.totalorder %s6087_s8, %s4489_s20  ;;  %p4493_p11 = scmp.lt.u32.totalorder %s4489_s20, %s6087_s8 }
  0x3e   :  { %p4495_p12 = pnand %p4493_p11, %p4490_p10 }
  0x40   :  { %4498 = shalt.err (!%p4495_p12)
}
  0x41   :  { %s4499_s2 = scalar_lea.vmem %s67_s18, 32  ;;  %p4504_p0 = scmp.lt.s32.totalorder %s67_s18, %s67_s18 }
  0x42   :  { %p4500_p13 = scmp.ne.s32.totalorder %s67_s18, %s4499_s2  ;;  %p4505_p1 = scmp.lt.s32.totalorder %s4499_s2, %s4499_s2 }
  0x44   :  { %p4506_p2 = por %p4505_p1, %p4504_p0 }
  0x46   :  { %p4507_p3 = pnand %p4506_p2, %p4500_p13 }
  0x48   :  { %4510 = shalt.err (!%p4507_p3)
}
  0x49   :  { %69 = dma.hbm_to_vmem [thread:$0]  %s6087_s8, 32, %s67_s18, [#allocation6]  }
  0x4a   :  { %s4511_s0 = scalar_lea.hbm %s6095_s16, 16 }
  0x4b   :  { %p4512_p4 = scmp.ne.s32.totalorder %s6095_s16, %s4511_s0  ;;  %p4515_p5 = scmp.lt.u32.totalorder %s4511_s0, %s6095_s16 }
  0x4d   :  { %p4517_p6 = pnand %p4515_p5, %p4512_p4 }
  0x4f   :  { %4520 = shalt.err (!%p4517_p6)
}
  0x50   :  { %s4521_s25 = scalar_lea.vmem %s99_s7, 16  ;;  %s4525_s1 = scalar_lea.vmem %s99_s7, 32 }
  0x51   :  { %p4522_p7 = scmp.ne.s32.totalorder %s99_s7, %s4521_s25  ;;  %p4526_p8 = scmp.lt.s32.totalorder %s99_s7, %s99_s7 }
  0x52   :  { %p4527_p9 = scmp.lt.s32.totalorder %s4525_s1, %s4521_s25 }
  0x54   :  { %p4528_p10 = por %p4527_p9, %p4526_p8 }
  0x56   :  { %p4529_p11 = pnand %p4528_p10, %p4522_p7 }
  0x58   :  { %4532 = shalt.err (!%p4529_p11)
}
  0x59   :  { %101 = dma.hbm_to_vmem [thread:$0]  %s6095_s16, 16, %s99_s7, [#allocation9]  }
  0x5a   :  { %4555 = dma.done.wait [#allocation3], 32  }
  0x5b   :  { %4556 = vsyncadd [#allocation3], 4294967264 }
  0x5c   :  { %4557 = dma.done.wait [#allocation6], 10272  }
  0x5d   :  { %4558 = vsyncadd [#allocation6], 4294957024 }
  0x5e   :  { %4559 = dma.done.wait [#allocation9], 32  }
  0x5f   :  { %4560 = vsyncadd [#allocation9], 4294967264  ;;  %vm134_vm0 = vcmask 1046528   ;;  %s6112_s22 = sld [smem:[#allocation21_spill]]  ;;  %vm200_vm1 = vcmask 1044480   ;;  %vm167_vm2 = vcmask 1045504  }
  0x60   :  { %vm233_vm3 = vcmask 1043456   ;;  %s6113_s30 = sld [smem:[#allocation22_spill]]  ;;  %s4570_s18 = smov 28   ;;  %vm266_vm4 = vcmask 228352   ;;  %vm273_vm5 = vcmask 457728   ;;  %vm280_vm6 = vcmask 687104  }
  0x61   :  { %s4571_s20 = smov 84   ;;  %s4572_s28 = smov 56   ;;  %vm287_vm7 = vcmask 916480   ;;  %vm418_vm8 = vcmask 97280   ;;  %vm857_vm9 = vcmask 1041408   ;;  %vm1315_vm10 = vcmask 1041409  }
  0x62   :  { %s4573_s29 = smov 112   ;;  %vm1318_vm11 = vcmask 1042434   ;;  %vm4576_vm12 = vmmov 0   ;;  %vm1321_vm13 = vcmask 1043459   ;;  %vm1324_vm14 = vcmask 1044484  }
  0x63   :  { %vm1327_vm15 = vcmask 1045509  }
  0x65   :  { %v4735_v0 = vld [vmem:[%s6112_s22] sm:$0xff]  ;;  %v4740_v1 = vld [vmem:[%s6112_s22 + $0x8] sm:$0xff]  ;;  %v4745_v2 = vld [vmem:[%s6112_s22 + $0x10] sm:$0xff] }
  0x66   :  { %v135_v3 = vrot.slane %v4735_v0, 1  ;;  %v136_v4 = vrot.slane %v4740_v1, 1  ;;  %v138_v5 = vrot.slane %v4745_v2, 1  ;;  %v201_v6 = vrot.slane %v4735_v0, 3  ;;  %v121_v11 = vld [vmem:[%s6112_s22 + $0x18] sm:$0xf] }
  0x67   :  { %v202_v7 = vrot.slane %v4740_v1, 3  ;;  %v204_v8 = vrot.slane %v4745_v2, 3  ;;  %v168_v9 = vrot.slane %v4735_v0, 2  ;;  %v169_v10 = vrot.slane %v4740_v1, 2  ;;  %v4765_v16 = vld [vmem:[%s6112_s22 + $0x20] sm:$0xff]  ;;  %v4770_v17 = vld [vmem:[%s6112_s22 + $0x28] sm:$0xff] }
  0x68   :  { %v137_v12 = vsel %vm134_vm0, %v135_v3, %v136_v4  ;;  %v139_v13 = vsel %vm134_vm0, %v136_v4, %v138_v5  ;;  %v171_v14 = vrot.slane %v4745_v2, 2  ;;  %v234_v15 = vrot.slane %v4735_v0, 4  ;;  %v4228_v22 = vld [vmem:[%s6113_s30 + $0x4] ss:$8 sps:$4 sm:$0xff]   ;;  %v4230_v23 = vld [vmem:[%s6113_s30] ss:$8 sps:$4 sm:$0xff]  }
  0x69   :  { %v4168_v18 = vpack.i.bf16 %v139_v13, %v137_v12  ;;  %v203_v19 = vsel %vm200_vm1, %v201_v6, %v202_v7  ;;  %v205_v20 = vsel %vm200_vm1, %v202_v7, %v204_v8  ;;  %v170_v21 = vsel %vm167_vm2, %v168_v9, %v169_v10  ;;  %v4231_v28 = vld [vmem:[%s6113_s30 + $0x14] ss:$8 sps:$4 sm:$0xff]   ;;  %434 = vmatprep.subr.bf16.mxu0 %v4228_v22  ;;  %v4233_v37 = vld [vmem:[%s6113_s30 + $0x10] ss:$8 sps:$4 sm:$0xff]   ;;  %v4234_v43 = vld [vmem:[%s6113_s30 + $0x24] ss:$8 sps:$4 sm:$0xff]  }
  0x6a   :  { %v4178_v24 = vpack.i.bf16 %v205_v20, %v203_v19  ;;  %v172_v25 = vsel %vm167_vm2, %v169_v10, %v171_v14  ;;  %v235_v26 = vrot.slane %v4740_v1, 4  ;;  %v237_v27 = vrot.slane %v4745_v2, 4  ;;  %435 = vmatpush1.bf16.msra.mxu0 %v4230_v23  ;;  %v4803_v42 = vld [vmem:[%s6112_s22 + $0x30] sm:$0xff]  ;;  %v125_v48 = vld [vmem:[%s6112_s22 + $0x38] sm:$0xf] }
  0x6b   :  { %4169 = vrot.lane.b32.xlu0 %v4168_v18, %s4570_s18  ;;  %v4173_v29 = vpack.i.bf16 %v172_v25, %v170_v21  ;;  %v140_v30 = vrot.slane %v121_v11, 1  ;;  %v142_v31 = vrot.slane %v4765_v16, 1  ;;  %v143_v32 = vrot.slane %v4770_v17, 1  ;;  %436 = vmatprep.subr.bf16.mxu0 %v4231_v28  ;;  %v4236_v57 = vld [vmem:[%s6113_s30 + $0x20] ss:$8 sps:$4 sm:$0xff]  }
  0x6c   :  { %4179 = vrot.lane.b32.xlu1 %v4178_v24, %s4571_s20  ;;  %v236_v33 = vsel %vm233_vm3, %v234_v15, %v235_v26  ;;  %v238_v34 = vsel %vm233_vm3, %v235_v26, %v237_v27  ;;  %v173_v35 = vrot.slane %v121_v11, 2  ;;  %v175_v36 = vrot.slane %v4765_v16, 2  ;;  %v4237_v62 = vld [vmem:[%s6113_s30 + $0x34] ss:$8 sps:$4 sm:$0xff]   ;;  %v4239_v10 = vld [vmem:[%s6113_s30 + $0x30] ss:$8 sps:$4 sm:$0xff]  }
  0x6d   :  { %v4183_v38 = vpack.i.bf16 %v238_v34, %v236_v33  ;;  %v141_v39 = vsel %vm134_vm0, %v138_v5, %v140_v30  ;;  %v144_v40 = vsel %vm134_vm0, %v142_v31, %v143_v32  ;;  %v176_v41 = vrot.slane %v4770_v17, 2  ;;  %v4240_v15 = vld [vmem:[%s6113_s30 + $0x44] ss:$8 sps:$4 sm:$0xff]   ;;  %v4242_v18 = vld [vmem:[%s6113_s30 + $0x40] ss:$8 sps:$4 sm:$0xff]  }
  0x6e   :  { %v4188_v44 = vpack.i.bf16 %v144_v40, %v141_v39  ;;  %v174_v45 = vsel %vm167_vm2, %v171_v14, %v173_v35  ;;  %v206_v46 = vrot.slane %v121_v11, 3  ;;  %v208_v47 = vrot.slane %v4765_v16, 3  ;;  %437 = vmatpush1.bf16.msra.mxu0 %v4233_v37  ;;  %v4243_v25 = vld [vmem:[%s6113_s30 + $0x54] ss:$8 sps:$4 sm:$0xff]   ;;  %v4245_v26 = vld [vmem:[%s6113_s30 + $0x50] ss:$8 sps:$4 sm:$0xff]  }
  0x6f   :  { %4174 = vrot.lane.b32.xlu0 %v4173_v29, %s4572_s28  ;;  %v177_v49 = vsel %vm167_vm2, %v175_v36, %v176_v41  ;;  %v209_v50 = vrot.slane %v4770_v17, 3  ;;  %v239_v51 = vrot.slane %v121_v11, 4  ;;  %v241_v52 = vrot.slane %v4765_v16, 4  ;;  %438 = vmatprep.subr.bf16.mxu0 %v4234_v43  ;;  %v4246_v28 = vld [vmem:[%s6113_s30 + $0x64] ss:$8 sps:$4 sm:$0xff]  }
  0x70   :  { %4184 = vrot.lane.b32.xlu1 %v4183_v38, %s4573_s29  ;;  %v4193_v53 = vpack.i.bf16 %v177_v49, %v174_v45  ;;  %v207_v54 = vsel %vm200_vm1, %v204_v8, %v206_v46  ;;  %v242_v55 = vrot.slane %v4770_v17, 4  ;;  %v145_v56 = vrot.slane %v4803_v42, 1  ;;  %v4248_v30 = vld [vmem:[%s6113_s30 + $0x60] ss:$8 sps:$4 sm:$0xff]   ;;  %v4249_v31 = vld [vmem:[%s6113_s30 + $0x74] ss:$8 sps:$4 sm:$0xff]  }
  0x71   :  { %v210_v58 = vsel %vm200_vm1, %v208_v47, %v209_v50  ;;  %v240_v59 = vsel %vm233_vm3, %v237_v27, %v239_v51  ;;  %v147_v60 = vrot.slane %v125_v48, 1  ;;  %v178_v61 = vrot.slane %v4803_v42, 2  ;;  %v4252_v33 = vld [vmem:[%s6113_s30 + $0x84] ss:$8 sps:$4 sm:$0x3f]  }
  0x72   :  { %v243_v63 = vsel %vm233_vm3, %v241_v52, %v242_v55  ;;  %v180_v3 = vrot.slane %v125_v48, 2  ;;  %v4198_v4 = vpack.i.bf16 %v210_v58, %v207_v54  ;;  %v146_v5 = vsel %vm134_vm0, %v143_v32, %v145_v56  ;;  %439 = vmatpush1.bf16.msra.mxu0 %v4236_v57  ;;  %v4251_v32 = vld [vmem:[%s6113_s30 + $0x70] ss:$8 sps:$4 sm:$0xff]   ;;  %v4254_v34 = vld [vmem:[%s6113_s30 + $0x80] ss:$8 sps:$4 sm:$0x3f]  }
  0x73   :  { %4189 = vrot.lane.b32.xlu0 %v4188_v44, %s4570_s18  ;;  %v4203_v6 = vpack.i.bf16 %v243_v63, %v240_v59  ;;  %v148_v7 = vsel %vm134_vm0, %v145_v56, %v147_v60  ;;  %v211_v8 = vrot.slane %v4803_v42, 3  ;;  %v213_v9 = vrot.slane %v125_v48, 3  ;;  %440 = vmatprep.subr.bf16.mxu0 %v4237_v62 }
  0x74   :  { %4194 = vrot.lane.b32.xlu1 %v4193_v53, %s4572_s28  ;;  %v179_v11 = vsel %vm167_vm2, %v176_v41, %v178_v61  ;;  %v181_v12 = vsel %vm167_vm2, %v178_v61, %v180_v3  ;;  %v244_v13 = vrot.slane %v4803_v42, 4  ;;  %v246_v14 = vrot.slane %v125_v48, 4 }
  0x75   :  { %v4208_v19 = vpack.i.bf16 %v148_v7, %v146_v5  ;;  %v4213_v20 = vpack.i.bf16 %v181_v12, %v179_v11  ;;  %v212_v21 = vsel %vm200_vm1, %v209_v50, %v211_v8  ;;  %v214_v22 = vsel %vm200_vm1, %v211_v8, %v213_v9 }
  0x76   :  { %441 = vmatpush1.bf16.msra.mxu0 %v4239_v10  ;;  %v245_v23 = vsel %vm233_vm3, %v242_v55, %v244_v13  ;;  %v247_v24 = vsel %vm233_vm3, %v244_v13, %v246_v14  ;;  %v4218_v27 = vpack.i.bf16 %v214_v22, %v212_v21  ;;  %v429_v35 = vsel %vm167_vm2, %v4254_v34, 0 }
  0x77   :  { %4199 = vrot.lane.b32.xlu0 %v4198_v4, %s4571_s20  ;;  %442 = vmatprep.subr.bf16.mxu0 %v4240_v15  ;;  %v4223_v29 = vpack.i.bf16 %v247_v24, %v245_v23  ;;  %vm1330_vm0 = vcmask 1046534   ;;  %vm1333_vm1 = vcmask 1047559  }
  0x78   :  { %4204 = vrot.lane.b32.xlu1 %v4203_v6, %s4573_s29 }
  0x7a   :  { %443 = vmatpush1.bf16.msra.mxu0 %v4242_v18 }
  0x7b   :  { %4209 = vrot.lane.b32.xlu0 %v4208_v19, %s4570_s18  ;;  %444 = vmatprep.subr.bf16.mxu0 %v4243_v25 }
  0x7c   :  { %4214 = vrot.lane.b32.xlu1 %v4213_v20, %s4572_s28 }
  0x7e   :  { %445 = vmatpush1.bf16.msra.mxu0 %v4245_v26 }
  0x7f   :  { %4219 = vrot.lane.b32.xlu0 %v4218_v27, %s4571_s20  ;;  %446 = vmatprep.subr.bf16.mxu0 %v4246_v28 }
  0x80   :  { %4224 = vrot.lane.b32.xlu1 %v4223_v29, %s4573_s29 }
  0x82   :  { %447 = vmatpush1.bf16.msra.mxu0 %v4248_v30 }
  0x83   :  { %448 = vmatprep.subr.bf16.mxu0 %v4249_v31 }
  0x86   :  { %449 = vmatpush1.bf16.msra.mxu0 %v4251_v32 }
  0x87   :  { %3718 = vmatprep.subr.msk.bf16.mxu0 %vm167_vm2, %v4252_v33  ;;  %vm4578_vm2 = vmmov 1  }
  0x8a   :  { %451 = vmatpush1.bf16.msra.mxu0 %v429_v35 }
  0xdd   :  { %v4170_v36 = vpop.permute.xlu0 %4169 }
  0xde   :  { %v4180_v37 = vpop.permute.xlu1 %4179  ;;  %v4172_v38 = vunpack.i.h.bf16 %v4170_v36  ;;  %v4171_v39 = vunpack.i.l.bf16 %v4170_v36 }
  0xdf   :  { %v4182_v41 = vunpack.i.h.bf16 %v4180_v37  ;;  %v4181_v43 = vunpack.i.l.bf16 %v4180_v37 }
  0xe0   :  { %v268_v47 = vsel %vm266_vm4, %v4740_v1, %v4172_v38  ;;  %v267_v48 = vsel %vm266_vm4, %v4735_v0, %v4171_v39  ;;  %v320_v38 = vlaneseq }
  0xe1   :  { %v4175_v40 = vpop.permute.xlu0 %4174 }
  0xe2   :  { %v4177_v44 = vunpack.i.h.bf16 %v4175_v40  ;;  %v4176_v45 = vunpack.i.l.bf16 %v4175_v40  ;;  %v4185_v46 = vpop.permute.xlu1 %4184  ;;  %v4917_v39 = vshrl.u32 %v320_v38, 7 }
  0xe3   :  { %v4187_v49 = vunpack.i.h.bf16 %v4185_v46  ;;  %v4186_v50 = vunpack.i.l.bf16 %v4185_v46 }
  0xe4   :  { %v274_v51 = vsel %vm273_vm5, %v267_v48, %v4176_v45  ;;  %v275_v52 = vsel %vm273_vm5, %v268_v47, %v4177_v44  ;;  %v4920_v40 = vsub.s32 0, %v4917_v39  ;;  %v6100_v45 = vsub.s32 1, %v4917_v39 }
  0xe5   :  { %v4190_v53 = vpop.permute.xlu0 %4189  ;;  %v295_v54 = vpack.c.bf16 %v4187_v49, %v4186_v50  ;;  %v281_v55 = vsel %vm280_vm6, %v274_v51, %v4181_v43  ;;  %v282_v56 = vsel %vm280_vm6, %v275_v52, %v4182_v41  ;;  %v318_v41 = vld [vmem:[#allocation2] sm:$0x3]  ;;  %v4574_v43 = vmov 1983009808  }
  0xe6   :  { %v4192_v57 = vunpack.i.h.bf16 %v4190_v53  ;;  %v4191_v58 = vunpack.i.l.bf16 %v4190_v53  ;;  %v4195_v59 = vpop.permute.xlu1 %4194  ;;  %v288_v1 = vsel %vm287_vm7, %v281_v55, %v4186_v50  ;;  %v289_v0 = vsel %vm287_vm7, %v282_v56, %v4187_v49 }
  0xe7   :  { %v4197_v60 = vunpack.i.h.bf16 %v4195_v59  ;;  %v4196_v61 = vunpack.i.l.bf16 %v4195_v59  ;;  %3719 = vmatprep.mubr.msk.bf16.mxu0 %vm418_vm8, %v295_v54  ;;  %v294_v62 = vpack.c.bf16 %v289_v0, %v288_v1  ;;  %v512_v44 = vunpack.c.l.s4 %v4574_v43 }
  0xe8   :  { %v270_v63 = vsel %vm266_vm4, %v4765_v16, %v4192_v57  ;;  %v269_v3 = vsel %vm266_vm4, %v4745_v2, %v4191_v58  ;;  %v4924_v46 = vrot.slane %v318_v41, %v4920_v40  ;;  %v4928_v48 = vrot.slane %v318_v41, %v6100_v45 }
  0xe9   :  { %v276_v4 = vsel %vm273_vm5, %v269_v3, %v4196_v61  ;;  %v277_v5 = vsel %vm273_vm5, %v270_v63, %v4197_v60  ;;  %v4200_v6 = vpop.permute.xlu0 %4199  ;;  %467 = vmatmul.mubr.bf16.vlgmr.msra.gmra.mrb[0].mxu0 %v294_v62  ;;  %v513_v47 = vunpack.c.0.s8 %v512_v44 }
  0xea   :  { %v4202_v7 = vunpack.i.h.bf16 %v4200_v6  ;;  %v4201_v8 = vunpack.i.l.bf16 %v4200_v6  ;;  %v4205_v9 = vpop.permute.xlu1 %4204 }
  0xeb   :  { %v4207_v10 = vunpack.i.h.bf16 %v4205_v9  ;;  %v4206_v11 = vunpack.i.l.bf16 %v4205_v9  ;;  %v4932_v52 = vsub.s32 %v513_v47, %v4917_v39 }
  0xec   :  { %v283_v12 = vsel %vm280_vm6, %v276_v4, %v4201_v8  ;;  %v284_v13 = vsel %vm280_vm6, %v277_v5, %v4202_v7 }
  0xed   :  { %v297_v14 = vpack.c.bf16 %v4207_v10, %v4206_v11  ;;  %v4210_v16 = vpop.permute.xlu0 %4209  ;;  %v290_v15 = vsel %vm287_vm7, %v283_v12, %v4206_v11  ;;  %v291_v2 = vsel %vm287_vm7, %v284_v13, %v4207_v10  ;;  %6114 = vst [vmem:[#allocation16_spill] sm:$0xff] %v4932_v52 }
  0xee   :  { %v4212_v18 = vunpack.i.h.bf16 %v4210_v16  ;;  %v4211_v19 = vunpack.i.l.bf16 %v4210_v16  ;;  %v4215_v20 = vpop.permute.xlu1 %4214  ;;  %v296_v21 = vpack.c.bf16 %v291_v2, %v290_v15 }
  0xef   :  { %v4217_v22 = vunpack.i.h.bf16 %v4215_v20  ;;  %v4216_v23 = vunpack.i.l.bf16 %v4215_v20  ;;  %3720 = vmatprep.mubr.msk.bf16.mxu0 %vm418_vm8, %v297_v14 }
  0xf0   :  { %v272_v24 = vsel %vm266_vm4, %v4803_v42, %v4212_v18  ;;  %v271_v25 = vsel %vm266_vm4, %v4770_v17, %v4211_v19  ;;  %vm5437_vm4 = vmpackc.low %vm857_vm9, %vm4578_vm2 }
  0xf1   :  { %v278_v26 = vsel %vm273_vm5, %v271_v25, %v4216_v23  ;;  %v279_v27 = vsel %vm273_vm5, %v272_v24, %v4217_v22  ;;  %v4220_v28 = vpop.permute.xlu0 %4219  ;;  %477 = vmatmul.mubr.bf16.gmra.mrb[4].mxu0 %v296_v21  ;;  %vm1548_vm5 = vcmask 80896  }
  0xf2   :  { %v4222_v29 = vunpack.i.h.bf16 %v4220_v28  ;;  %v4221_v30 = vunpack.i.l.bf16 %v4220_v28  ;;  %v4225_v31 = vpop.permute.xlu1 %4224 }
  0xf3   :  { %v4227_v32 = vunpack.i.h.bf16 %v4225_v31  ;;  %v4226_v33 = vunpack.i.l.bf16 %v4225_v31 }
  0xf4   :  { %v285_v34 = vsel %vm280_vm6, %v278_v26, %v4221_v30  ;;  %v286_v35 = vsel %vm280_vm6, %v279_v27, %v4222_v29  ;;  %vm2995_vm6 = vcmask 162816  }
  0xf5   :  { %v299_v36 = vpack.c.bf16 %v4227_v32, %v4226_v33  ;;  %v292_v42 = vsel %vm287_vm7, %v285_v34, %v4226_v33  ;;  %v293_v17 = vsel %vm287_vm7, %v286_v35, %v4227_v32 }
  0xf6   :  { %v298_v37 = vpack.c.bf16 %v293_v17, %v292_v42 }
  0xf7   :  { %3721 = vmatprep.mubr.msk.bf16.mxu0 %vm418_vm8, %v299_v36 }
  0xf9   :  { %487 = vmatmul.mubr.bf16.gmra.mrb[8].mxu0 %v298_v37 }
 0x1bc   :  { %v468_v49 = vpop.f32.mrb[0].mxu0 }
 0x1bd   :  { %v469_v50 = vadd.f32 %v468_v49, %v4924_v46  ;;  %v470_v51 = vpop.f32.mrb[1].mxu0 }
 0x1be   :  { %v471_v53 = vadd.f32 %v470_v51, %v4928_v48  ;;  %v472_v54 = vpop.f32.mrb[2].mxu0 }
 0x1bf   :  { %v473_v55 = vadd.f32 %v472_v54, %v4924_v46  ;;  %v474_v56 = vpop.f32.mrb[3].mxu0 }
 0x1c0   :  { %v509_v57 = vcombine.low %v469_v50, %v471_v53  ;;  %v510_v58 = vcombine.high %v469_v50, %v471_v53  ;;  %v475_v59 = vadd.f32 %v474_v56, %v4928_v48 }
 0x1c2   :  { %v517_v1 = vrot.slane %v509_v57, %v4932_v52  ;;  %v524_v0 = vrot.slane %v510_v58, %v4932_v52  ;;  %v527_v60 = vcombine.low %v473_v55, %v475_v59  ;;  %v528_v61 = vcombine.high %v473_v55, %v475_v59 }
 0x1c4   :  { %v525_v62 = vcombine.high %v517_v1, %v517_v1  ;;  %v526_v63 = vcombine.high %v524_v0, %v524_v0  ;;  %v623_v3 = vrot.slane %v517_v1, %v4932_v52  ;;  %v639_v4 = vrot.slane %v524_v0, %v4932_v52  ;;  %v4941_v5 = vpop.f32.mrb[4].mxu0 }
 0x1c5   :  { %v4944_v6 = vrot.slane %v527_v60, %v4932_v52  ;;  %v4946_v7 = vpop.f32.mrb[5].mxu0  ;;  %v4955_v16 = vrot.slane %v528_v61, %v4932_v52 }
 0x1c6   :  { %v624_v8 = vcombine.high %v623_v3, %v623_v3  ;;  %v631_v9 = vrot.slane %v525_v62, %v4932_v52  ;;  %v640_v10 = vcombine.high %v639_v4, %v639_v4  ;;  %v647_v11 = vrot.slane %v526_v63, %v4932_v52  ;;  %v4950_v12 = vpop.f32.mrb[6].mxu0 }
 0x1c7   :  { %v858_v13 = vsel %vm857_vm9, %v623_v3, -inf  ;;  %v886_v14 = vsel %vm857_vm9, %v639_v4, -inf  ;;  %v543_v15 = vcombine.high %v4944_v6, %v4944_v6  ;;  %v4959_v2 = vpop.f32.mrb[7].mxu0 }
 0x1c8   :  { %v632_v18 = vcombine.high %v631_v9, %v631_v9  ;;  %v648_v19 = vcombine.high %v647_v11, %v647_v11  ;;  %v859_v20 = vrot.slane %v858_v13, 4  ;;  %v865_v21 = vsel %vm857_vm9, %v624_v8, -inf }
 0x1c9   :  { %v866_v22 = vrot.slane %v865_v21, 4  ;;  %v872_v23 = vsel %vm857_vm9, %v631_v9, -inf  ;;  %v887_v24 = vrot.slane %v886_v14, 4  ;;  %v893_v25 = vsel %vm857_vm9, %v640_v10, -inf }
 0x1ca   :  { %v860_v26 = vmax.f32 %v858_v13, %v859_v20  ;;  %v873_v27 = vrot.slane %v872_v23, 4  ;;  %v879_v28 = vsel %vm857_vm9, %v632_v18, -inf  ;;  %v894_v29 = vrot.slane %v893_v25, 4 }
 0x1cb   :  { %v867_v30 = vmax.f32 %v865_v21, %v866_v22  ;;  %v880_v31 = vrot.slane %v879_v28, 4  ;;  %v888_v32 = vmax.f32 %v886_v14, %v887_v24  ;;  %v900_v33 = vsel %vm857_vm9, %v647_v11, -inf }
 0x1cc   :  { %v861_v34 = vrot.slane %v860_v26, 2  ;;  %v874_v35 = vmax.f32 %v872_v23, %v873_v27  ;;  %v895_v36 = vmax.f32 %v893_v25, %v894_v29  ;;  %v901_v42 = vrot.slane %v900_v33, 4  ;;  %v4966_v17 = vpop.f32.mrb[8].mxu0 }
 0x1cd   :  { %v868_v37 = vrot.slane %v867_v30, 2  ;;  %v881_v38 = vmax.f32 %v879_v28, %v880_v31  ;;  %v889_v41 = vrot.slane %v888_v32, 2  ;;  %v907_v43 = vsel %vm857_vm9, %v648_v19, -inf  ;;  %v4969_v44 = vpop.f32.mrb[9].mxu0 }
 0x1ce   :  { %v862_v47 = vmax.f32 %v860_v26, %v861_v34  ;;  %v875_v49 = vrot.slane %v874_v35, 2  ;;  %v896_v50 = vrot.slane %v895_v36, 2  ;;  %v902_v51 = vmax.f32 %v900_v33, %v901_v42  ;;  %v4971_v53 = vpop.f32.mrb[10].mxu0 }
 0x1cf   :  { %v869_v54 = vmax.f32 %v867_v30, %v868_v37  ;;  %v882_v55 = vrot.slane %v881_v38, 2  ;;  %v890_v56 = vmax.f32 %v888_v32, %v889_v41  ;;  %v908_v57 = vrot.slane %v907_v43, 4  ;;  %v4973_v58 = vpop.f32.mrb[11].mxu0 }
 0x1d0   :  { %v863_v59 = vrot.slane %v862_v47, 1  ;;  %v876_v1 = vmax.f32 %v874_v35, %v875_v49  ;;  %v897_v0 = vmax.f32 %v895_v36, %v896_v50  ;;  %v903_v60 = vrot.slane %v902_v51, 2 }
 0x1d1   :  { %v870_v61 = vrot.slane %v869_v54, 1  ;;  %v883_v62 = vmax.f32 %v881_v38, %v882_v55  ;;  %v891_v63 = vrot.slane %v890_v56, 1  ;;  %v909_v3 = vmax.f32 %v907_v43, %v908_v57 }
 0x1d2   :  { %v864_v4 = vmax.f32 %v862_v47, %v863_v59  ;;  %v877_v8 = vrot.slane %v876_v1, 1  ;;  %v898_v9 = vrot.slane %v897_v0, 1  ;;  %v904_v10 = vmax.f32 %v902_v51, %v903_v60 }
 0x1d3   :  { %v871_v11 = vmax.f32 %v869_v54, %v870_v61  ;;  %v884_v13 = vrot.slane %v883_v62, 1  ;;  %v892_v14 = vmax.f32 %v890_v56, %v891_v63  ;;  %v910_v18 = vrot.slane %v909_v3, 2 }
 0x1d4   :  { %v878_v19 = vmax.f32 %v876_v1, %v877_v8  ;;  %v899_v20 = vmax.f32 %v897_v0, %v898_v9  ;;  %v905_v21 = vrot.slane %v904_v10, 1  ;;  %v655_v22 = vrot.slane %v4944_v6, %v4932_v52 }
 0x1d5   :  { %v885_v23 = vmax.f32 %v883_v62, %v884_v13  ;;  %v911_v24 = vmax.f32 %v909_v3, %v910_v18  ;;  %v1194_v25 = vmax.f32 %v864_v4, %v871_v11  ;;  %v663_v26 = vrot.slane %v543_v15, %v4932_v52 }
 0x1d6   :  { %v1196_v27 = vmax.f32 %v892_v14, %v899_v20  ;;  %v544_v28 = vcombine.high %v4955_v16, %v4955_v16  ;;  %v656_v29 = vcombine.high %v655_v22, %v655_v22  ;;  %v671_v30 = vrot.slane %v4955_v16, %v4932_v52 }
 0x1d7   :  { %v912_v31 = vrot.slane %v911_v24, 1  ;;  %v1195_v32 = vmax.f32 %v878_v19, %v885_v23  ;;  %v4984_v33 = vadd.f32 %v4941_v5, %v4924_v46  ;;  %v906_v6 = vmax.f32 %v904_v10, %v905_v21 }
 0x1d8   :  { %v4986_v34 = vmax.f32 %v1196_v27, 0.0  ;;  %v664_v35 = vcombine.high %v663_v26, %v663_v26  ;;  %v914_v15 = vsel %vm857_vm9, %v655_v22, -inf  ;;  %v4989_v42 = vmax.f32 %v1194_v25, 0.0 }
 0x1d9   :  { %v913_v36 = vmax.f32 %v911_v24, %v912_v31  ;;  %v4991_v37 = vmax.f32 %v1195_v32, 0.0  ;;  %v915_v38 = vrot.slane %v914_v15, 4  ;;  %v672_v41 = vcombine.high %v671_v30, %v671_v30 }
 0x1da   :  { %6115 = vst [vmem:[#allocation17_spill] sm:$0xff] %v4989_v42  ;;  %v4995_v16 = vmul.f32 %v4986_v34, %v4986_v34  ;;  %v679_v5 = vrot.slane %v544_v28, %v4932_v52  ;;  %v921_v43 = vsel %vm857_vm9, %v656_v29, -inf  ;;  %v1317_v54 = vrot.slane %v4986_v34, 6 }
 0x1db   :  { %v1197_v47 = vmax.f32 %v906_v6, %v913_v36  ;;  %v1243_v49 = vmul.f32 %v4991_v37, %v4991_v37  ;;  %v1314_v50 = vrot.slane %v4991_v37, 7  ;;  %v916_v51 = vmax.f32 %v914_v15, %v915_v38 }
 0x1dc   :  { %v922_v55 = vrot.slane %v921_v43, 4  ;;  %v928_v56 = vsel %vm857_vm9, %v663_v26, -inf  ;;  %v935_v57 = vsel %vm857_vm9, %v664_v35, -inf  ;;  %v1242_v61 = vmul.f32 %v4989_v42, %v4989_v42 }
 0x1dd   :  { %v5005_v59 = vmax.f32 %v1197_v47, 0.0  ;;  %v1316_v1 = vsel %vm1315_vm10, %v1314_v50, %v4989_v42  ;;  %v1363_v0 = vrot.slane %v1243_v49, 7  ;;  %v917_v60 = vrot.slane %v916_v51, 2 }
 0x1de   :  { %v923_v62 = vmax.f32 %v921_v43, %v922_v55  ;;  %v929_v63 = vrot.slane %v928_v56, 4  ;;  %v936_v3 = vrot.slane %v935_v57, 4  ;;  %v5012_v4 = vsel %vm1318_vm11, %v1317_v54, %v1316_v1 }
 0x1df   :  { %v1365_v8 = vrot.slane %v4995_v16, 6  ;;  %v680_v9 = vcombine.high %v679_v5, %v679_v5  ;;  %v918_v10 = vmax.f32 %v916_v51, %v917_v60  ;;  %v5017_v11 = vmul.f32 %v5005_v59, %v5005_v59 }
 0x1e0   :  { %v924_v13 = vrot.slane %v923_v62, 2  ;;  %v930_v14 = vmax.f32 %v928_v56, %v929_v63  ;;  %v937_v18 = vmax.f32 %v935_v57, %v936_v3  ;;  %v1364_v19 = vsel %vm1315_vm10, %v1363_v0, %v1242_v61 }
 0x1e1   :  { %v919_v20 = vrot.slane %v918_v10, 1  ;;  %v942_v21 = vsel %vm857_vm9, %v671_v30, -inf  ;;  %v949_v22 = vsel %vm857_vm9, %v672_v41, -inf  ;;  %v956_v29 = vsel %vm857_vm9, %v679_v5, -inf }
 0x1e2   :  { %v925_v23 = vmax.f32 %v923_v62, %v924_v13  ;;  %v931_v24 = vrot.slane %v930_v14, 2  ;;  %v938_v25 = vrot.slane %v937_v18, 2  ;;  %v943_v26 = vrot.slane %v942_v21, 4 }
 0x1e3   :  { %v920_v27 = vmax.f32 %v918_v10, %v919_v20  ;;  %v950_v28 = vrot.slane %v949_v22, 4  ;;  %v963_v31 = vsel %vm857_vm9, %v680_v9, -inf  ;;  %v957_v38 = vrot.slane %v956_v29, 4 }
 0x1e4   :  { %v926_v32 = vrot.slane %v925_v23, 1  ;;  %v932_v6 = vmax.f32 %v930_v14, %v931_v24  ;;  %v939_v35 = vmax.f32 %v937_v18, %v938_v25  ;;  %v944_v15 = vmax.f32 %v942_v21, %v943_v26 }
 0x1e5   :  { %v951_v36 = vmax.f32 %v949_v22, %v950_v28  ;;  %v964_v16 = vrot.slane %v963_v31, 4  ;;  %v481_v30 = vadd.f32 %v4946_v7, %v4928_v48  ;;  %v958_v51 = vmax.f32 %v956_v29, %v957_v38 }
 0x1e6   :  { %v927_v41 = vmax.f32 %v925_v23, %v926_v32  ;;  %v933_v43 = vrot.slane %v932_v6, 1  ;;  %v940_v47 = vrot.slane %v939_v35, 1  ;;  %v945_v49 = vrot.slane %v944_v15, 2 }
 0x1e7   :  { %v952_v50 = vrot.slane %v951_v36, 2  ;;  %v965_v54 = vmax.f32 %v963_v31, %v964_v16  ;;  %v545_v5 = vcombine.low %v4984_v33, %v481_v30  ;;  %v959_v60 = vrot.slane %v958_v51, 2 }
 0x1e8   :  { %v934_v55 = vmax.f32 %v932_v6, %v933_v43  ;;  %v941_v56 = vmax.f32 %v939_v35, %v940_v47  ;;  %v946_v57 = vmax.f32 %v944_v15, %v945_v49  ;;  %v1198_v1 = vmax.f32 %v920_v27, %v927_v41 }
 0x1e9   :  { %v953_v0 = vmax.f32 %v951_v36, %v952_v50  ;;  %v966_v61 = vrot.slane %v965_v54, 2  ;;  %v546_v62 = vcombine.high %v4984_v33, %v481_v30  ;;  %v553_v9 = vrot.slane %v545_v5, %v4932_v52 }
 0x1ea   :  { %v947_v63 = vrot.slane %v946_v57, 1  ;;  %v1199_v7 = vmax.f32 %v934_v55, %v941_v56  ;;  %v5028_v3 = vmax.f32 %v1198_v1, 0.0  ;;  %v960_v13 = vmax.f32 %v958_v51, %v959_v60 }
 0x1eb   :  { %v954_v10 = vrot.slane %v953_v0, 1  ;;  %v967_v14 = vmax.f32 %v965_v54, %v966_v61  ;;  %v560_v18 = vrot.slane %v546_v62, %v4932_v52  ;;  %v5034_v21 = vsel %vm1318_vm11, %v1365_v8, %v1364_v19 }
 0x1ec   :  { %v948_v22 = vmax.f32 %v946_v57, %v947_v63  ;;  %v5036_v23 = vmax.f32 %v1199_v7, 0.0  ;;  %v961_v24 = vrot.slane %v960_v13, 1  ;;  %v561_v26 = vcombine.high %v553_v9, %v553_v9 }
 0x1ed   :  { %v955_v33 = vmax.f32 %v953_v0, %v954_v10  ;;  %v968_v25 = vrot.slane %v967_v14, 1  ;;  %v5041_v28 = vmul.f32 %v5028_v3, %v5028_v3  ;;  %v562_v31 = vcombine.high %v560_v18, %v560_v18 }
 0x1ee   :  { %v5048_v19 = vmul.f32 %v5036_v23, %v5036_v23  ;;  %v687_v6 = vrot.slane %v553_v9, %v4932_v52  ;;  %v695_v15 = vrot.slane %v561_v26, %v4932_v52  ;;  %v703_v36 = vrot.slane %v560_v18, %v4932_v52 }
 0x1ef   :  { %v5044_v32 = vmax.f32 %v967_v14, %v968_v25  ;;  %v1200_v8 = vmax.f32 %v948_v22, %v955_v33  ;;  %v711_v38 = vrot.slane %v562_v31, %v4932_v52  ;;  %v962_v16 = vmax.f32 %v960_v13, %v961_v24 }
 0x1f0   :  { %v688_v41 = vcombine.high %v687_v6, %v687_v6  ;;  %v970_v43 = vsel %vm857_vm9, %v687_v6, -inf  ;;  %v696_v49 = vcombine.high %v695_v15, %v695_v15  ;;  %v704_v50 = vcombine.high %v703_v36, %v703_v36 }
 0x1f1   :  { %v5055_v30 = vmax.f32 %v1200_v8, 0.0  ;;  %v971_v51 = vrot.slane %v970_v43, 4  ;;  %v1201_v54 = vmax.f32 %v962_v16, %v5044_v32  ;;  %v712_v55 = vcombine.high %v711_v38, %v711_v38 }
 0x1f2   :  { %v977_v56 = vsel %vm857_vm9, %v688_v41, -inf  ;;  %v984_v0 = vsel %vm857_vm9, %v695_v15, -inf  ;;  %v991_v60 = vsel %vm857_vm9, %v696_v49, -inf  ;;  %v998_v7 = vsel %vm857_vm9, %v703_v36, -inf }
 0x1f3   :  { %v972_v57 = vmax.f32 %v970_v43, %v971_v51  ;;  %v978_v1 = vrot.slane %v977_v56, 4  ;;  %v5066_v61 = vmul.f32 %v5055_v30, %v5055_v30  ;;  %v985_v62 = vrot.slane %v984_v0, 4 }
 0x1f4   :  { %v992_v63 = vrot.slane %v991_v60, 4  ;;  %v999_v13 = vrot.slane %v998_v7, 4  ;;  %v1005_v14 = vsel %vm857_vm9, %v704_v50, -inf  ;;  %v1012_v24 = vsel %vm857_vm9, %v711_v38, -inf }
 0x1f5   :  { %v973_v9 = vrot.slane %v972_v57, 2  ;;  %v979_v10 = vmax.f32 %v977_v56, %v978_v1  ;;  %v986_v18 = vmax.f32 %v984_v0, %v985_v62  ;;  %v1006_v33 = vrot.slane %v1005_v14, 4 }
 0x1f6   :  { %v993_v22 = vmax.f32 %v991_v60, %v992_v63  ;;  %v1000_v31 = vmax.f32 %v998_v7, %v999_v13  ;;  %v1013_v32 = vrot.slane %v1012_v24, 4  ;;  %v1019_v16 = vsel %vm857_vm9, %v712_v55, -inf }
 0x1f7   :  { %v974_v25 = vmax.f32 %v972_v57, %v973_v9  ;;  %v980_v26 = vrot.slane %v979_v10, 2  ;;  %v987_v8 = vrot.slane %v986_v18, 2  ;;  %v1007_v15 = vmax.f32 %v1005_v14, %v1006_v33 }
 0x1f8   :  { %v994_v6 = vrot.slane %v993_v22, 2  ;;  %v1001_v43 = vrot.slane %v1000_v31, 2  ;;  %v1014_v49 = vmax.f32 %v1012_v24, %v1013_v32  ;;  %v1020_v1 = vrot.slane %v1019_v16, 4 }
 0x1f9   :  { %v975_v36 = vrot.slane %v974_v25, 1  ;;  %v981_v41 = vmax.f32 %v979_v10, %v980_v26  ;;  %v988_v51 = vmax.f32 %v986_v18, %v987_v8  ;;  %v1008_v56 = vrot.slane %v1007_v15, 2 }
 0x1fa   :  { %v995_v50 = vmax.f32 %v993_v22, %v994_v6  ;;  %v1002_v38 = vmax.f32 %v1000_v31, %v1001_v43  ;;  %v1015_v57 = vrot.slane %v1014_v49, 2  ;;  %v1021_v9 = vmax.f32 %v1019_v16, %v1020_v1 }
 0x1fb   :  { %v976_v0 = vmax.f32 %v974_v25, %v975_v36  ;;  %v982_v60 = vrot.slane %v981_v41, 1  ;;  %v989_v62 = vrot.slane %v988_v51, 1  ;;  %v1009_v7 = vmax.f32 %v1007_v15, %v1008_v56 }
 0x1fc   :  { %v996_v63 = vrot.slane %v995_v50, 1  ;;  %v1003_v14 = vrot.slane %v1002_v38, 1  ;;  %v1016_v33 = vmax.f32 %v1014_v49, %v1015_v57  ;;  %v483_v55 = vadd.f32 %v4950_v12, %v4924_v46 }
 0x1fd   :  { %v983_v13 = vmax.f32 %v981_v41, %v982_v60  ;;  %v990_v10 = vmax.f32 %v988_v51, %v989_v62  ;;  %v1010_v18 = vrot.slane %v1009_v7, 1  ;;  %v1022_v22 = vrot.slane %v1021_v9, 2 }
 0x1fe   :  { %v997_v24 = vmax.f32 %v995_v50, %v996_v63  ;;  %v5074_v26 = vmax.f32 %v1201_v54, 0.0  ;;  %v1017_v25 = vrot.slane %v1016_v33, 1  ;;  %v485_v31 = vadd.f32 %v4959_v2, %v4928_v48 }
 0x1ff   :  { %v1202_v32 = vmax.f32 %v976_v0, %v983_v13  ;;  %v1004_v8 = vmax.f32 %v1002_v38, %v1003_v14  ;;  %v1011_v6 = vmax.f32 %v1009_v7, %v1010_v18  ;;  %v1023_v15 = vmax.f32 %v1021_v9, %v1022_v22 }
 0x200   :  { %v1203_v16 = vmax.f32 %v990_v10, %v997_v24  ;;  %v563_v12 = vcombine.low %v483_v55, %v485_v31  ;;  %v564_v43 = vcombine.high %v483_v55, %v485_v31  ;;  %v1018_v56 = vmax.f32 %v1016_v33, %v1017_v25 }
 0x201   :  { %v1024_v49 = vrot.slane %v1023_v15, 1  ;;  %v1204_v51 = vmax.f32 %v1004_v8, %v1011_v6  ;;  %v5080_v50 = vmax.f32 %v1202_v32, 0.0  ;;  %v5088_v0 = vadd.f32 %v4966_v17, %v4924_v46 }
 0x202   :  { %v5082_v54 = vmax.f32 %v1203_v16, 0.0  ;;  %v571_v1 = vrot.slane %v563_v12, %v4932_v52  ;;  %v578_v2 = vrot.slane %v564_v43, %v4932_v52  ;;  %v5105_v55 = vadd.f32 %v4969_v44, %v4928_v48 }
 0x203   :  { %v1025_v60 = vmax.f32 %v1023_v15, %v1024_v49  ;;  %v5090_v38 = vmax.f32 %v1204_v51, 0.0  ;;  %v1250_v33 = vmul.f32 %v5080_v50, %v5080_v50  ;;  %v5116_v8 = vadd.f32 %v4971_v53, %v4924_v46 }
 0x204   :  { %6116 = vst [vmem:[#allocation18_spill] sm:$0xff] %v5082_v54  ;;  %v1251_v57 = vmul.f32 %v5082_v54, %v5082_v54  ;;  %v1335_v62 = vrot.slane %v5082_v54, 7  ;;  %v579_v63 = vcombine.high %v571_v1, %v571_v1  ;;  %v580_v7 = vcombine.high %v578_v2, %v578_v2 }
 0x205   :  { %6117 = vst [vmem:[#allocation19_spill] sm:$0xff] %v5090_v38  ;;  %v719_v9 = vrot.slane %v571_v1, %v4932_v52  ;;  %v735_v13 = vrot.slane %v578_v2, %v4932_v52  ;;  %v1205_v14 = vmax.f32 %v1018_v56, %v1025_v60  ;;  %v5101_v17 = vmul.f32 %v5090_v38, %v5090_v38 }
 0x206   :  { %v1336_v10 = vsel %vm1315_vm10, %v1335_v62, %v5080_v50  ;;  %v1377_v24 = vrot.slane %v1251_v57, 7  ;;  %v727_v22 = vrot.slane %v579_v63, %v4932_v52  ;;  %v1337_v32 = vrot.slane %v5090_v38, 6 }
 0x207   :  { %v720_v18 = vcombine.high %v719_v9, %v719_v9  ;;  %v5110_v25 = vmax.f32 %v1205_v14, 0.0  ;;  %v743_v31 = vrot.slane %v580_v7, %v4932_v52  ;;  %v736_v44 = vcombine.high %v735_v13, %v735_v13 }
 0x208   :  { %v728_v6 = vcombine.high %v727_v22, %v727_v22  ;;  %v1026_v15 = vsel %vm857_vm9, %v719_v9, -inf  ;;  %v5125_v43 = vsel %vm1318_vm11, %v1337_v32, %v1336_v10  ;;  %v1378_v49 = vsel %vm1315_vm10, %v1377_v24, %v1250_v33 }
 0x209   :  { %v1033_v16 = vsel %vm857_vm9, %v720_v18, -inf  ;;  %v5122_v12 = vmul.f32 %v5110_v25, %v5110_v25  ;;  %v1379_v51 = vrot.slane %v5101_v17, 6  ;;  %v1027_v56 = vrot.slane %v1026_v15, 4 }
 0x20a   :  { %v1034_v46 = vrot.slane %v1033_v16, 4  ;;  %v1040_v53 = vsel %vm857_vm9, %v727_v22, -inf  ;;  %v1047_v1 = vsel %vm857_vm9, %v728_v6, -inf  ;;  %v744_v2 = vcombine.high %v743_v31, %v743_v31 }
 0x20b   :  { %v1041_v60 = vrot.slane %v1040_v53, 4  ;;  %v1048_v57 = vrot.slane %v1047_v1, 4  ;;  %v1054_v62 = vsel %vm857_vm9, %v735_v13, -inf  ;;  %v1028_v63 = vmax.f32 %v1026_v15, %v1027_v56 }
 0x20c   :  { %v1035_v7 = vmax.f32 %v1033_v16, %v1034_v46  ;;  %v1055_v9 = vrot.slane %v1054_v62, 4  ;;  %v1061_v14 = vsel %vm857_vm9, %v736_v44, -inf  ;;  %v1068_v17 = vsel %vm857_vm9, %v743_v31, -inf }
 0x20d   :  { %v1042_v10 = vmax.f32 %v1040_v53, %v1041_v60  ;;  %v1049_v33 = vmax.f32 %v1047_v1, %v1048_v57  ;;  %v1062_v24 = vrot.slane %v1061_v14, 4  ;;  %v1029_v18 = vrot.slane %v1028_v63, 2 }
 0x20e   :  { %v1036_v32 = vrot.slane %v1035_v7, 2  ;;  %v1056_v22 = vmax.f32 %v1054_v62, %v1055_v9  ;;  %v1069_v45 = vrot.slane %v1068_v17, 4  ;;  %v1075_v47 = vsel %vm857_vm9, %v744_v2, -inf }
 0x20f   :  { %v1043_v6 = vrot.slane %v1042_v10, 2  ;;  %v1050_v41 = vrot.slane %v1049_v33, 2  ;;  %v1063_v5 = vmax.f32 %v1061_v14, %v1062_v24  ;;  %v1030_v13 = vmax.f32 %v1028_v63, %v1029_v18 }
 0x210   :  { %v1037_v15 = vmax.f32 %v1035_v7, %v1036_v32  ;;  %v1057_v16 = vrot.slane %v1056_v22, 2  ;;  %v1070_v56 = vmax.f32 %v1068_v17, %v1069_v45  ;;  %v1076_v1 = vrot.slane %v1075_v47, 4 }
 0x211   :  { %v1044_v46 = vmax.f32 %v1042_v10, %v1043_v6  ;;  %v1051_v44 = vmax.f32 %v1049_v33, %v1050_v41  ;;  %v1064_v53 = vrot.slane %v1063_v5, 2  ;;  %v1031_v60 = vrot.slane %v1030_v13, 1 }
 0x212   :  { %v1038_v57 = vrot.slane %v1037_v15, 1  ;;  %v1058_v31 = vmax.f32 %v1056_v22, %v1057_v16  ;;  %v1071_v27 = vrot.slane %v1070_v56, 2  ;;  %v1077_v35 = vmax.f32 %v1075_v47, %v1076_v1 }
 0x213   :  { %v1045_v36 = vrot.slane %v1044_v46, 1  ;;  %v1052_v62 = vrot.slane %v1051_v44, 1  ;;  %v1065_v9 = vmax.f32 %v1063_v5, %v1064_v53  ;;  %v1032_v29 = vmax.f32 %v1030_v13, %v1031_v60 }
 0x214   :  { %v1039_v14 = vmax.f32 %v1037_v15, %v1038_v57  ;;  %v1059_v24 = vrot.slane %v1058_v31, 1  ;;  %v1072_v2 = vmax.f32 %v1070_v56, %v1071_v27  ;;  %v1078_v45 = vrot.slane %v1077_v35, 2 }
 0x215   :  { %v1046_v63 = vmax.f32 %v1044_v46, %v1045_v36  ;;  %v1053_v7 = vmax.f32 %v1051_v44, %v1052_v62  ;;  %v1066_v18 = vrot.slane %v1065_v9, 1  ;;  %v581_v17 = vcombine.low %v5088_v0, %v5105_v55 }
 0x216   :  { %v1060_v10 = vmax.f32 %v1058_v31, %v1059_v24  ;;  %v1073_v41 = vrot.slane %v1072_v2, 1  ;;  %v1206_v33 = vmax.f32 %v1032_v29, %v1039_v14  ;;  %v1079_v22 = vmax.f32 %v1077_v35, %v1078_v45 }
 0x217   :  { %v1067_v32 = vmax.f32 %v1065_v9, %v1066_v18  ;;  %v1207_v6 = vmax.f32 %v1046_v63, %v1053_v7  ;;  %v582_v47 = vcombine.high %v5088_v0, %v5105_v55  ;;  %v5141_v27 = vsel %vm1318_vm11, %v1379_v51, %v1378_v49 }
 0x218   :  { %v5143_v36 = vmax.f32 %v1206_v33, 0.0  ;;  %v589_v13 = vrot.slane %v581_v17, %v4932_v52  ;;  %v1080_v15 = vrot.slane %v1079_v22, 1  ;;  %v5155_v51 = vmax.f32 %v1072_v2, %v1073_v41 }
 0x219   :  { %v1208_v29 = vmax.f32 %v1060_v10, %v1067_v32  ;;  %v5146_v16 = vmax.f32 %v1207_v6, 0.0  ;;  %v596_v56 = vrot.slane %v582_v47, %v4932_v52  ;;  %v5163_v53 = vadd.f32 %v4973_v58, %v4928_v48 }
 0x21a   :  { %v5152_v0 = vmul.f32 %v5143_v36, %v5143_v36  ;;  %v597_v55 = vcombine.high %v589_v13, %v589_v13  ;;  %v751_v49 = vrot.slane %v589_v13, %v4932_v52  ;;  %v5157_v46 = vmax.f32 %v1079_v22, %v1080_v15 }
 0x21b   :  { %v5159_v44 = vmax.f32 %v1208_v29, 0.0  ;;  %v598_v60 = vcombine.high %v596_v56, %v596_v56  ;;  %v5171_v9 = vmul.f32 %v5146_v16, %v5146_v16  ;;  %v767_v48 = vrot.slane %v596_v56, %v4932_v52 }
 0x21c   :  { %v752_v57 = vcombine.high %v751_v49, %v751_v49  ;;  %v759_v31 = vrot.slane %v597_v55, %v4932_v52  ;;  %v1082_v63 = vsel %vm857_vm9, %v751_v49, -inf }
 0x21d   :  { %v775_v58 = vrot.slane %v598_v60, %v4932_v52  ;;  %v5180_v7 = vmul.f32 %v5159_v44, %v5159_v44  ;;  %v1083_v45 = vrot.slane %v1082_v63, 4  ;;  %v768_v41 = vcombine.high %v767_v48, %v767_v48 }
 0x21e   :  { %v760_v2 = vcombine.high %v759_v31, %v759_v31  ;;  %v1089_v10 = vsel %vm857_vm9, %v752_v57, -inf  ;;  %v1096_v32 = vsel %vm857_vm9, %v759_v31, -inf  ;;  %v1110_v13 = vsel %vm857_vm9, %v767_v48, -inf }
 0x21f   :  { %v776_v33 = vcombine.high %v775_v58, %v775_v58  ;;  %v1090_v17 = vrot.slane %v1089_v10, 4  ;;  %v1084_v22 = vmax.f32 %v1082_v63, %v1083_v45  ;;  %v1097_v6 = vrot.slane %v1096_v32, 4 }
 0x220   :  { %v1103_v47 = vsel %vm857_vm9, %v760_v2, -inf  ;;  %v1111_v56 = vrot.slane %v1110_v13, 4  ;;  %v1117_v55 = vsel %vm857_vm9, %v768_v41, -inf  ;;  %v1124_v57 = vsel %vm857_vm9, %v775_v58, -inf }
 0x221   :  { %v1091_v15 = vmax.f32 %v1089_v10, %v1090_v17  ;;  %v1104_v29 = vrot.slane %v1103_v47, 4  ;;  %v1085_v49 = vrot.slane %v1084_v22, 2  ;;  %v1098_v60 = vmax.f32 %v1096_v32, %v1097_v6 }
 0x222   :  { %v1118_v24 = vrot.slane %v1117_v55, 4  ;;  %v1112_v14 = vmax.f32 %v1110_v13, %v1111_v56  ;;  %v1125_v31 = vrot.slane %v1124_v57, 4  ;;  %v1131_v2 = vsel %vm857_vm9, %v776_v33, -inf }
 0x223   :  { %v1092_v35 = vrot.slane %v1091_v15, 2  ;;  %v1105_v18 = vmax.f32 %v1103_v47, %v1104_v29  ;;  %v1086_v63 = vmax.f32 %v1084_v22, %v1085_v49  ;;  %v1099_v45 = vrot.slane %v1098_v60, 2 }
 0x224   :  { %v1119_v1 = vmax.f32 %v1117_v55, %v1118_v24  ;;  %v1113_v17 = vrot.slane %v1112_v14, 2  ;;  %v1126_v5 = vmax.f32 %v1124_v57, %v1125_v31  ;;  %v1132_v32 = vrot.slane %v1131_v2, 4 }
 0x225   :  { %v1093_v48 = vmax.f32 %v1091_v15, %v1092_v35  ;;  %v1106_v10 = vrot.slane %v1105_v18, 2  ;;  %v1087_v20 = vrot.slane %v1086_v63, 1  ;;  %v1100_v41 = vmax.f32 %v1098_v60, %v1099_v45 }
 0x226   :  { %v1120_v62 = vrot.slane %v1119_v1, 2  ;;  %v1114_v58 = vmax.f32 %v1112_v14, %v1113_v17  ;;  %v1127_v54 = vrot.slane %v1126_v5, 2  ;;  %v1133_v22 = vmax.f32 %v1131_v2, %v1132_v32 }
 0x227   :  { %v1094_v6 = vrot.slane %v1093_v48, 1  ;;  %v1107_v38 = vmax.f32 %v1105_v18, %v1106_v10  ;;  %v1088_v47 = vmax.f32 %v1086_v63, %v1087_v20  ;;  %v1101_v13 = vrot.slane %v1100_v41, 1 }
 0x228   :  { %v1121_v29 = vmax.f32 %v1119_v1, %v1120_v62  ;;  %v1115_v55 = vrot.slane %v1114_v58, 1  ;;  %v1128_v33 = vmax.f32 %v1126_v5, %v1127_v54  ;;  %v1134_v49 = vrot.slane %v1133_v22, 2  ;;  %v1427_v54 = vld [vmem:[%s6084_s5] sm:$0xff]  ;;  %v1428_v5 = vld [vmem:[%s6084_s5 + $0x8] sm:$0xff] }
 0x229   :  { %v1095_v56 = vmax.f32 %v1093_v48, %v1094_v6  ;;  %v1108_v24 = vrot.slane %v1107_v38, 1  ;;  %v1102_v35 = vmax.f32 %v1100_v41, %v1101_v13  ;;  %v599_v60 = vcombine.low %v5116_v8, %v5163_v53 }
 0x22a   :  { %v1122_v15 = vrot.slane %v1121_v29, 1  ;;  %v1116_v31 = vmax.f32 %v1114_v58, %v1115_v55  ;;  %v1129_v45 = vrot.slane %v1128_v33, 1  ;;  %v1135_v10 = vmax.f32 %v1133_v22, %v1134_v49 }
 0x22b   :  { %v1109_v57 = vmax.f32 %v1107_v38, %v1108_v24  ;;  %v1210_v18 = vmax.f32 %v1088_v47, %v1095_v56  ;;  %v600_v20 = vcombine.high %v5116_v8, %v5163_v53  ;;  %v607_v1 = vrot.slane %v599_v60, %v4932_v52 }
 0x22c   :  { %v1123_v14 = vmax.f32 %v1121_v29, %v1122_v15  ;;  %v1130_v62 = vmax.f32 %v1128_v33, %v1129_v45  ;;  %v1136_v2 = vrot.slane %v1135_v10, 1  ;;  %v6103_v8 = vmov 0.0|0.0  }
 0x22d   :  { %v1211_v63 = vmax.f32 %v1102_v35, %v1109_v57  ;;  %v614_v17 = vrot.slane %v600_v20, %v4932_v52  ;;  %v615_v41 = vcombine.high %v607_v1, %v607_v1  ;;  %4075 = vmatprep.subr.bf16.mxu1 %v6103_v8  ;;  %v5204_v53 = vmax.f32 %v1210_v18, 0.0 }
 0x22e   :  { %v1212_v48 = vmax.f32 %v1116_v31, %v1123_v14  ;;  %v783_v6 = vrot.slane %v607_v1, %v4932_v52  ;;  %v4076_v58 = vpack.c.bf16 %v1428_v5, %v1427_v54  ;;  %v1137_v47 = vmax.f32 %v1135_v10, %v1136_v2 }
 0x22f   :  { %v5206_v32 = vmax.f32 %v1211_v63, 0.0  ;;  %v616_v29 = vcombine.high %v614_v17, %v614_v17  ;;  %v791_v22 = vrot.slane %v615_v41, %v4932_v52  ;;  %v799_v33 = vrot.slane %v614_v17, %v4932_v52 }
 0x230   :  { %v5209_v13 = vmax.f32 %v1212_v48, 0.0  ;;  %v784_v55 = vcombine.high %v783_v6, %v783_v6  ;;  %4077 = vmatpush3.bf16.msra.mxu1 %v4076_v58  ;;  %v6119_v35 = vmax.f32 %v5155_v51, %v5157_v46  ;;  %v1213_v60 = vmax.f32 %v1130_v62, %v1137_v47 }
 0x231   :  { %v1259_v56 = vmul.f32 %v5206_v32, %v5206_v32  ;;  %v1349_v24 = vrot.slane %v5206_v32, 7  ;;  %4078 = vmatprep.subr.bf16.mxu1 %v6103_v8  ;;  %v792_v18 = vcombine.high %v791_v22, %v791_v22  ;;  %v807_v14 = vrot.slane %v616_v29, %v4932_v52 }
 0x232   :  { %6118 = vst [vmem:[#allocation20_spill] sm:$0xff] %v5209_v13  ;;  %v5219_v15 = vmax.f32 %v6119_v35, 0.0  ;;  %v5224_v57 = vmul.f32 %v5209_v13, %v5209_v13  ;;  %v1351_v45 = vrot.slane %v5209_v13, 6  ;;  %v1258_v51 = vmul.f32 %v5204_v53, %v5204_v53 }
 0x233   :  { %v1350_v31 = vsel %vm1315_vm10, %v1349_v24, %v5204_v53  ;;  %v1391_v46 = vrot.slane %v1259_v56, 7  ;;  %v800_v10 = vcombine.high %v799_v33, %v799_v33  ;;  %v1138_v20 = vsel %vm857_vm9, %v783_v6, -inf }
 0x234   :  { %v5234_v1 = vmax.f32 %v1213_v60, 0.0  ;;  %v5237_v54 = vsel %vm1318_vm11, %v1351_v45, %v1350_v31  ;;  %v1139_v5 = vrot.slane %v1138_v20, 4  ;;  %v1145_v62 = vsel %vm857_vm9, %v784_v55, -inf }
 0x235   :  { %v808_v2 = vcombine.high %v807_v14, %v807_v14  ;;  %v1146_v48 = vrot.slane %v1145_v62, 4  ;;  %v1152_v17 = vsel %vm857_vm9, %v791_v22, -inf  ;;  %v1159_v47 = vsel %vm857_vm9, %v792_v18, -inf }
 0x236   :  { %v1140_v41 = vmax.f32 %v1138_v20, %v1139_v5  ;;  %v1153_v58 = vrot.slane %v1152_v17, 4  ;;  %v1166_v6 = vsel %vm857_vm9, %v799_v33, -inf  ;;  %v5245_v29 = vsel %vm1315_vm10, %v1391_v46, %v1258_v51 }
 0x237   :  { %v1147_v56 = vmax.f32 %v1145_v62, %v1146_v48  ;;  %v1160_v24 = vrot.slane %v1159_v47, 4  ;;  %v1167_v35 = vrot.slane %v1166_v6, 4  ;;  %v1173_v31 = vsel %vm857_vm9, %v800_v10, -inf }
 0x238   :  { %v1141_v60 = vrot.slane %v1140_v41, 2  ;;  %v1154_v55 = vmax.f32 %v1152_v17, %v1153_v58  ;;  %v1180_v45 = vsel %vm857_vm9, %v807_v14, -inf  ;;  %v1174_v5 = vrot.slane %v1173_v31, 4 }
 0x239   :  { %v1148_v49 = vrot.slane %v1147_v56, 2  ;;  %v1161_v22 = vmax.f32 %v1159_v47, %v1160_v24  ;;  %v1168_v20 = vmax.f32 %v1166_v6, %v1167_v35  ;;  %v1181_v38 = vrot.slane %v1180_v45, 4 }
 0x23a   :  { %v1142_v63 = vmax.f32 %v1140_v41, %v1141_v60  ;;  %v1155_v18 = vrot.slane %v1154_v55, 2  ;;  %v1187_v33 = vsel %vm857_vm9, %v808_v2, -inf  ;;  %v1175_v48 = vmax.f32 %v1173_v31, %v1174_v5  ;;  %v1429_v41 = vld [vmem:[%s6084_s5 + $0x10] sm:$0xff]  ;;  %v1430_v2 = vld [vmem:[%s6084_s5 + $0x18] sm:$0xff]  ;;  %v1432_v31 = vld [vmem:[%s6084_s5 + $0x28] sm:$0xff] }
 0x23b   :  { %v1149_v51 = vmax.f32 %v1147_v56, %v1148_v49  ;;  %v1162_v46 = vrot.slane %v1161_v22, 2  ;;  %v1169_v62 = vrot.slane %v1168_v20, 2  ;;  %v1182_v17 = vmax.f32 %v1180_v45, %v1181_v38 }
 0x23c   :  { %v1143_v8 = vrot.slane %v1142_v63, 1  ;;  %v1156_v52 = vmax.f32 %v1154_v55, %v1155_v18  ;;  %v1188_v58 = vrot.slane %v1187_v33, 4  ;;  %v1176_v13 = vrot.slane %v1175_v48, 2  ;;  %v1431_v55 = vld [vmem:[%s6084_s5 + $0x20] sm:$0xff] }
 0x23d   :  { %v1150_v10 = vrot.slane %v1149_v51, 1  ;;  %v1163_v42 = vmax.f32 %v1161_v22, %v1162_v46  ;;  %v1170_v14 = vmax.f32 %v1168_v20, %v1169_v62  ;;  %v1183_v6 = vrot.slane %v1182_v17, 2  ;;  %v1433_v20 = vld [vmem:[%s6084_s5 + $0x30] sm:$0xff]  ;;  %v1435_v46 = vld [vmem:[%s6084_s5 + $0x40] sm:$0xff]  ;;  %v1436_v62 = vld [vmem:[%s6084_s5 + $0x48] sm:$0xff] }
 0x23e   :  { %v1144_v49 = vmax.f32 %v1142_v63, %v1143_v8  ;;  %v1157_v47 = vrot.slane %v1156_v52, 1  ;;  %v1189_v56 = vmax.f32 %v1187_v33, %v1188_v58  ;;  %v1177_v60 = vmax.f32 %v1175_v48, %v1176_v13 }
 0x23f   :  { %v1151_v24 = vmax.f32 %v1149_v51, %v1150_v10  ;;  %v1164_v35 = vrot.slane %v1163_v42, 1  ;;  %v1171_v38 = vrot.slane %v1170_v14, 1  ;;  %v5264_v45 = vmul.f32 %v5234_v1, %v5234_v1  ;;  %v1434_v51 = vld [vmem:[%s6084_s5 + $0x38] sm:$0xff] }
 0x240   :  { %v1184_v8 = vmax.f32 %v1182_v17, %v1183_v6  ;;  %v1190_v63 = vrot.slane %v1189_v56, 2  ;;  %v4079_v22 = vpack.c.bf16 %v1430_v2, %v1429_v41  ;;  %v1158_v13 = vmax.f32 %v1156_v52, %v1157_v47  ;;  %v5285_v47 = vld [vmem:[%s6084_s5 + $0x50] sm:$0xff]  ;;  %v5290_v6 = vld [vmem:[%s6084_s5 + $0x58] sm:$0xff] }
 0x241   :  { %v1165_v5 = vmax.f32 %v1163_v42, %v1164_v35  ;;  %v1178_v18 = vrot.slane %v1177_v60, 1  ;;  %v1214_v33 = vmax.f32 %v1144_v49, %v1151_v24  ;;  %v1353_v48 = vrot.slane %v5234_v1, 5 }
 0x242   :  { %v1185_v17 = vrot.slane %v1184_v8, 1  ;;  %v1191_v58 = vmax.f32 %v1189_v56, %v1190_v63  ;;  %4080 = vmatpush3.bf16.msra.mxu1 %v4079_v22  ;;  %v4082_v52 = vpack.c.bf16 %v1432_v31, %v1431_v55  ;;  %v1172_v42 = vmax.f32 %v1170_v14, %v1171_v38  ;;  %v5296_v38 = vld [vmem:[%s6084_s5 + $0x60] sm:$0xff] }
 0x243   :  { %v1179_v10 = vmax.f32 %v1177_v60, %v1178_v18  ;;  %v1215_v41 = vmax.f32 %v1158_v13, %v1165_v5  ;;  %v5279_v2 = vmax.f32 %v1214_v33, 0.0  ;;  %v6120_v49 = vmov 0.0|0.0   ;;  %v5301_v60 = vld [vmem:[%s6084_s5 + $0x68] sm:$0xff] }
 0x244   :  { %4081 = vmatprep.subr.bf16.mxu1 %v6120_v49  ;;  %v1395_v56 = vrot.slane %v5264_v45, 5  ;;  %v1192_v24 = vrot.slane %v1191_v58, 1  ;;  %v4085_v14 = vpack.c.bf16 %v1434_v51, %v1433_v20  ;;  %v4088_v35 = vpack.c.bf16 %v1436_v62, %v1435_v46 }
 0x245   :  { %v1186_v55 = vmax.f32 %v1184_v8, %v1185_v17  ;;  %v1216_v31 = vmax.f32 %v1172_v42, %v1179_v10  ;;  %v5303_v63 = vmax.f32 %v1215_v41, 0.0  ;;  %v5307_v22 = vmul.f32 %v5279_v2, %v5279_v2 }
 0x246   :  { %v1193_v20 = vmax.f32 %v1191_v58, %v1192_v24  ;;  %4083 = vmatpush3.bf16.msra.mxu1 %v4082_v52  ;;  %v4091_v13 = vpack.c.bf16 %v5290_v6, %v5285_v47  ;;  %v1355_v8 = vrot.slane %v5279_v2, 4  ;;  %v4094_v33 = vpack.c.bf16 %v5301_v60, %v5296_v38 }
 0x247   :  { %v5311_v5 = vmax.f32 %v1216_v31, 0.0  ;;  %v5315_v18 = vmul.f32 %v5303_v63, %v5303_v63  ;;  %4084 = vmatprep.subr.bf16.mxu1 %v6120_v49  ;;  %v4577_v51 = vmov 0.0   ;;  %v1397_v62 = vrot.slane %v5307_v22, 4 }
 0x248   :  { %3985 = vmatprep.mubr.msk.f32.mxu1 %vm4576_vm12, %v4577_v51  ;;  %v1217_v46 = vmax.f32 %v1186_v55, %v1193_v20  ;;  %v1249_v17 = vmul.f32 %v5074_v26, %v5074_v26  ;;  %v6121_v58 = vrot.slane %v5005_v59, 5  ;;  %v1257_v41 = vmul.f32 %v5219_v15, %v5219_v15 }
 0x249   :  { %v1264_v10 = vmul.f32 %v5311_v5, %v5311_v5  ;;  %v6122_v47 = vrot.slane %v5028_v3, 4  ;;  %v6123_v24 = vrot.slane %v5036_v23, 3  ;;  %v6124_v55 = vrot.slane %v5110_v25, 5 }
 0x24a   :  { %v1322_v52 = vsel %vm1321_vm13, %v6121_v58, %v5012_v4  ;;  %v5330_v42 = vmax.f32 %v1217_v46, 0.0  ;;  %4086 = vmatpush3.bf16.msra.mxu1 %v4085_v14  ;;  %v1354_v14 = vsel %vm1321_vm13, %v1353_v48, %v5237_v54  ;;  %v6125_v22 = vrot.slane %v5055_v30, 2 }
 0x24b   :  { %v1325_v6 = vsel %vm1324_vm14, %v6122_v47, %v1322_v52  ;;  %4087 = vmatprep.subr.bf16.mxu1 %v6120_v49  ;;  %v1340_v31 = vsel %vm1321_vm13, %v6124_v55, %v5125_v43  ;;  %v1332_v46 = vrot.slane %v5074_v26, 1  ;;  %v6126_v58 = vrot.slane %v5143_v36, 4 }
 0x24c   :  { %v1328_v4 = vsel %vm1327_vm15, %v6123_v24, %v1325_v6  ;;  %v1356_v47 = vsel %vm1324_vm14, %v1355_v8, %v1354_v14  ;;  %v1265_v6 = vmul.f32 %v5330_v42, %v5330_v42  ;;  %v6127_v43 = vrot.slane %v5146_v16, 3 }
 0x24d   :  { %v1331_v20 = vsel %vm1330_vm0, %v6125_v22, %v1328_v4  ;;  %v1342_v52 = vsel %vm1324_vm14, %v6126_v58, %v1340_v31  ;;  %v1347_v54 = vrot.slane %v5219_v15, 1  ;;  %v1357_v48 = vrot.slane %v5303_v63, 3 }
 0x24e   :  { %v1344_v24 = vsel %vm1327_vm15, %v6127_v43, %v1342_v52  ;;  %4089 = vmatpush3.bf16.msra.mxu1 %v4088_v35  ;;  %v1334_v4 = vsel %vm1333_vm1, %v1332_v46, %v1331_v20  ;;  %v6128_v55 = vrot.slane %v5159_v44, 2  ;;  %v1359_v8 = vrot.slane %v5311_v5, 2 }
 0x24f   :  { %v6129_v14 = vrot.slane %v5017_v11, 5  ;;  %4090 = vmatprep.subr.bf16.mxu1 %v6120_v49  ;;  %v1358_v58 = vsel %vm1327_vm15, %v1357_v48, %v1356_v47  ;;  %v1361_v52 = vrot.slane %v5330_v42, 1  ;;  %v6130_v35 = vrot.slane %v5041_v28, 4 }
 0x250   :  { %v1346_v31 = vsel %vm1330_vm0, %v6128_v55, %v1344_v24  ;;  %v6131_v46 = vrot.slane %v5122_v12, 5  ;;  %v1360_v11 = vsel %vm1330_vm0, %v1359_v8, %v1358_v58  ;;  %v6133_v47 = vrot.slane %v5152_v0, 4 }
 0x251   :  { %v1368_v22 = vsel %vm1321_vm13, %v6129_v14, %v5034_v21  ;;  %v1348_v24 = vsel %vm1333_vm1, %v1347_v54, %v1346_v31  ;;  %v6132_v21 = vrot.slane %v5048_v19, 3  ;;  %v6134_v28 = vrot.slane %v5066_v61, 2 }
 0x252   :  { %v1370_v20 = vsel %vm1324_vm14, %v6130_v35, %v1368_v22  ;;  %v1382_v43 = vsel %vm1321_vm13, %v6131_v46, %v5141_v27  ;;  %v6135_v12 = vrot.slane %v5171_v9, 3  ;;  %v1389_v22 = vrot.slane %v1257_v41, 1  ;;  %4092 = vmatpush3.bf16.msra.mxu1 %v4091_v13 }
 0x253   :  { %v1372_v55 = vsel %vm1327_vm15, %v6132_v21, %v1370_v20  ;;  %v1384_v48 = vsel %vm1324_vm14, %v6133_v47, %v1382_v43  ;;  %v6136_v54 = vrot.slane %v5224_v57, 6  ;;  %v1375_v31 = vrot.slane %v1249_v17, 1  ;;  %4093 = vmatprep.subr.bf16.mxu1 %v6120_v49  ;;  %v1441_v57 = vld [vmem:[%s6084_s5 + $0x70] sm:$0xff] }
 0x254   :  { %v1374_v14 = vsel %vm1330_vm0, %v6134_v28, %v1372_v55  ;;  %v1386_v27 = vsel %vm1327_vm15, %v6135_v12, %v1384_v48  ;;  %v6137_v0 = vrot.slane %v5180_v7, 2  ;;  %v1399_v9 = vrot.slane %v5315_v18, 3  ;;  %v1546_v12 = vld [vmem:[%s6085_s6] sm:$0xff] }
 0x255   :  { %v1394_v19 = vsel %vm1318_vm11, %v6136_v54, %v5245_v29  ;;  %v1442_v29 = vld [vmem:[%s6084_s5 + $0x78] sm:$0xff]  ;;  %v1362_v7 = vsel %vm1333_vm1, %v1361_v52, %v1360_v11  ;;  %v1401_v17 = vrot.slane %v1264_v10, 2  ;;  %v1403_v41 = vrot.slane %v1265_v6, 1  ;;  %v4285_v54 = vld [vmem:[#allocation5 + $0xa0] ss:$8 sps:$4 sm:$0xff]  }
 0x256   :  { %v1388_v8 = vsel %vm1330_vm0, %v6137_v0, %v1386_v27  ;;  %v1396_v61 = vsel %vm1321_vm13, %v1395_v56, %v1394_v19  ;;  %v1376_v56 = vsel %vm1333_vm1, %v1375_v31, %v1374_v14  ;;  %v1411_v58 = vadd.f32 %v1348_v24, %v1334_v4  ;;  %4095 = vmatpush3.bf16.msra.mxu1 %v4094_v33  ;;  %v1547_v27 = vld [vmem:[%s6085_s6 + $0x8] sm:$0x3]  ;;  %v4255_v19 = vld [vmem:[#allocation5] ss:$8 sps:$4 sm:$0xff]   ;;  %v4260_v0 = vld [vmem:[#allocation5 + $0x14] ss:$8 sps:$4 sm:$0xff]  }
 0x257   :  { %v1390_v13 = vsel %vm1333_vm1, %v1389_v22, %v1388_v8  ;;  %v1398_v45 = vsel %vm1324_vm14, %v1397_v62, %v1396_v61  ;;  %v4097_v46 = vpack.c.bf16 %v1442_v29, %v1441_v57  ;;  %4096 = vmatprep.subr.bf16.mxu1 %v6120_v49  ;;  %v4100_v22 = vpack.c.bf16 %v1547_v27, %v1546_v12  ;;  %v4257_v31 = vld [vmem:[#allocation5 + $0x4] ss:$8 sps:$4 sm:$0xff]   ;;  %v4258_v8 = vld [vmem:[#allocation5 + $0x10] ss:$8 sps:$4 sm:$0xff]   ;;  %v4266_v57 = vld [vmem:[#allocation5 + $0x34] ss:$8 sps:$4 sm:$0xff]  }
 0x258   :  { %v1400_v18 = vsel %vm1327_vm15, %v1399_v9, %v1398_v45  ;;  %v1419_v20 = vadd.f32 %v1390_v13, %v1376_v56  ;;  %v1412_v43 = vadd.f32 %v1411_v58, %v1362_v7  ;;  %2430 = vmatprep.subr.bf16.mxu0 %v4257_v31  ;;  %v4263_v61 = vld [vmem:[#allocation5 + $0x24] ss:$8 sps:$4 sm:$0xff]   ;;  %v4261_v9 = vld [vmem:[#allocation5 + $0x20] ss:$8 sps:$4 sm:$0xff]   ;;  %v4264_v29 = vld [vmem:[#allocation5 + $0x30] ss:$8 sps:$4 sm:$0xff]  }
 0x259   :  { %v1402_v35 = vsel %vm1330_vm0, %v1401_v17, %v1400_v18  ;;  %2431 = vmatpush1.bf16.msra.mxu0 %v4255_v19  ;;  %v4284_v12 = vld [vmem:[#allocation5 + $0x94] ss:$8 sps:$4 sm:$0xff]   ;;  %v4282_v27 = vld [vmem:[#allocation5 + $0x90] ss:$8 sps:$4 sm:$0xff]  }
 0x25a   :  { %v1404_v52 = vsel %vm1333_vm1, %v1403_v41, %v1402_v35  ;;  %v1413_v10 = vrot.slane %v1412_v43, 4  ;;  %4098 = vmatpush3.bf16.msra.mxu1 %v4097_v46  ;;  %2432 = vmatprep.subr.bf16.mxu0 %v4260_v0  ;;  %v4579_v35 = vmov 1966171168   ;;  %v4288_v19 = vld [vmem:[#allocation5 + $0xb0] ss:$8 sps:$4 sm:$0xff]  }
 0x25b   :  { %v1420_v62 = vadd.f32 %v1419_v20, %v1404_v52  ;;  %4099 = vmatprep.subr.bf16.mxu1 %v6120_v49  ;;  %v1530_v20 = vunpack.c.l.s4 %v4579_v35  ;;  %v4290_v31 = vld [vmem:[#allocation5 + $0xb4] ss:$8 sps:$4 sm:$0xff]   ;;  %v4293_v0 = vld [vmem:[#allocation5 + $0xc4] ss:$8 sps:$4 sm:$0xff]  }
 0x25c   :  { %v1414_v21 = vadd.f32 %v1413_v10, %v1412_v43 }
 0x25d   :  { %v1421_v11 = vrot.slane %v1420_v62, 4  ;;  %2433 = vmatpush1.bf16.msra.mxu0 %v4258_v8  ;;  %v1531_v46 = vunpack.c.0.s8 %v1530_v20  ;;  %v4291_v8 = vld [vmem:[#allocation5 + $0xc0] ss:$8 sps:$4 sm:$0xff]  }
 0x25e   :  { %v1415_v4 = vrot.slane %v1414_v21, 2  ;;  %2434 = vmatprep.subr.bf16.mxu0 %v4263_v61  ;;  %v4296_v61 = vld [vmem:[#allocation5 + $0xd4] ss:$8 sps:$4 sm:$0xff]  }
 0x25f   :  { %v1422_v6 = vadd.f32 %v1421_v11, %v1420_v62  ;;  %v5451_v52 = vsub.s32 %v1531_v46, %v4917_v39  ;;  %v1525_v11 = vld [vmem:[%s6082_s3] sm:$0x1] }
 0x260   :  { %v1416_v55 = vadd.f32 %v1415_v4, %v1414_v21  ;;  %v4267_v4 = vld [vmem:[#allocation5 + $0x40] ss:$8 sps:$4 sm:$0xff]  }
 0x261   :  { %v1423_v24 = vrot.slane %v1422_v6, 2  ;;  %2435 = vmatpush1.bf16.msra.mxu0 %v4261_v9  ;;  %v4294_v9 = vld [vmem:[#allocation5 + $0xd0] ss:$8 sps:$4 sm:$0xff]  }
 0x262   :  { %v1417_v38 = vrot.slane %v1416_v55, 1  ;;  %2436 = vmatprep.subr.bf16.mxu0 %v4266_v57  ;;  %v4299_v57 = vld [vmem:[#allocation5 + $0xe4] ss:$8 sps:$4 sm:$0xff]  }
 0x263   :  { %v1424_v47 = vadd.f32 %v1423_v24, %v1422_v6  ;;  %v4269_v24 = vld [vmem:[#allocation5 + $0x44] ss:$8 sps:$4 sm:$0xff]  }
 0x264   :  { %v1418_v48 = vadd.f32 %v1417_v38, %v1416_v55  ;;  %v4272_v55 = vld [vmem:[#allocation5 + $0x54] ss:$8 sps:$4 sm:$0xff]   ;;  %v4275_v38 = vld [vmem:[#allocation5 + $0x64] ss:$8 sps:$4 sm:$0xff]  }
 0x265   :  { %v1425_v60 = vrot.slane %v1424_v47, 1  ;;  %2437 = vmatpush1.bf16.msra.mxu0 %v4264_v29  ;;  %v4297_v29 = vld [vmem:[#allocation5 + $0xe0] ss:$8 sps:$4 sm:$0xff]  }
 0x266   :  { %2438 = vmatprep.subr.bf16.mxu0 %v4269_v24  ;;  %v6140_v24 = vld [vmem:[#allocation20_spill] sm:$0xff] }
 0x267   :  { %v1426_v33 = vadd.f32 %v1425_v60, %v1424_v47  ;;  %v4270_v47 = vld [vmem:[#allocation5 + $0x50] ss:$8 sps:$4 sm:$0xff]   ;;  %v4273_v60 = vld [vmem:[#allocation5 + $0x60] ss:$8 sps:$4 sm:$0xff]  }
 0x269   :  { %v1445_v28 = vrot.slane %v1426_v33, 7  ;;  %2439 = vmatpush1.bf16.msra.mxu0 %v4267_v4  ;;  %v4278_v33 = vld [vmem:[#allocation5 + $0x74] ss:$8 sps:$4 sm:$0xff]  }
 0x26a   :  { %2440 = vmatprep.subr.bf16.mxu0 %v4272_v55 }
 0x26b   :  { %v1446_v14 = vsel %vm1315_vm10, %v1445_v28, %v1418_v48  ;;  %v4276_v48 = vld [vmem:[#allocation5 + $0x70] ss:$8 sps:$4 sm:$0xff]   ;;  %v4281_v28 = vld [vmem:[#allocation5 + $0x84] ss:$8 sps:$4 sm:$0xff]  }
 0x26c   :  { %3986 = vmatmul.mubr.f32.vlgmr.msra.gmra.mrb[0].mxu1 %v1446_v14  ;;  %v4279_v14 = vld [vmem:[#allocation5 + $0x80] ss:$8 sps:$4 sm:$0xff]  }
 0x26d   :  { %3992 = vmatprep.mubr.msk.f32.mxu1 %vm4576_vm12, %v4577_v51  ;;  %4102 = vmatpush3.bf16.msk.msra.mxu1 %vm5437_vm4, %v4100_v22 }
 0x26e   :  { %4103 = vmatprep.subr.bf16.mxu1 %v6120_v49  ;;  %2441 = vmatpush1.bf16.msra.mxu0 %v4270_v47 }
 0x26f   :  { %2442 = vmatprep.subr.bf16.mxu0 %v4275_v38 }
 0x272   :  { %2443 = vmatpush1.bf16.msra.mxu0 %v4273_v60 }
 0x273   :  { %2444 = vmatprep.subr.bf16.mxu0 %v4278_v33 }
 0x276   :  { %2445 = vmatpush1.bf16.msra.mxu0 %v4276_v48 }
 0x277   :  { %2446 = vmatprep.subr.bf16.mxu0 %v4281_v28 }
 0x27a   :  { %2447 = vmatpush1.bf16.msra.mxu0 %v4279_v14 }
 0x27b   :  { %2448 = vmatprep.subr.bf16.mxu0 %v4284_v12 }
 0x27e   :  { %2449 = vmatpush1.bf16.msra.mxu0 %v4282_v27 }
 0x33f   :  { %v1514_v7 = vpop.f32.mrb[0].mxu1 }
 0x340   :  { %v1518_v13 = vmul.f32 0.0034722222, %v1514_v7  ;;  %v3987_v45 = vpop.f32.mrb[1].mxu1  ;;  %v4302_v7 = vld [vmem:[#allocation5 + $0xf4] ss:$8 sps:$4 sm:$0xff]  }
 0x341   :  { %v4305_v45 = vld [vmem:[#allocation5 + $0x104] ss:$8 sps:$4 sm:$0xff]  }
 0x342   :  { %v1519_v17 = vmul.f32 %v1518_v13, %v1518_v13  ;;  %3993 = vmatmul.mubr.msk.f32.vlgmr.msra.gmra.mrb[2].mxu1 %vm1548_vm5, %v1518_v13 }
 0x343   :  { %4106 = vmatpush3.bf16.msk.msra.mxu1 %vm5437_vm4, %v4100_v22  ;;  %3999 = vmatprep.mubr.msk.f32.mxu1 %vm4576_vm12, %v4577_v51  ;;  %v4287_v22 = vld [vmem:[#allocation5 + $0xa4] ss:$8 sps:$4 sm:$0xff]  }
 0x344   :  { %v1521_v56 = vrot.slane %v1519_v17, 7  ;;  %4107 = vmatprep.subr.bf16.mxu1 %v6120_v49  ;;  %2450 = vmatprep.subr.bf16.mxu0 %v4287_v22 }
 0x345   :  { %2451 = vmatpush1.bf16.msra.mxu0 %v4285_v54 }
 0x346   :  { %v1523_v18 = vsub.f32 %v1518_v13, %v1521_v56  ;;  %2452 = vmatprep.subr.bf16.mxu0 %v4290_v31  ;;  %v4300_v13 = vld [vmem:[#allocation5 + $0xf0] ss:$8 sps:$4 sm:$0xff]  }
 0x348   :  { %v1524_v41 = vmax.f32 %v1523_v18, 0.0 }
 0x349   :  { %2453 = vmatpush1.bf16.msra.mxu0 %v4288_v19 }
 0x34a   :  { %v1526_v58 = vadd.f32 1e-05, %v1524_v41  ;;  %2454 = vmatprep.subr.bf16.mxu0 %v4293_v0  ;;  %v1726_v41 = vld [vmem:[%s6083_s4] sm:$0x1] }
 0x34c   :  { %4415 = vrsqrt.f32 %v1526_v58 }
 0x34d   :  { %2455 = vmatpush1.bf16.msra.mxu0 %v4291_v8 }
 0x34e   :  { %2456 = vmatprep.subr.bf16.mxu0 %v4296_v61 }
 0x351   :  { %2457 = vmatpush1.bf16.msra.mxu0 %v4294_v9 }
 0x352   :  { %2458 = vmatprep.subr.bf16.mxu0 %v4299_v57 }
 0x355   :  { %2459 = vmatpush1.bf16.msra.mxu0 %v4297_v29 }
 0x356   :  { %v4416_v43 = vpop.eup %4415  ;;  %2460 = vmatprep.subr.bf16.mxu0 %v4302_v7 }
 0x357   :  { %v1535_v62 = vrot.slane %v4416_v43, %v5451_v52 }
 0x359   :  { %v1536_v10 = vcombine.high %v1535_v62, %v1535_v62  ;;  %2461 = vmatpush1.bf16.msra.mxu0 %v4300_v13 }
 0x35a   :  { %2473 = vmatprep.subr.bf16.mxu0 %v4305_v45 }
 0x35b   :  { %v1543_v21 = vrot.slane %v1536_v10, %v5451_v52 }
 0x35d   :  { %v1545_v6 = vmul.f32 %v1543_v21, %v1525_v11 }
 0x35f   :  { %4000 = vmatmul.mubr.msk.f32.vlgmr.msra.gmra.mrb[4].mxu1 %vm1548_vm5, %v1545_v6 }
 0x360   :  { %4034 = vmatprep.mubr.msk.f32.mxu1 %vm4576_vm12, %v4577_v51 }
 0x415   :  { %v1621_v17 = vpop.f32.mrb[2].mxu1 }
 0x416   :  { %v3994_v56 = vpop.f32.mrb[3].mxu1 }
 0x432   :  { %v1694_v18 = vpop.f32.mrb[4].mxu1 }
 0x433   :  { %v5465_v58 = vrot.slane %v1694_v18, %v4920_v40  ;;  %v1727_v35 = vmul.f32 %v1694_v18, %v1621_v17  ;;  %v4001_v20 = vpop.f32.mrb[5].mxu1 }
 0x435   :  { %v1728_v46 = vsub.f32 %v1726_v41, %v1727_v35  ;;  %v1703_v43 = vmul.f32 %v5465_v58, %v4991_v37  ;;  %v1704_v62 = vmul.f32 %v5465_v58, %v4986_v34  ;;  %v1705_v10 = vmul.f32 %v5465_v58, %v5005_v59 }
 0x436   :  { %v1706_v11 = vmul.f32 %v5465_v58, %v5028_v3  ;;  %v1707_v21 = vmul.f32 %v5465_v58, %v5036_v23  ;;  %v1708_v6 = vmul.f32 %v5465_v58, %v5055_v30  ;;  %v1709_v4 = vmul.f32 %v5465_v58, %v5074_v26 }
 0x437   :  { %v5482_v37 = vrot.slane %v1728_v46, %v4920_v40  ;;  %v1710_v34 = vmul.f32 %v5465_v58, %v5080_v50  ;;  %v1715_v59 = vmul.f32 %v5465_v58, %v5146_v16  ;;  %v1716_v3 = vmul.f32 %v5465_v58, %v5159_v44 }
 0x438   :  { %v1717_v23 = vmul.f32 %v5465_v58, %v5219_v15  ;;  %v1718_v30 = vmul.f32 %v5465_v58, %v5204_v53  ;;  %v1719_v26 = vmul.f32 %v5465_v58, %v5206_v32  ;;  %v1720_v55 = vmul.f32 %v5465_v58, %v6140_v24 }
 0x439   :  { %v1721_v50 = vmul.f32 %v5465_v58, %v5234_v1  ;;  %v1722_v16 = vmul.f32 %v5465_v58, %v5279_v2  ;;  %v1736_v44 = vadd.f32 %v5482_v37, %v1703_v43  ;;  %v5504_v47 = vadd.f32 %v5482_v37, %v1704_v62 }
 0x43a   :  { %v5507_v15 = vadd.f32 %v5482_v37, %v1705_v10  ;;  %v5510_v53 = vadd.f32 %v5482_v37, %v1706_v11  ;;  %v5513_v32 = vadd.f32 %v5482_v37, %v1707_v21  ;;  %v5516_v38 = vadd.f32 %v5482_v37, %v1708_v6  ;;  %v6141_v10 = vld [vmem:[#allocation17_spill] sm:$0xff] }
 0x43b   :  { %v5519_v1 = vadd.f32 %v5482_v37, %v1709_v4  ;;  %v5522_v2 = vadd.f32 %v5482_v37, %v1710_v34  ;;  %v1748_v60 = vadd.f32 %v5482_v37, %v1715_v59  ;;  %v5526_v33 = vadd.f32 %v5482_v37, %v1716_v3 }
 0x43c   :  { %v5529_v48 = vadd.f32 %v5482_v37, %v1717_v23  ;;  %v5532_v28 = vadd.f32 %v5482_v37, %v1718_v30  ;;  %v5535_v14 = vadd.f32 %v5482_v37, %v1719_v26  ;;  %v5538_v12 = vadd.f32 %v5482_v37, %v1720_v55 }
 0x43d   :  { %v5541_v27 = vadd.f32 %v5482_v37, %v1721_v50  ;;  %v5544_v22 = vadd.f32 %v5482_v37, %v1722_v16  ;;  %v1775_v54 = vrot.slane %v1736_v44, 7  ;;  %v1789_v19 = vrot.slane %v1748_v60, 7 }
 0x43e   :  { %v1807_v31 = vrot.slane %v5504_v47, 7  ;;  %v1809_v0 = vrot.slane %v5507_v15, 6  ;;  %v1811_v8 = vrot.slane %v5510_v53, 5  ;;  %v1813_v61 = vrot.slane %v5513_v32, 4 }
 0x43f   :  { %v1815_v9 = vrot.slane %v5516_v38, 3  ;;  %v1817_v57 = vrot.slane %v5519_v1, 2  ;;  %v1819_v29 = vrot.slane %v5522_v2, 1  ;;  %v1821_v7 = vrot.slane %v5526_v33, 7 }
 0x440   :  { %v1808_v13 = vsel %vm1315_vm10, %v1807_v31, %v1736_v44  ;;  %v1823_v45 = vrot.slane %v5529_v48, 6  ;;  %v1825_v17 = vrot.slane %v5532_v28, 5  ;;  %v1827_v56 = vrot.slane %v5535_v14, 4 }
 0x441   :  { %v1810_v18 = vsel %vm1318_vm11, %v1809_v0, %v1808_v13  ;;  %v1822_v41 = vsel %vm1315_vm10, %v1821_v7, %v1748_v60  ;;  %v1829_v35 = vrot.slane %v5538_v12, 3  ;;  %v1831_v20 = vrot.slane %v5541_v27, 2 }
 0x442   :  { %v1812_v46 = vsel %vm1321_vm13, %v1811_v8, %v1810_v18  ;;  %v1824_v43 = vsel %vm1318_vm11, %v1823_v45, %v1822_v41  ;;  %v1833_v62 = vrot.slane %v5544_v22, 1  ;;  %v1702_v11 = vmul.f32 %v5465_v58, %v6141_v10 }
 0x443   :  { %v1814_v21 = vsel %vm1324_vm14, %v1813_v61, %v1812_v46  ;;  %v1826_v6 = vsel %vm1321_vm13, %v1825_v17, %v1824_v43  ;;  %v1714_v4 = vmul.f32 %v5465_v58, %v5143_v36  ;;  %v1777_v34 = vrot.slane %v5504_v47, 6  ;;  %v6142_v46 = vld [vmem:[#allocation18_spill] sm:$0xff] }
 0x444   :  { %v1816_v59 = vsel %vm1327_vm15, %v1815_v9, %v1814_v21  ;;  %v1828_v3 = vsel %vm1324_vm14, %v1827_v56, %v1826_v6  ;;  %v1735_v23 = vadd.f32 %v5482_v37, %v1702_v11  ;;  %v1779_v30 = vrot.slane %v5507_v15, 5 }
 0x445   :  { %v1818_v26 = vsel %vm1330_vm0, %v1817_v57, %v1816_v59  ;;  %v1830_v24 = vsel %vm1327_vm15, %v1829_v35, %v1828_v3  ;;  %v1747_v55 = vadd.f32 %v5482_v37, %v1714_v4  ;;  %v1781_v50 = vrot.slane %v5510_v53, 4 }
 0x446   :  { %v1820_v36 = vsel %vm1333_vm1, %v1819_v29, %v1818_v26  ;;  %v1832_v16 = vsel %vm1330_vm0, %v1831_v20, %v1830_v24  ;;  %v1776_v44 = vsel %vm1315_vm10, %v1775_v54, %v1735_v23  ;;  %v1783_v60 = vrot.slane %v5513_v32, 3  ;;  %v4303_v24 = vld [vmem:[#allocation5 + $0x100] ss:$8 sps:$4 sm:$0xff]  }
 0x447   :  { %v1834_v31 = vsel %vm1333_vm1, %v1833_v62, %v1832_v16  ;;  %v1778_v0 = vsel %vm1318_vm11, %v1777_v34, %v1776_v44  ;;  %v1785_v8 = vrot.slane %v5516_v38, 2  ;;  %v1787_v61 = vrot.slane %v5519_v1, 1  ;;  %v6143_v62 = vld [vmem:[#allocation19_spill] sm:$0xff] }
 0x448   :  { %v1934_v9 = vpack.c.bf16 %v1834_v31, %v1820_v36  ;;  %v1780_v57 = vsel %vm1321_vm13, %v1779_v30, %v1778_v0  ;;  %v1790_v7 = vsel %vm1315_vm10, %v1789_v19, %v1747_v55  ;;  %v1791_v29 = vrot.slane %v5526_v33, 6  ;;  %v4308_v31 = vld [vmem:[#allocation5 + $0x114] ss:$8 sps:$4 sm:$0xff]  }
 0x449   :  { %v1782_v13 = vsel %vm1324_vm14, %v1781_v50, %v1780_v57  ;;  %v1793_v54 = vrot.slane %v5529_v48, 5  ;;  %v1795_v45 = vrot.slane %v5532_v28, 4  ;;  %v1797_v17 = vrot.slane %v5535_v14, 3 }
 0x44a   :  { %2462 = vmatprep.mubr.bf16.mxu0 %v1934_v9  ;;  %v1784_v56 = vsel %vm1327_vm15, %v1783_v60, %v1782_v13  ;;  %v1792_v18 = vsel %vm1318_vm11, %v1791_v29, %v1790_v7  ;;  %v1799_v41 = vrot.slane %v5538_v12, 2  ;;  %v1801_v35 = vrot.slane %v5541_v27, 1 }
 0x44b   :  { %v1786_v19 = vsel %vm1330_vm0, %v1785_v8, %v1784_v56  ;;  %v1794_v20 = vsel %vm1321_vm13, %v1793_v54, %v1792_v18  ;;  %v1711_v43 = vmul.f32 %v5465_v58, %v6142_v46  ;;  %v1712_v10 = vmul.f32 %v5465_v58, %v6143_v62  ;;  %v4306_v18 = vld [vmem:[#allocation5 + $0x110] ss:$8 sps:$4 sm:$0xff]   ;;  %v4311_v46 = vld [vmem:[#allocation5 + $0x124] ss:$8 sps:$4 sm:$0xff]  }
 0x44c   :  { %v1788_v11 = vsel %vm1333_vm1, %v1787_v61, %v1786_v19  ;;  %v1796_v21 = vsel %vm1324_vm14, %v1795_v45, %v1794_v20  ;;  %v1723_v6 = vmul.f32 %v5465_v58, %v5303_v63  ;;  %v1724_v4 = vmul.f32 %v5465_v58, %v5311_v5 }
 0x44d   :  { %v1798_v34 = vsel %vm1327_vm15, %v1797_v17, %v1796_v21  ;;  %v5613_v59 = vadd.f32 %v5482_v37, %v1711_v43  ;;  %v5616_v3 = vadd.f32 %v5482_v37, %v1712_v10  ;;  %v1871_v23 = vrot.slane %v5510_v53, 7 }
 0x44e   :  { %v1800_v30 = vsel %vm1330_vm0, %v1799_v41, %v1798_v34  ;;  %v5621_v26 = vadd.f32 %v5482_v37, %v1723_v6  ;;  %v5624_v63 = vadd.f32 %v5482_v37, %v1724_v4  ;;  %v1873_v5 = vrot.slane %v5513_v32, 6 }
 0x44f   :  { %v1802_v55 = vsel %vm1333_vm1, %v1801_v35, %v1800_v30  ;;  %v1872_v50 = vsel %vm1315_vm10, %v1871_v23, %v5507_v15  ;;  %v1875_v36 = vrot.slane %v5516_v38, 5  ;;  %v1877_v60 = vrot.slane %v5519_v1, 4  ;;  %v4309_v30 = vld [vmem:[#allocation5 + $0x120] ss:$8 sps:$4 sm:$0xff]  }
 0x450   :  { %v1933_v16 = vpack.c.bf16 %v1802_v55, %v1788_v11  ;;  %v1874_v44 = vsel %vm1318_vm11, %v1873_v5, %v1872_v50  ;;  %v1879_v8 = vrot.slane %v5522_v2, 3  ;;  %v1885_v61 = vrot.slane %v5532_v28, 7  ;;  %v4314_v50 = vld [vmem:[#allocation5 + $0x134] ss:$8 sps:$4 sm:$0xff]  }
 0x451   :  { %v1876_v0 = vsel %vm1321_vm13, %v1875_v36, %v1874_v44  ;;  %v1887_v9 = vrot.slane %v5535_v14, 6  ;;  %v1881_v7 = vrot.slane %v5613_v59, 2  ;;  %v1883_v29 = vrot.slane %v5616_v3, 1 }
 0x452   :  { %2463 = vmatmul.mubr.bf16.vlgmr.msra.gmra.mrb[12].mxu0 %v1933_v16  ;;  %v1878_v57 = vsel %vm1324_vm14, %v1877_v60, %v1876_v0  ;;  %v1889_v13 = vrot.slane %v5538_v12, 5  ;;  %v1886_v45 = vsel %vm1315_vm10, %v1885_v61, %v5529_v48  ;;  %v1891_v17 = vrot.slane %v5541_v27, 4 }
 0x453   :  { %2474 = vmatpush1.bf16.msra.mxu0 %v4303_v24  ;;  %v1880_v54 = vsel %vm1327_vm15, %v1879_v8, %v1878_v57  ;;  %v1893_v56 = vrot.slane %v5544_v22, 3  ;;  %v1888_v35 = vsel %vm1318_vm11, %v1887_v9, %v1886_v45  ;;  %v1895_v19 = vrot.slane %v5621_v26, 2  ;;  %v4317_v45 = vld [vmem:[#allocation5 + $0x144] ss:$8 sps:$4 sm:$0xff]  }
 0x454   :  { %v1882_v41 = vsel %vm1330_vm0, %v1881_v7, %v1880_v54  ;;  %v1897_v20 = vrot.slane %v5624_v63, 1  ;;  %2475 = vmatprep.subr.bf16.mxu0 %v4308_v31  ;;  %v1890_v62 = vsel %vm1321_vm13, %v1889_v13, %v1888_v35  ;;  %v1839_v10 = vrot.slane %v5507_v15, 7 }
 0x455   :  { %v1884_v43 = vsel %vm1333_vm1, %v1883_v29, %v1882_v41  ;;  %v1841_v11 = vrot.slane %v5510_v53, 6  ;;  %v1892_v21 = vsel %vm1324_vm14, %v1891_v17, %v1890_v62  ;;  %v1843_v6 = vrot.slane %v5513_v32, 5 }
 0x456   :  { %v1845_v4 = vrot.slane %v5516_v38, 4  ;;  %v1847_v34 = vrot.slane %v5519_v1, 3  ;;  %v1894_v23 = vsel %vm1327_vm15, %v1893_v56, %v1892_v21  ;;  %v1840_v5 = vsel %vm1315_vm10, %v1839_v10, %v5504_v47 }
 0x457   :  { %2476 = vmatpush1.bf16.msra.mxu0 %v4306_v18  ;;  %v1849_v24 = vrot.slane %v5522_v2, 2  ;;  %v1851_v15 = vrot.slane %v5613_v59, 1  ;;  %v1896_v55 = vsel %vm1330_vm0, %v1895_v19, %v1894_v23  ;;  %v1842_v36 = vsel %vm1318_vm11, %v1841_v11, %v1840_v5 }
 0x458   :  { %2477 = vmatprep.subr.bf16.mxu0 %v4311_v46  ;;  %v1853_v16 = vrot.slane %v5529_v48, 7  ;;  %v1855_v44 = vrot.slane %v5532_v28, 6  ;;  %v1898_v60 = vsel %vm1333_vm1, %v1897_v20, %v1896_v55  ;;  %v1844_v31 = vsel %vm1321_vm13, %v1843_v6, %v1842_v36  ;;  %v4312_v48 = vld [vmem:[#allocation5 + $0x130] ss:$8 sps:$4 sm:$0xff]  }
 0x459   :  { %v1857_v47 = vrot.slane %v5535_v14, 5  ;;  %v1859_v0 = vrot.slane %v5538_v12, 4  ;;  %v1936_v8 = vpack.c.bf16 %v1898_v60, %v1884_v43  ;;  %v1846_v61 = vsel %vm1324_vm14, %v1845_v4, %v1844_v31  ;;  %v4326_v31 = vld [vmem:[#allocation5 + $0x174] ss:$8 sps:$4 sm:$0xff]  }
 0x45a   :  { %v1854_v9 = vsel %vm1315_vm10, %v1853_v16, %v5526_v33  ;;  %v1861_v57 = vrot.slane %v5541_v27, 3  ;;  %v1848_v7 = vsel %vm1327_vm15, %v1847_v34, %v1846_v61  ;;  %v1863_v13 = vrot.slane %v5544_v22, 2  ;;  %v4332_v61 = vld [vmem:[#allocation5 + $0x194] ss:$8 sps:$4 sm:$0xff]  }
 0x45b   :  { %2478 = vmatpush1.bf16.msra.mxu0 %v4309_v30  ;;  %v1856_v29 = vsel %vm1318_vm11, %v1855_v44, %v1854_v9  ;;  %v1865_v54 = vrot.slane %v5621_v26, 1  ;;  %2505 = vmatprep.mubr.bf16.mxu0 %v1936_v8  ;;  %v1850_v17 = vsel %vm1330_vm0, %v1849_v24, %v1848_v7  ;;  %v1713_v33 = vmul.f32 %v5465_v58, %v5110_v25  ;;  %v4318_v30 = vld [vmem:[#allocation5 + $0x150] ss:$8 sps:$4 sm:$0xff]   ;;  %v4327_v8 = vld [vmem:[#allocation5 + $0x180] ss:$8 sps:$4 sm:$0xff]  }
 0x45c   :  { %2479 = vmatprep.subr.bf16.mxu0 %v4314_v50  ;;  %v1858_v56 = vsel %vm1321_vm13, %v1857_v47, %v1856_v29  ;;  %v1903_v18 = vrot.slane %v5513_v32, 7  ;;  %v5685_v41 = vsel %vm1333_vm1, %v1851_v15, %v1850_v17  ;;  %v1725_v19 = vmul.f32 %v5465_v58, %v5330_v42  ;;  %v4315_v32 = vld [vmem:[#allocation5 + $0x140] ss:$8 sps:$4 sm:$0xff]   ;;  %v4323_v15 = vld [vmem:[#allocation5 + $0x164] ss:$8 sps:$4 sm:$0xff]  }
 0x45d   :  { %v1860_v35 = vsel %vm1324_vm14, %v1859_v0, %v1858_v56  ;;  %v1905_v20 = vrot.slane %v5516_v38, 6  ;;  %v1746_v43 = vadd.f32 %v5482_v37, %v1713_v33  ;;  %v1907_v25 = vrot.slane %v5519_v1, 5  ;;  %v4320_v38 = vld [vmem:[#allocation5 + $0x154] ss:$8 sps:$4 sm:$0xff]   ;;  %v4330_v9 = vld [vmem:[#allocation5 + $0x190] ss:$8 sps:$4 sm:$0xff]  }
 0x45e   :  { %v1862_v46 = vsel %vm1327_vm15, %v1861_v57, %v1860_v35  ;;  %v1904_v62 = vsel %vm1315_vm10, %v1903_v18, %v5510_v53  ;;  %v1758_v11 = vadd.f32 %v5482_v37, %v1725_v19  ;;  %v1909_v42 = vrot.slane %v5522_v2, 4  ;;  %v4335_v57 = vld [vmem:[#allocation5 + $0x1a4] ss:$8 sps:$4 sm:$0xff]   ;;  %v4338_v7 = vld [vmem:[#allocation5 + $0x1b4] ss:$8 sps:$4 sm:$0xff]  }
 0x45f   :  { %2480 = vmatpush1.bf16.msra.mxu0 %v4312_v48  ;;  %v1864_v10 = vsel %vm1330_vm0, %v1863_v13, %v1862_v46  ;;  %v1906_v21 = vsel %vm1318_vm11, %v1905_v20, %v1904_v62  ;;  %v1913_v58 = vrot.slane %v5616_v3, 2  ;;  %v1911_v1 = vrot.slane %v5613_v59, 3  ;;  %v4333_v48 = vld [vmem:[#allocation5 + $0x1a0] ss:$8 sps:$4 sm:$0xff]   ;;  %v4336_v29 = vld [vmem:[#allocation5 + $0x1b0] ss:$8 sps:$4 sm:$0xff]  }
 0x460   :  { %2481 = vmatprep.subr.bf16.mxu0 %v4317_v45  ;;  %v5702_v6 = vsel %vm1333_vm1, %v1865_v54, %v1864_v10  ;;  %v1908_v53 = vsel %vm1321_vm13, %v1907_v25, %v1906_v21  ;;  %v1917_v34 = vrot.slane %v5535_v14, 7  ;;  %v1919_v2 = vrot.slane %v5538_v12, 6  ;;  %v4341_v13 = vld [vmem:[#allocation5 + $0x1c4] ss:$8 sps:$4 sm:$0xff]   ;;  %v4339_v54 = vld [vmem:[#allocation5 + $0x1c0] ss:$8 sps:$4 sm:$0xff]  }
 0x461   :  { %v1935_v4 = vpack.c.bf16 %v5702_v6, %v5685_v41  ;;  %v1910_v37 = vsel %vm1324_vm14, %v1909_v42, %v1908_v53  ;;  %v1915_v23 = vrot.slane %v1746_v43, 1  ;;  %v1921_v59 = vrot.slane %v5541_v27, 5  ;;  %v4344_v45 = vld [vmem:[#allocation5 + $0x1d4] ss:$8 sps:$4 sm:$0xff]   ;;  %v4342_v17 = vld [vmem:[#allocation5 + $0x1d0] ss:$8 sps:$4 sm:$0xff]  }
 0x462   :  { %v1912_v3 = vsel %vm1327_vm15, %v1911_v1, %v1910_v37  ;;  %v1918_v24 = vsel %vm1315_vm10, %v1917_v34, %v5532_v28  ;;  %v1923_v12 = vrot.slane %v5544_v22, 4  ;;  %v1925_v36 = vrot.slane %v5621_v26, 3  ;;  %v4321_v28 = vld [vmem:[#allocation5 + $0x160] ss:$8 sps:$4 sm:$0xff]   ;;  %v4324_v26 = vld [vmem:[#allocation5 + $0x170] ss:$8 sps:$4 sm:$0xff]  }
 0x463   :  { %2482 = vmatpush1.bf16.msra.mxu0 %v4315_v32  ;;  %v1914_v5 = vsel %vm1330_vm0, %v1913_v58, %v1912_v3  ;;  %v1920_v14 = vsel %vm1318_vm11, %v1919_v2, %v1918_v24  ;;  %v1927_v16 = vrot.slane %v5624_v63, 2  ;;  %v1929_v60 = vrot.slane %v1758_v11, 1  ;;  %v4329_v63 = vld [vmem:[#allocation5 + $0x184] ss:$8 sps:$4 sm:$0xff]   ;;  %v4345_v33 = vld [vmem:[#allocation5 + $0x1e0] ss:$8 sps:$4 sm:$0xff]  }
 0x464   :  { %2483 = vmatprep.subr.bf16.mxu0 %v4320_v38  ;;  %v5717_v55 = vsel %vm1333_vm1, %v1915_v23, %v1914_v5  ;;  %v1922_v50 = vsel %vm1321_vm13, %v1921_v59, %v1920_v14  ;;  %v4347_v56 = vld [vmem:[#allocation5 + $0x1e4] ss:$8 sps:$4 sm:$0xff]   ;;  %v4350_v18 = vld [vmem:[#allocation5 + $0x1f4] ss:$8 sps:$4 sm:$0xff]   ;;  %v4348_v35 = vld [vmem:[#allocation5 + $0x1f0] ss:$8 sps:$4 sm:$0xff]  }
 0x465   :  { %v1924_v44 = vsel %vm1324_vm14, %v1923_v12, %v1922_v50  ;;  %v4353_v19 = vld [vmem:[#allocation5 + $0x204] ss:$8 sps:$4 sm:$0xff]   ;;  %v4351_v20 = vld [vmem:[#allocation5 + $0x200] ss:$8 sps:$4 sm:$0xff]   ;;  %v4356_v46 = vld [vmem:[#allocation5 + $0x214] ss:$8 sps:$4 sm:$0xff]  }
 0x466   :  { %v1926_v27 = vsel %vm1327_vm15, %v1925_v36, %v1924_v44  ;;  %v4354_v43 = vld [vmem:[#allocation5 + $0x210] ss:$8 sps:$4 sm:$0xff]   ;;  %v4580_v62 = vmov 0   ;;  %v4359_v25 = vld [vmem:[#allocation5 + $0x224] ss:$8 sps:$4 sm:$0xff]  }
 0x467   :  { %2484 = vmatpush1.bf16.msra.mxu0 %v4318_v30  ;;  %v1928_v47 = vsel %vm1330_vm0, %v1927_v16, %v1926_v27  ;;  %v4357_v32 = vld [vmem:[#allocation5 + $0x220] ss:$8 sps:$4 sm:$0xff]   ;;  %v4362_v10 = vld [vmem:[#allocation5 + $0x234] ss:$8 sps:$4 sm:$0xff]   ;;  %v4360_v11 = vld [vmem:[#allocation5 + $0x230] ss:$8 sps:$4 sm:$0xff]  }
 0x468   :  { %2485 = vmatprep.subr.bf16.mxu0 %v4323_v15  ;;  %v5728_v0 = vsel %vm1333_vm1, %v1929_v60, %v1928_v47  ;;  %v4365_v21 = vld [vmem:[#allocation5 + $0x244] ss:$8 sps:$4 sm:$0xff]   ;;  %v4363_v42 = vld [vmem:[#allocation5 + $0x240] ss:$8 sps:$4 sm:$0xff]   ;;  %v4368_v58 = vld [vmem:[#allocation5 + $0x254] ss:$8 sps:$4 sm:$0xff]  }
 0x469   :  { %v1937_v22 = vpack.c.bf16 %v5728_v0, %v5717_v55  ;;  %v4366_v41 = vld [vmem:[#allocation5 + $0x250] ss:$8 sps:$4 sm:$0xff]   ;;  %v4371_v38 = vld [vmem:[#allocation5 + $0x264] ss:$8 sps:$4 sm:$0xff]   ;;  %v4369_v6 = vld [vmem:[#allocation5 + $0x260] ss:$8 sps:$4 sm:$0xff]  }
 0x46a   :  { %v4374_v53 = vld [vmem:[#allocation5 + $0x274] ss:$8 sps:$4 sm:$0xff]   ;;  %v4372_v1 = vld [vmem:[#allocation5 + $0x270] ss:$8 sps:$4 sm:$0xff]   ;;  %v2874_v37 = vld [vmem:[%s6090_s11 + $0x8] sm:$0xff] }
 0x46b   :  { %2486 = vmatpush1.bf16.msra.mxu0 %v4321_v28  ;;  %v2875_v2 = vld [vmem:[%s6090_s11 + $0x10] sm:$0xff]  ;;  %v2876_v3 = vld [vmem:[%s6090_s11 + $0x18] sm:$0xff]  ;;  %v2877_v23 = vld [vmem:[%s6090_s11 + $0x20] sm:$0xff] }
 0x46c   :  { %2487 = vmatprep.subr.bf16.mxu0 %v4326_v31  ;;  %v4111_v30 = vpack.c.bf16 %v2876_v3, %v2875_v2  ;;  %v2878_v5 = vld [vmem:[%s6090_s11 + $0x28] sm:$0xff]  ;;  %v2879_v59 = vld [vmem:[%s6090_s11 + $0x30] sm:$0xff]  ;;  %v2880_v15 = vld [vmem:[%s6090_s11 + $0x38] sm:$0xff] }
 0x46d   :  { %v4114_v24 = vpack.c.bf16 %v2878_v5, %v2877_v23  ;;  %v4117_v55 = vpack.c.bf16 %v2880_v15, %v2879_v59  ;;  %v2881_v14 = vld [vmem:[%s6090_s11 + $0x40] sm:$0xff]  ;;  %v2882_v12 = vld [vmem:[%s6090_s11 + $0x48] sm:$0xff]  ;;  %v2883_v36 = vld [vmem:[%s6090_s11 + $0x50] sm:$0xff] }
 0x46e   :  { %v4120_v50 = vpack.c.bf16 %v2882_v12, %v2881_v14  ;;  %v2884_v16 = vld [vmem:[%s6090_s11 + $0x58] sm:$0xff]  ;;  %v2885_v28 = vld [vmem:[%s6090_s11 + $0x60] sm:$0xff]  ;;  %v2886_v27 = vld [vmem:[%s6090_s11 + $0x68] sm:$0xff] }
 0x46f   :  { %2488 = vmatpush1.bf16.msra.mxu0 %v4324_v26  ;;  %v4123_v44 = vpack.c.bf16 %v2884_v16, %v2883_v36  ;;  %v4126_v60 = vpack.c.bf16 %v2886_v27, %v2885_v28  ;;  %v2887_v31 = vld [vmem:[%s6090_s11 + $0x70] sm:$0xff]  ;;  %v2888_v47 = vld [vmem:[%s6090_s11 + $0x78] sm:$0xff] }
 0x470   :  { %2489 = vmatprep.subr.bf16.mxu0 %v4329_v63  ;;  %v4129_v0 = vpack.c.bf16 %v2888_v47, %v2887_v31  ;;  %v6144_v63 = vsub.s32 1, %v4917_v39 }
 0x473   :  { %2490 = vmatpush1.bf16.msra.mxu0 %v4327_v8 }
 0x474   :  { %2491 = vmatprep.subr.bf16.mxu0 %v4332_v61 }
 0x477   :  { %2492 = vmatpush1.bf16.msra.mxu0 %v4330_v9 }
 0x478   :  { %2493 = vmatprep.subr.bf16.mxu0 %v4335_v57 }
 0x47b   :  { %2494 = vmatpush1.bf16.msra.mxu0 %v4333_v48 }
 0x47c   :  { %2495 = vmatprep.subr.bf16.mxu0 %v4338_v7 }
 0x47f   :  { %2496 = vmatpush1.bf16.msra.mxu0 %v4336_v29 }
 0x480   :  { %2497 = vmatprep.subr.bf16.mxu0 %v4341_v13 }
 0x483   :  { %2498 = vmatpush1.bf16.msra.mxu0 %v4339_v54 }
 0x484   :  { %2499 = vmatprep.subr.bf16.mxu0 %v4344_v45 }
 0x487   :  { %2500 = vmatpush1.bf16.msra.mxu0 %v4342_v17 }
 0x488   :  { %2501 = vmatprep.subr.bf16.mxu0 %v4347_v56  ;;  %v6145_v56 = vld [vmem:[#allocation16_spill] sm:$0xff] }
 0x48b   :  { %2502 = vmatpush1.bf16.msra.mxu0 %v4345_v33 }
 0x48c   :  { %2503 = vmatprep.subr.bf16.mxu0 %v4350_v18 }
 0x48f   :  { %2504 = vmatpush1.bf16.msra.mxu0 %v4348_v35 }
 0x490   :  { %2516 = vmatprep.subr.bf16.mxu0 %v4353_v19 }
 0x492   :  { %2506 = vmatmul.mubr.bf16.vlgmr.msra.gmra.mrb[12].mxu0 %v1935_v4  ;;  %v2873_v4 = vld [vmem:[%s6090_s11] sm:$0xff] }
 0x493   :  { %2517 = vmatpush1.bf16.msra.mxu0 %v4351_v20  ;;  %2548 = vmatprep.mubr.bf16.mxu0 %v4580_v62  ;;  %v4108_v34 = vpack.c.bf16 %v2874_v37, %v2873_v4 }
 0x494   :  { %2518 = vmatprep.subr.bf16.mxu0 %v4356_v46 }
 0x495   :  { %4109 = vmatpush3.bf16.msra.mxu1 %v4108_v34 }
 0x496   :  { %4110 = vmatprep.subr.bf16.mxu1 %v6120_v49 }
 0x497   :  { %2519 = vmatpush1.bf16.msra.mxu0 %v4354_v43 }
 0x498   :  { %2520 = vmatprep.subr.bf16.mxu0 %v4359_v25 }
 0x499   :  { %4112 = vmatpush3.bf16.msra.mxu1 %v4111_v30 }
 0x49a   :  { %4113 = vmatprep.subr.bf16.mxu1 %v6120_v49 }
 0x49b   :  { %2521 = vmatpush1.bf16.msra.mxu0 %v4357_v32 }
 0x49c   :  { %2522 = vmatprep.subr.bf16.mxu0 %v4362_v10 }
 0x49d   :  { %4115 = vmatpush3.bf16.msra.mxu1 %v4114_v24 }
 0x49e   :  { %4116 = vmatprep.subr.bf16.mxu1 %v6120_v49 }
 0x49f   :  { %2523 = vmatpush1.bf16.msra.mxu0 %v4360_v11 }
 0x4a0   :  { %2524 = vmatprep.subr.bf16.mxu0 %v4365_v21 }
 0x4a1   :  { %4118 = vmatpush3.bf16.msra.mxu1 %v4117_v55 }
 0x4a2   :  { %4119 = vmatprep.subr.bf16.mxu1 %v6120_v49 }
 0x4a3   :  { %2525 = vmatpush1.bf16.msra.mxu0 %v4363_v42 }
 0x4a4   :  { %2526 = vmatprep.subr.bf16.mxu0 %v4368_v58 }
 0x4a5   :  { %4121 = vmatpush3.bf16.msra.mxu1 %v4120_v50 }
 0x4a6   :  { %4122 = vmatprep.subr.bf16.mxu1 %v6120_v49 }
 0x4a7   :  { %2527 = vmatpush1.bf16.msra.mxu0 %v4366_v41 }
 0x4a8   :  { %2528 = vmatprep.subr.bf16.mxu0 %v4371_v38 }
 0x4a9   :  { %4124 = vmatpush3.bf16.msra.mxu1 %v4123_v44 }
 0x4aa   :  { %4125 = vmatprep.subr.bf16.mxu1 %v6120_v49 }
 0x4ab   :  { %2529 = vmatpush1.bf16.msra.mxu0 %v4369_v6 }
 0x4ac   :  { %2530 = vmatprep.subr.bf16.mxu0 %v4374_v53 }
 0x4ad   :  { %4127 = vmatpush3.bf16.msra.mxu1 %v4126_v60 }
 0x4ae   :  { %4128 = vmatprep.subr.bf16.mxu1 %v6120_v49 }
 0x4af   :  { %2531 = vmatpush1.bf16.msra.mxu0 %v4372_v1 }
 0x4b1   :  { %4130 = vmatpush3.bf16.msra.mxu1 %v4129_v0 }
 0x4b2   :  { %2549 = vmatmul.mubr.bf16.vlgmr.msra.gmra.mrb[12].mxu0 %v1937_v22  ;;  %4131 = vmatprep.subr.bf16.mxu1 %v6120_v49  ;;  %v2018_v22 = vld [vmem:[#allocation7] sm:$0x3] }
 0x4b3   :  { %v2023_v26 = vrot.slane %v2018_v22, %v4920_v40  ;;  %v2027_v8 = vrot.slane %v2018_v22, %v6144_v63 }
 0x585   :  { %v2550_v61 = vpop.f32.mrb[12].mxu0 }
 0x586   :  { %v4137_v9 = vadd.f32 %v2550_v61, %v2023_v26  ;;  %v2552_v57 = vpop.f32.mrb[13].mxu0 }
 0x587   :  { %v4138_v48 = vadd.f32 %v2552_v57, %v2027_v8  ;;  %v2554_v7 = vpop.f32.mrb[14].mxu0 }
 0x588   :  { %v4139_v29 = vadd.f32 %v2554_v7, %v2023_v26  ;;  %v2556_v13 = vpop.f32.mrb[15].mxu0 }
 0x589   :  { %v2563_v54 = vcombine.low %v4137_v9, %v4138_v48  ;;  %v2564_v45 = vcombine.high %v4137_v9, %v4138_v48  ;;  %v4140_v17 = vadd.f32 %v2556_v13, %v2027_v8 }
 0x58b   :  { %v2571_v33 = vrot.slane %v2563_v54, %v6145_v56  ;;  %v2578_v18 = vrot.slane %v2564_v45, %v6145_v56  ;;  %v2581_v35 = vcombine.low %v4139_v29, %v4140_v17  ;;  %v2582_v19 = vcombine.high %v4139_v29, %v4140_v17 }
 0x58d   :  { %v2579_v20 = vcombine.high %v2571_v33, %v2571_v33  ;;  %v2580_v46 = vcombine.high %v2578_v18, %v2578_v18  ;;  %v2605_v39 = vrot.slane %v2571_v33, %v6145_v56  ;;  %v2621_v43 = vrot.slane %v2578_v18, %v6145_v56 }
 0x58e   :  { %v5802_v62 = vrot.slane %v2581_v35, %v6145_v56  ;;  %v5809_v58 = vrot.slane %v2582_v19, %v6145_v56 }
 0x58f   :  { %v2606_v25 = vcombine.high %v2605_v39, %v2605_v39  ;;  %v2613_v32 = vrot.slane %v2579_v20, %v6145_v56  ;;  %v2622_v10 = vcombine.high %v2621_v43, %v2621_v43  ;;  %v2629_v11 = vrot.slane %v2580_v46, %v6145_v56 }
 0x590   :  { %v2679_v21 = vsel %vm857_vm9, %v2605_v39, -inf  ;;  %v2707_v42 = vsel %vm857_vm9, %v2621_v43, -inf  ;;  %v2597_v41 = vcombine.high %v5802_v62, %v5802_v62 }
 0x591   :  { %v2614_v38 = vcombine.high %v2613_v32, %v2613_v32  ;;  %v2630_v6 = vcombine.high %v2629_v11, %v2629_v11  ;;  %v2680_v53 = vrot.slane %v2679_v21, 4  ;;  %v2686_v1 = vsel %vm857_vm9, %v2606_v25, -inf }
 0x592   :  { %v2687_v4 = vrot.slane %v2686_v1, 4  ;;  %v2693_v37 = vsel %vm857_vm9, %v2613_v32, -inf  ;;  %v2708_v34 = vrot.slane %v2707_v42, 4  ;;  %v2714_v2 = vsel %vm857_vm9, %v2622_v10, -inf }
 0x593   :  { %v2681_v3 = vmax.f32 %v2679_v21, %v2680_v53  ;;  %v2694_v23 = vrot.slane %v2693_v37, 4  ;;  %v2700_v30 = vsel %vm857_vm9, %v2614_v38, -inf  ;;  %v2715_v5 = vrot.slane %v2714_v2, 4 }
 0x594   :  { %v2688_v24 = vmax.f32 %v2686_v1, %v2687_v4  ;;  %v2701_v59 = vrot.slane %v2700_v30, 4  ;;  %v2709_v15 = vmax.f32 %v2707_v42, %v2708_v34  ;;  %v2721_v55 = vsel %vm857_vm9, %v2629_v11, -inf }
 0x595   :  { %v2682_v14 = vrot.slane %v2681_v3, 2  ;;  %v2695_v12 = vmax.f32 %v2693_v37, %v2694_v23  ;;  %v2716_v50 = vmax.f32 %v2714_v2, %v2715_v5  ;;  %v2722_v36 = vrot.slane %v2721_v55, 4 }
 0x596   :  { %v2689_v16 = vrot.slane %v2688_v24, 2  ;;  %v2702_v44 = vmax.f32 %v2700_v30, %v2701_v59  ;;  %v2710_v28 = vrot.slane %v2709_v15, 2  ;;  %v2728_v27 = vsel %vm857_vm9, %v2630_v6, -inf }
 0x597   :  { %v2683_v60 = vmax.f32 %v2681_v3, %v2682_v14  ;;  %v2696_v31 = vrot.slane %v2695_v12, 2  ;;  %v2717_v47 = vrot.slane %v2716_v50, 2  ;;  %v2723_v0 = vmax.f32 %v2721_v55, %v2722_v36 }
 0x598   :  { %v2690_v22 = vmax.f32 %v2688_v24, %v2689_v16  ;;  %v2703_v26 = vrot.slane %v2702_v44, 2  ;;  %v2711_v63 = vmax.f32 %v2709_v15, %v2710_v28  ;;  %v2729_v8 = vrot.slane %v2728_v27, 4 }
 0x599   :  { %v2684_v61 = vrot.slane %v2683_v60, 1  ;;  %v2697_v9 = vmax.f32 %v2695_v12, %v2696_v31  ;;  %v2718_v57 = vmax.f32 %v2716_v50, %v2717_v47  ;;  %v2724_v48 = vrot.slane %v2723_v0, 2 }
 0x59a   :  { %v2691_v7 = vrot.slane %v2690_v22, 1  ;;  %v2704_v29 = vmax.f32 %v2702_v44, %v2703_v26  ;;  %v2712_v13 = vrot.slane %v2711_v63, 1  ;;  %v2730_v54 = vmax.f32 %v2728_v27, %v2729_v8 }
 0x59b   :  { %v2685_v45 = vmax.f32 %v2683_v60, %v2684_v61  ;;  %v2698_v17 = vrot.slane %v2697_v9, 1  ;;  %v2719_v33 = vrot.slane %v2718_v57, 1  ;;  %v2725_v18 = vmax.f32 %v2723_v0, %v2724_v48 }
 0x59c   :  { %v2692_v35 = vmax.f32 %v2690_v22, %v2691_v7  ;;  %v2705_v19 = vrot.slane %v2704_v29, 1  ;;  %v2713_v20 = vmax.f32 %v2711_v63, %v2712_v13  ;;  %v2731_v46 = vrot.slane %v2730_v54, 2 }
 0x59d   :  { %v2699_v39 = vmax.f32 %v2697_v9, %v2698_v17  ;;  %v2720_v43 = vmax.f32 %v2718_v57, %v2719_v33  ;;  %v2726_v25 = vrot.slane %v2725_v18, 1  ;;  %v2637_v32 = vrot.slane %v5802_v62, %v6145_v56 }
 0x59e   :  { %v2706_v10 = vmax.f32 %v2704_v29, %v2705_v19  ;;  %v2732_v11 = vmax.f32 %v2730_v54, %v2731_v46  ;;  %v2791_v21 = vmax.f32 %v2685_v45, %v2692_v35  ;;  %v2645_v42 = vrot.slane %v2597_v41, %v6145_v56 }
 0x59f   :  { %v2793_v38 = vmax.f32 %v2713_v20, %v2720_v43  ;;  %v2598_v6 = vcombine.high %v5809_v58, %v5809_v58  ;;  %v2638_v53 = vcombine.high %v2637_v32, %v2637_v32  ;;  %v2653_v1 = vrot.slane %v5809_v58, %v6145_v56 }
 0x5a0   :  { %v2733_v4 = vrot.slane %v2732_v11, 1  ;;  %v2792_v37 = vmax.f32 %v2699_v39, %v2706_v10  ;;  %v5826_v34 = vmax.f32 %v2791_v21, 0.0  ;;  %v2646_v62 = vcombine.high %v2645_v42, %v2645_v42 }
 0x5a1   :  { %v5828_v2 = vmax.f32 %v2793_v38, 0.0  ;;  %v2735_v3 = vsel %vm857_vm9, %v2637_v32, -inf  ;;  %v2727_v23 = vmax.f32 %v2725_v18, %v2726_v25  ;;  %v2654_v59 = vcombine.high %v2653_v1, %v2653_v1 }
 0x5a2   :  { %v2734_v30 = vmax.f32 %v2732_v11, %v2733_v4  ;;  %v5831_v41 = vmax.f32 %v2792_v37, 0.0  ;;  %v2736_v5 = vrot.slane %v2735_v3, 4  ;;  %v2661_v58 = vrot.slane %v2598_v6, %v6145_v56 }
 0x5a3   :  { %v5835_v24 = vmul.f32 %v5828_v2, %v5828_v2  ;;  %v2742_v15 = vsel %vm857_vm9, %v2638_v53, -inf  ;;  %v2807_v36 = vmul.f32 %v5826_v34, %v5826_v34  ;;  %v2749_v44 = vsel %vm857_vm9, %v2645_v42, -inf }
 0x5a4   :  { %v2794_v55 = vmax.f32 %v2727_v23, %v2734_v30  ;;  %v2808_v14 = vmul.f32 %v5831_v41, %v5831_v41  ;;  %v2831_v12 = vrot.slane %v5831_v41, 7  ;;  %v2737_v50 = vmax.f32 %v2735_v3, %v2736_v5 }
 0x5a5   :  { %v2743_v16 = vrot.slane %v2742_v15, 4  ;;  %v2756_v28 = vsel %vm857_vm9, %v2646_v62, -inf  ;;  %v2833_v60 = vrot.slane %v5828_v2, 6  ;;  %v2662_v47 = vcombine.high %v2661_v58, %v2661_v58 }
 0x5a6   :  { %v5846_v27 = vmax.f32 %v2794_v55, 0.0  ;;  %v2832_v56 = vsel %vm1315_vm10, %v2831_v12, %v5826_v34  ;;  %v2738_v31 = vrot.slane %v2737_v50, 2  ;;  %v2750_v22 = vrot.slane %v2749_v44, 4 }
 0x5a7   :  { %v2744_v0 = vmax.f32 %v2742_v15, %v2743_v16  ;;  %v2757_v26 = vrot.slane %v2756_v28, 4  ;;  %v2834_v63 = vsel %vm1318_vm11, %v2833_v60, %v2832_v56  ;;  %v2845_v8 = vrot.slane %v2808_v14, 7 }
 0x5a8   :  { %v2847_v61 = vrot.slane %v5835_v24, 6  ;;  %v2739_v9 = vmax.f32 %v2737_v50, %v2738_v31  ;;  %v2751_v48 = vmax.f32 %v2749_v44, %v2750_v22  ;;  %v2763_v29 = vsel %vm857_vm9, %v2653_v1, -inf }
 0x5a9   :  { %v2745_v57 = vrot.slane %v2744_v0, 2  ;;  %v2758_v7 = vmax.f32 %v2756_v28, %v2757_v26  ;;  %v2810_v13 = vmul.f32 %v5846_v27, %v5846_v27  ;;  %v2764_v45 = vrot.slane %v2763_v29, 4 }
 0x5aa   :  { %v2740_v54 = vrot.slane %v2739_v9, 1  ;;  %v2770_v17 = vsel %vm857_vm9, %v2654_v59, -inf  ;;  %v2752_v18 = vrot.slane %v2751_v48, 2  ;;  %v2835_v20 = vrot.slane %v5846_v27, 5 }
 0x5ab   :  { %v2746_v33 = vmax.f32 %v2744_v0, %v2745_v57  ;;  %v2759_v35 = vrot.slane %v2758_v7, 2  ;;  %v2771_v19 = vrot.slane %v2770_v17, 4  ;;  %v2765_v46 = vmax.f32 %v2763_v29, %v2764_v45 }
 0x5ac   :  { %v2777_v39 = vsel %vm857_vm9, %v2661_v58, -inf  ;;  %v2784_v43 = vsel %vm857_vm9, %v2662_v47, -inf  ;;  %v2753_v32 = vmax.f32 %v2751_v48, %v2752_v18  ;;  %v2741_v21 = vmax.f32 %v2739_v9, %v2740_v54 }
 0x5ad   :  { %v2747_v25 = vrot.slane %v2746_v33, 1  ;;  %v2760_v10 = vmax.f32 %v2758_v7, %v2759_v35  ;;  %v2772_v11 = vmax.f32 %v2770_v17, %v2771_v19  ;;  %v2766_v42 = vrot.slane %v2765_v46, 2 }
 0x5ae   :  { %v2778_v38 = vrot.slane %v2777_v39, 4  ;;  %v2785_v6 = vrot.slane %v2784_v43, 4  ;;  %v2754_v1 = vrot.slane %v2753_v32, 1  ;;  %v2846_v62 = vsel %vm1315_vm10, %v2845_v8, %v2807_v36 }
 0x5af   :  { %v2748_v53 = vmax.f32 %v2746_v33, %v2747_v25  ;;  %v2761_v4 = vrot.slane %v2760_v10, 1  ;;  %v2773_v37 = vrot.slane %v2772_v11, 2  ;;  %v2767_v3 = vmax.f32 %v2765_v46, %v2766_v42 }
 0x5b0   :  { %v2779_v23 = vmax.f32 %v2777_v39, %v2778_v38  ;;  %v2786_v30 = vmax.f32 %v2784_v43, %v2785_v6  ;;  %v2755_v5 = vmax.f32 %v2753_v32, %v2754_v1  ;;  %v2849_v15 = vrot.slane %v2810_v13, 5 }
 0x5b1   :  { %v2762_v24 = vmax.f32 %v2760_v10, %v2761_v4  ;;  %v2774_v59 = vmax.f32 %v2772_v11, %v2773_v37  ;;  %v2795_v58 = vmax.f32 %v2741_v21, %v2748_v53  ;;  %v2768_v55 = vrot.slane %v2767_v3, 1 }
 0x5b2   :  { %v2780_v14 = vrot.slane %v2779_v23, 2  ;;  %v2787_v12 = vrot.slane %v2786_v30, 2  ;;  %v2848_v28 = vsel %vm1318_vm11, %v2847_v61, %v2846_v62  ;;  %v2836_v31 = vsel %vm1321_vm13, %v2835_v20, %v2834_v63 }
 0x5b3   :  { %v2775_v50 = vrot.slane %v2774_v59, 1  ;;  %v2796_v16 = vmax.f32 %v2755_v5, %v2762_v24  ;;  %v5861_v44 = vmax.f32 %v2795_v58, 0.0  ;;  %v2769_v56 = vmax.f32 %v2767_v3, %v2768_v55  ;;  %v2992_v24 = vld [vmem:[%s6091_s12] sm:$0xff] }
 0x5b4   :  { %v2781_v60 = vmax.f32 %v2779_v23, %v2780_v14  ;;  %v2788_v36 = vmax.f32 %v2786_v30, %v2787_v12  ;;  %v2850_v57 = vsel %vm1321_vm13, %v2849_v15, %v2848_v28 }
 0x5b5   :  { %v2776_v47 = vmax.f32 %v2774_v59, %v2775_v50  ;;  %v5865_v0 = vmax.f32 %v2796_v16, 0.0  ;;  %v2811_v22 = vmul.f32 %v5861_v44, %v5861_v44  ;;  %v2837_v26 = vrot.slane %v5861_v44, 4  ;;  %v2993_v59 = vld [vmem:[%s6091_s12 + $0x8] sm:$0xff]  ;;  %v2994_v50 = vld [vmem:[%s6091_s12 + $0x10] sm:$0xf] }
 0x5b6   :  { %v2782_v8 = vrot.slane %v2781_v60, 1  ;;  %v2789_v9 = vrot.slane %v2788_v36, 1  ;;  %v4132_v14 = vpack.c.bf16 %v2993_v59, %v2992_v24 }
 0x5b7   :  { %v2797_v48 = vmax.f32 %v2769_v56, %v2776_v47  ;;  %v2812_v61 = vmul.f32 %v5865_v0, %v5865_v0  ;;  %v2851_v7 = vrot.slane %v2811_v22, 4  ;;  %v2838_v29 = vsel %vm1324_vm14, %v2837_v26, %v2836_v31 }
 0x5b8   :  { %v2783_v63 = vmax.f32 %v2781_v60, %v2782_v8  ;;  %v2790_v13 = vmax.f32 %v2788_v36, %v2789_v9  ;;  %v2839_v54 = vrot.slane %v5865_v0, 3  ;;  %v2971_v9 = vld [vmem:[%s6088_s9] sm:$0x1] }
 0x5b9   :  { %v5875_v45 = vmax.f32 %v2797_v48, 0.0  ;;  %v2852_v17 = vsel %vm1324_vm14, %v2851_v7, %v2850_v57  ;;  %v2853_v35 = vrot.slane %v2812_v61, 3  ;;  %v4375_v61 = vld [vmem:[%s6092_s13 + $0x40] sm:$0xff]  }
 0x5ba   :  { %v2798_v33 = vmax.f32 %v2783_v63, %v2790_v13  ;;  %v2840_v18 = vsel %vm1327_vm15, %v2839_v54, %v2838_v29  ;;  %v4376_v7 = vld [vmem:[%s6092_s13] sm:$0xff]   ;;  %v4377_v29 = vld [vmem:[%s6092_s13 + $0x48] sm:$0xff]   ;;  %v4379_v63 = vld [vmem:[%s6092_s13 + $0x50] sm:$0xff]  }
 0x5bb   :  { %v2813_v19 = vmul.f32 %v5875_v45, %v5875_v45  ;;  %v2841_v20 = vrot.slane %v5875_v45, 2  ;;  %v2854_v39 = vsel %vm1327_vm15, %v2853_v35, %v2852_v17  ;;  %v4380_v13 = vld [vmem:[%s6092_s13 + $0x10] sm:$0xff]   ;;  %v4381_v54 = vld [vmem:[%s6092_s13 + $0x58] sm:$0xff]   ;;  %v4385_v35 = vld [vmem:[%s6092_s13 + $0x68] sm:$0xff]  }
 0x5bc   :  { %v5882_v46 = vmax.f32 %v2798_v33, 0.0  ;;  %v4382_v17 = vld [vmem:[%s6092_s13 + $0x18] sm:$0xff]   ;;  %v4383_v33 = vld [vmem:[%s6092_s13 + $0x60] sm:$0xff]  }
 0x5bd   :  { %v2842_v43 = vsel %vm1330_vm0, %v2841_v20, %v2840_v18  ;;  %v2855_v25 = vrot.slane %v2813_v19, 2  ;;  %v4384_v18 = vld [vmem:[%s6092_s13 + $0x20] sm:$0xff]   ;;  %v4386_v19 = vld [vmem:[%s6092_s13 + $0x28] sm:$0xff]   ;;  %v4387_v20 = vld [vmem:[%s6092_s13 + $0x70] sm:$0xff]  }
 0x5be   :  { %v2814_v32 = vmul.f32 %v5882_v46, %v5882_v46  ;;  %v2843_v10 = vrot.slane %v5882_v46, 1 }
 0x5bf   :  { %v2856_v11 = vsel %vm1330_vm0, %v2855_v25, %v2854_v39  ;;  %v4388_v39 = vld [vmem:[%s6092_s13 + $0x30] sm:$0xff]   ;;  %v4390_v25 = vld [vmem:[%s6092_s13 + $0x38] sm:$0xff]  }
 0x5c0   :  { %v2844_v21 = vsel %vm1333_vm1, %v2843_v10, %v2842_v43  ;;  %v2857_v42 = vrot.slane %v2814_v32, 1  ;;  %v4389_v43 = vld [vmem:[%s6092_s13 + $0x78] sm:$0xff]   ;;  %v4391_v32 = vld [vmem:[%s6092_s13 + $0xc0] sm:$0xff]  }
 0x5c1   :  { %v2861_v38 = vrot.slane %v2844_v21, 4 }
 0x5c2   :  { %v2858_v6 = vsel %vm1333_vm1, %v2857_v42, %v2856_v11  ;;  %v3157_v42 = vld [vmem:[%s6089_s10] sm:$0x1] }
 0x5c3   :  { %v2862_v53 = vadd.f32 %v2861_v38, %v2844_v21  ;;  %v2867_v1 = vrot.slane %v2858_v6, 4 }
 0x5c5   :  { %v2863_v4 = vrot.slane %v2862_v53, 2  ;;  %v2868_v37 = vadd.f32 %v2867_v1, %v2858_v6 }
 0x5c7   :  { %v2864_v62 = vadd.f32 %v2863_v4, %v2862_v53  ;;  %v2869_v3 = vrot.slane %v2868_v37, 2 }
 0x5c9   :  { %v2870_v23 = vadd.f32 %v2869_v3, %v2868_v37  ;;  %v2865_v30 = vrot.slane %v2864_v62, 1 }
 0x5cb   :  { %v2871_v5 = vrot.slane %v2870_v23, 1  ;;  %v2866_v15 = vadd.f32 %v2865_v30, %v2864_v62 }
 0x5cd   :  { %v2872_v58 = vadd.f32 %v2871_v5, %v2870_v23 }
 0x5cf   :  { %v2891_v55 = vrot.slane %v2872_v58, 7 }
 0x5d1   :  { %v2892_v12 = vsel %vm1315_vm10, %v2891_v55, %v2866_v15 }
 0x5d2   :  { %4035 = vmatmul.mubr.f32.vlgmr.msra.gmra.mrb[6].mxu1 %v2892_v12 }
 0x5d3   :  { %4133 = vmatpush3.bf16.msra.mxu1 %v4132_v14  ;;  %4043 = vmatprep.mubr.msk.f32.mxu1 %vm4576_vm12, %v4577_v51 }
 0x5d4   :  { %4041 = vmatprep.subr.mxu1 %v4577_v51 }
 0x5d7   :  { %4042 = vmatpush3.msk.msra.mxu1 %vm233_vm3, %v2994_v50 }
 0x5d8   :  { %4134 = vmatprep.subr.bf16.mxu1 %v6120_v49 }
 0x6a5   :  { %v2960_v16 = vpop.f32.mrb[6].mxu1 }
 0x6a6   :  { %v2964_v28 = vmul.f32 0.03125, %v2960_v16  ;;  %v4036_v56 = vpop.f32.mrb[7].mxu1 }
 0x6a8   :  { %v2965_v60 = vmul.f32 %v2964_v28, %v2964_v28  ;;  %4044 = vmatmul.mubr.msk.f32.vlgmr.msra.gmra.mrb[8].mxu1 %vm2995_vm6, %v2964_v28 }
 0x6a9   :  { %4136 = vmatpush3.bf16.msra.mxu1 %v4132_v14  ;;  %4052 = vmatprep.mubr.msk.f32.mxu1 %vm4576_vm12, %v4577_v51 }
 0x6aa   :  { %v2967_v36 = vrot.slane %v2965_v60, 7  ;;  %4050 = vmatprep.subr.mxu1 %v4577_v51 }
 0x6ac   :  { %v2969_v31 = vsub.f32 %v2964_v28, %v2967_v36 }
 0x6ad   :  { %4051 = vmatpush3.msk.msra.mxu1 %vm233_vm3, %v2994_v50 }
 0x6ae   :  { %v2970_v47 = vmax.f32 %v2969_v31, 0.0  ;;  %3900 = vmatprep.subr.bf16.mxu1 %v4375_v61 }
 0x6b0   :  { %v2972_v22 = vadd.f32 1e-05, %v2970_v47 }
 0x6b2   :  { %4417 = vrsqrt.f32 %v2972_v22 }
 0x6bc   :  { %v4418_v49 = vpop.eup %4417 }
 0x6bd   :  { %v2981_v26 = vrot.slane %v4418_v49, %v5451_v52 }
 0x6bf   :  { %v2982_v8 = vcombine.high %v2981_v26, %v2981_v26 }
 0x6c1   :  { %v2989_v57 = vrot.slane %v2982_v8, %v5451_v52  ;;  %v4378_v52 = vld [vmem:[%s6092_s13 + $0x8] sm:$0xff]  }
 0x6c3   :  { %v2991_v48 = vmul.f32 %v2989_v57, %v2971_v9 }
 0x6c5   :  { %4053 = vmatmul.mubr.msk.f32.vlgmr.msra.gmra.mrb[10].mxu1 %vm2995_vm6, %v2991_v48 }
 0x6c6   :  { %3901 = vmatpush3.bf16.msra.mxu1 %v4376_v7 }
 0x6c7   :  { %3902 = vmatprep.subr.bf16.mxu1 %v4377_v29 }
 0x6ca   :  { %3903 = vmatpush3.bf16.msra.mxu1 %v4378_v52  ;;  %v4392_v52 = vld [vmem:[%s6092_s13 + $0x80] sm:$0xff]  }
 0x6cb   :  { %3904 = vmatprep.subr.bf16.mxu1 %v4379_v63 }
 0x6ce   :  { %3905 = vmatpush3.bf16.msra.mxu1 %v4380_v13 }
 0x6cf   :  { %3906 = vmatprep.subr.bf16.mxu1 %v4381_v54  ;;  %v4393_v54 = vld [vmem:[%s6092_s13 + $0xc8] sm:$0xff]  }
 0x6d2   :  { %3907 = vmatpush3.bf16.msra.mxu1 %v4382_v17 }
 0x6d3   :  { %3908 = vmatprep.subr.bf16.mxu1 %v4383_v33  ;;  %v4394_v33 = vld [vmem:[%s6092_s13 + $0x88] sm:$0xff]  }
 0x6d6   :  { %3909 = vmatpush3.bf16.msra.mxu1 %v4384_v18  ;;  %v4395_v18 = vld [vmem:[%s6092_s13 + $0xd0] sm:$0xff]  }
 0x6d7   :  { %3910 = vmatprep.subr.bf16.mxu1 %v4385_v35  ;;  %v4396_v35 = vld [vmem:[%s6092_s13 + $0x90] sm:$0xff]  }
 0x6da   :  { %3911 = vmatpush3.bf16.msra.mxu1 %v4386_v19  ;;  %v4397_v19 = vld [vmem:[%s6092_s13 + $0xd8] sm:$0xff]  }
 0x6db   :  { %3912 = vmatprep.subr.bf16.mxu1 %v4387_v20  ;;  %v4398_v20 = vld [vmem:[%s6092_s13 + $0x98] sm:$0xff]  }
 0x6de   :  { %3913 = vmatpush3.bf16.msra.mxu1 %v4388_v39  ;;  %v4399_v39 = vld [vmem:[%s6092_s13 + $0xe0] sm:$0xff]  }
 0x6df   :  { %3914 = vmatprep.subr.bf16.mxu1 %v4389_v43  ;;  %v4400_v43 = vld [vmem:[%s6092_s13 + $0xa0] sm:$0xff]  }
 0x6e2   :  { %3915 = vmatpush3.bf16.msra.mxu1 %v4390_v25  ;;  %v4401_v25 = vld [vmem:[%s6092_s13 + $0xe8] sm:$0xff]  }
 0x6e3   :  { %3922 = vmatprep.subr.bf16.mxu1 %v4391_v32  ;;  %v4402_v32 = vld [vmem:[%s6092_s13 + $0xa8] sm:$0xff]  }
 0x77b   :  { %v3068_v10 = vpop.f32.mrb[8].mxu1 }
 0x77c   :  { %v4045_v11 = vpop.f32.mrb[9].mxu1 }
 0x77d   :  { %v4404_v11 = vld [vmem:[%s6092_s13 + $0xb0] sm:$0xff]  }
 0x798   :  { %v3141_v21 = vpop.f32.mrb[10].mxu1 }
 0x799   :  { %v3148_v38 = vrot.slane %v3141_v21, %v4920_v40  ;;  %v3158_v6 = vmul.f32 %v3141_v21, %v3068_v10  ;;  %v4054_v53 = vpop.f32.mrb[11].mxu1  ;;  %v4403_v10 = vld [vmem:[%s6092_s13 + $0xf0] sm:$0xff]   ;;  %v4405_v21 = vld [vmem:[%s6092_s13 + $0xf8] sm:$0xff]  }
 0x79a   :  { %v4408_v53 = vld [vmem:[%s6094_s15 + $0x8] sm:$0xff]  }
 0x79b   :  { %v3159_v1 = vsub.f32 %v3157_v42, %v3158_v6  ;;  %v3150_v4 = vmul.f32 %v3148_v38, %v5831_v41  ;;  %v3154_v62 = vmul.f32 %v3148_v38, %v5865_v0  ;;  %v3149_v3 = vmul.f32 %v3148_v38, %v5826_v34  ;;  %v4406_v42 = vld [vmem:[%s6092_s13 + $0xb8] sm:$0xff]   ;;  %v4407_v6 = vld [vmem:[%s6094_s15] sm:$0xff]  }
 0x79c   :  { %v3153_v23 = vmul.f32 %v3148_v38, %v5861_v44  ;;  %v3152_v30 = vmul.f32 %v3148_v38, %v5846_v27  ;;  %v3156_v5 = vmul.f32 %v3148_v38, %v5882_v46  ;;  %v3151_v24 = vmul.f32 %v3148_v38, %v5828_v2 }
 0x79d   :  { %v3164_v37 = vrot.slane %v3159_v1, %v4920_v40  ;;  %v3155_v59 = vmul.f32 %v3148_v38, %v5875_v45  ;;  %v4409_v1 = vld [vmem:[%s6094_s15 + $0x10] sm:$0xff]  }
 0x79f   :  { %v3167_v58 = vadd.f32 %v3164_v37, %v3150_v4  ;;  %v3171_v15 = vadd.f32 %v3164_v37, %v3154_v62  ;;  %v3166_v55 = vadd.f32 %v3164_v37, %v3149_v3  ;;  %v3170_v41 = vadd.f32 %v3164_v37, %v3153_v23  ;;  %v4410_v4 = vld [vmem:[%s6094_s15 + $0x18] sm:$0xff]   ;;  %v4412_v62 = vld [vmem:[%s6094_s15 + $0x28] sm:$0xff]   ;;  %v4413_v3 = vld [vmem:[%s6094_s15 + $0x30] sm:$0xff]  }
 0x7a0   :  { %v3169_v14 = vadd.f32 %v3164_v37, %v3152_v30  ;;  %v3173_v40 = vadd.f32 %v3164_v37, %v3156_v5  ;;  %v3168_v12 = vadd.f32 %v3164_v37, %v3151_v24  ;;  %v3172_v0 = vadd.f32 %v3164_v37, %v3155_v59  ;;  %v4411_v37 = vld [vmem:[%s6094_s15 + $0x20] sm:$0xff]   ;;  %v4414_v23 = vld [vmem:[%s6094_s15 + $0x38] sm:$0xff]   ;;  %s4581_s15 = smov [#allocation11]  }
 0x7a1   :  { %v3175_v50 = vpack.c.bf16 %v3167_v58, %v3167_v58  ;;  %v3179_v34 = vpack.c.bf16 %v3171_v15, %v3171_v15  ;;  %v3174_v16 = vpack.c.bf16 %v3166_v55, %v3166_v55  ;;  %v3178_v44 = vpack.c.bf16 %v3170_v41, %v3170_v41  ;;  %v3810_v15 = vld [vmem:[#allocation8] ss:$0 sm:$0xff]  ;;  %s3689_s21 = sshll.u32 %s4581_s15, 4  ;;  %s3690_s21 = int_to_ptr.vmem [resolvable:$true] %s3689_s21 }
 0x7a2   :  { %v3177_v28 = vpack.c.bf16 %v3169_v14, %v3169_v14  ;;  %v3181_v27 = vpack.c.bf16 %v3173_v40, %v3173_v40  ;;  %v3176_v56 = vpack.c.bf16 %v3168_v12, %v3168_v12  ;;  %v3180_v46 = vpack.c.bf16 %v3172_v0, %v3172_v0  ;;  %s4533_s17 = scalar_lea.vmem %s3690_s21, 32  ;;  %p4538_p13 = scmp.lt.s32.totalorder %s3690_s21, %s3690_s21 }
 0x7a3   :  { %v3266_v60 = vunpack.c.l.b16 %v3179_v34  ;;  %v3265_v2 = vunpack.c.l.b16 %v3178_v44  ;;  %v3262_v31 = vunpack.c.l.b16 %v3175_v50  ;;  %v3261_v22 = vunpack.c.l.b16 %v3174_v16  ;;  %v3843_v44 = vld [vmem:[#allocation10] ss:$0 sm:$0xff]  ;;  %p4534_p12 = scmp.ne.s32.totalorder %s3690_s21, %s4533_s17  ;;  %p4539_p0 = scmp.lt.s32.totalorder %s4533_s17, %s4533_s17 }
 0x7a4   :  { %v3268_v36 = vunpack.c.l.b16 %v3181_v27  ;;  %v3267_v45 = vunpack.c.l.b16 %v3180_v46  ;;  %v3264_v26 = vunpack.c.l.b16 %v3177_v28  ;;  %v3263_v9 = vunpack.c.l.b16 %v3176_v56 }
 0x7a5   :  { %v3271_v47 = vrot.slane %v3266_v60, 7  ;;  %v3269_v49 = vrot.slane %v3265_v2, 7  ;;  %p4540_p1 = por %p4539_p0, %p4538_p13 }
 0x7a6   :  { %v3275_v8 = vrot.slane %v3268_v36, 7  ;;  %v3273_v57 = vrot.slane %v3267_v45, 7 }
 0x7a7   :  { %v3272_v48 = vsel %vm1315_vm10, %v3271_v47, %v3262_v31  ;;  %v3270_v61 = vsel %vm1315_vm10, %v3269_v49, %v3261_v22  ;;  %p4541_p2 = pnand %p4540_p1, %p4534_p12 }
 0x7a8   :  { %v3278_v7 = vpack.c.b16 %v3272_v48, %v3272_v48  ;;  %v3277_v29 = vpack.c.b16 %v3270_v61, %v3270_v61  ;;  %v3276_v63 = vsel %vm1315_vm10, %v3275_v8, %v3264_v26  ;;  %v3274_v13 = vsel %vm1315_vm10, %v3273_v57, %v3263_v9 }
 0x7a9   :  { %v3280_v17 = vpack.c.b16 %v3276_v63, %v3276_v63  ;;  %v3279_v38 = vpack.c.b16 %v3274_v13, %v3274_v13 }
 0x7aa   :  { %3509 = vmatprep.mubr.bf16.mxu1 %v3278_v7 }
 0x7ab   :  { %3510 = vmatmul.mubr.bf16.vlgmr.msra.gmra.mrb[12].mxu1 %v3277_v29 }
 0x7ac   :  { %3923 = vmatpush3.bf16.msra.mxu1 %v4392_v52  ;;  %3549 = vmatprep.mubr.bf16.mxu1 %v3280_v17 }
 0x7ad   :  { %3924 = vmatprep.subr.bf16.mxu1 %v4393_v54 }
 0x7b0   :  { %3925 = vmatpush3.bf16.msra.mxu1 %v4394_v33 }
 0x7b1   :  { %3926 = vmatprep.subr.bf16.mxu1 %v4395_v18 }
 0x7b4   :  { %3927 = vmatpush3.bf16.msra.mxu1 %v4396_v35 }
 0x7b5   :  { %3928 = vmatprep.subr.bf16.mxu1 %v4397_v19 }
 0x7b8   :  { %3929 = vmatpush3.bf16.msra.mxu1 %v4398_v20 }
 0x7b9   :  { %3930 = vmatprep.subr.bf16.mxu1 %v4399_v39 }
 0x7bc   :  { %3931 = vmatpush3.bf16.msra.mxu1 %v4400_v43 }
 0x7bd   :  { %3932 = vmatprep.subr.bf16.mxu1 %v4401_v25 }
 0x7c0   :  { %3933 = vmatpush3.bf16.msra.mxu1 %v4402_v32 }
 0x7c1   :  { %3934 = vmatprep.subr.bf16.mxu1 %v4403_v10 }
 0x7c4   :  { %3935 = vmatpush3.bf16.msra.mxu1 %v4404_v11 }
 0x7c5   :  { %3936 = vmatprep.subr.bf16.mxu1 %v4405_v21 }
 0x7c8   :  { %3937 = vmatpush3.bf16.msra.mxu1 %v4406_v42 }
 0x7c9   :  { %4055 = vmatprep.subr.bf16.mxu1 %v4577_v51 }
 0x7cb   :  { %3550 = vmatmul.mubr.bf16.vlgmr.msra.gmra.mrb[16].mxu1 %v3279_v38 }
 0x7cc   :  { %4071 = vmatprep.mubr.msk.bf16.mxu1 %vm4576_vm12, %v4577_v51  ;;  %4056 = vmatpush3.bf16.msra.mxu1 %v4407_v6 }
 0x7cd   :  { %4057 = vmatprep.subr.bf16.mxu1 %v4577_v51 }
 0x7d0   :  { %4058 = vmatpush3.bf16.msra.mxu1 %v4408_v53 }
 0x7d1   :  { %4059 = vmatprep.subr.bf16.mxu1 %v4577_v51 }
 0x7d4   :  { %4060 = vmatpush3.bf16.msra.mxu1 %v4409_v1 }
 0x7d5   :  { %4061 = vmatprep.subr.bf16.mxu1 %v4577_v51 }
 0x7d8   :  { %4062 = vmatpush3.bf16.msra.mxu1 %v4410_v4 }
 0x7d9   :  { %4063 = vmatprep.subr.bf16.mxu1 %v4577_v51 }
 0x7dc   :  { %4064 = vmatpush3.bf16.msra.mxu1 %v4411_v37 }
 0x7dd   :  { %4065 = vmatprep.subr.bf16.mxu1 %v4577_v51 }
 0x7e0   :  { %4066 = vmatpush3.bf16.msra.mxu1 %v4412_v62 }
 0x7e1   :  { %4067 = vmatprep.subr.bf16.mxu1 %v4577_v51 }
 0x7e4   :  { %4068 = vmatpush3.bf16.msra.mxu1 %v4413_v3 }
 0x7e5   :  { %4069 = vmatprep.subr.bf16.mxu1 %v4577_v51 }
 0x7e8   :  { %4070 = vmatpush3.bf16.msra.mxu1 %v4414_v23 }
 0x87e   :  { %v3916_v30 = vpop.f32.mrb[12].mxu1 }
 0x87f   :  { %v3917_v5 = vpop.f32.mrb[13].mxu1 }
 0x880   :  { %v3918_v24 = vadd.f32 %v3917_v5, %v3916_v30  ;;  %v3919_v59 = vpop.f32.mrb[14].mxu1 }
 0x881   :  { %v3920_v58 = vpop.f32.mrb[15].mxu1 }
 0x882   :  { %v3512_v14 = vadd.f32 %v3918_v24, %v3810_v15 }
 0x89e   :  { %v3938_v55 = vpop.f32.mrb[16].mxu1 }
 0x89f   :  { %v3939_v41 = vpop.f32.mrb[17].mxu1 }
 0x8a0   :  { %v3940_v40 = vadd.f32 %v3939_v41, %v3938_v55  ;;  %v3941_v12 = vpop.f32.mrb[18].mxu1 }
 0x8a1   :  { %v3942_v0 = vpop.f32.mrb[19].mxu1 }
 0x8a2   :  { %v3552_v50 = vadd.f32 %v3940_v40, %v3512_v14 }
 0x8a4   :  { %v3557_v34 = vmax.f32 %v3552_v50, 0.0 }
 0x8a6   :  { %v3558_v16 = vpack.c.bf16 %v3557_v34, %v3557_v34 }
 0x8a8   :  { %4072 = vmatmul.mubr.bf16.vlgmr.msra.gmra.mrb[20].mxu1 %v3558_v16 }
 0x97b   :  { %v3664_v28 = vpop.f32.mrb[20].mxu1 }
 0x97c   :  { %v3665_v51 = vadd.f32 %v3843_v44, %v3664_v28  ;;  %v4073_v27 = vpop.f32.mrb[21].mxu1 }
 0x97d   :  { %v3667_v56 = vpop.f32.mrb[22].mxu1 }
 0x97e   :  { %v4074_v46 = vpop.f32.mrb[23].mxu1  ;;  %v3670_v60 = vsel %vm857_vm9, %v3665_v51, -inf }
 0x97f   :  { %3671 = vmax.xlane.f32.xlu0 %v3670_v60 }
 0xa0c   :  { %v3672_v2 = vpop.xlane.xlu0 %3671 }
 0xa0d   :  { %v3673_v36 = vsub.f32 %v3665_v51, %v3672_v2 }
 0xa0f   :  { %v3674_v45 = vmul.f32 1.442695, %v3673_v36 }
 0xa11   :  { %4419 = vpow2.f32 %v3674_v45 }
 0xa1b   :  { %v4420_v31 = vpop.eup %4419 }
 0xa1c   :  { %v3676_v47 = vsel %vm857_vm9, %v4420_v31, 0.0 }
 0xa1d   :  { %3677 = vadd.xlane.f32.xlu1 %v3676_v47 }
 0xaaa   :  { %v3678_v22 = vpop.xlane.xlu1 %3677 }
 0xaab   :  { %4421 = vlog2.f32 %v3678_v22 }
 0xab5   :  { %v4422_v49 = vpop.eup %4421 }
 0xab6   :  { %v3680_v26 = vmul.f32 0.6931472, %v4422_v49 }
 0xab8   :  { %v3681_v8 = vsub.f32 %v3673_v36, %v3680_v26 }
 0xaba   :  { %3682 = vst [vmem:[#allocation11] sm:$0x3] %v3681_v8 }
 0xabb   :  { %4544 = shalt.err (!%p4541_p2)
}
 0xabc   :  { %s6146_s2 = sld [smem:[#allocation23_spill]] }
 0xac2   :  { %s4545_s27 = scalar_lea.hbm %s6146_s2, 32 }
 0xac3   :  { %p4546_p3 = scmp.ne.s32.totalorder %s6146_s2, %s4545_s27  ;;  %p4549_p4 = scmp.lt.u32.totalorder %s4545_s27, %s6146_s2 }
 0xac5   :  { %p4551_p5 = pnand %p4549_p4, %p4546_p3 }
 0xac7   :  { %4554 = shalt.err (!%p4551_p5)
}
 0xac8   :  { %3692 = dma.vmem_to_hbm [thread:$0]  %s3690_s21, 32, %s6146_s2, [#allocation4]  }
 0xac9   :  { %4561 = dma.done.wait [#allocation4], 32  }
 0xaca   :  { %4562 = vsyncadd [#allocation4], 4294967264 }
 0xacb   :  { %3696 = vsyncpa [#allocation3], 1 }
 0xacc   :  { %3697 = vsyncpa [#allocation6], 1 }
 0xacd   :  { %3698 = vsyncpa [#allocation9], 1 }
 0xace   :  { %3699 = vsyncpa [#allocation4], 1 }

</bundles_post_ra>
